<compile_context>
chip_gen: v5e
topology: v5e:2x2
jax: 0.10.0
libtpu: 0.0.40
codegen_flags: <defaults>
</compile_context>

<pallas_src>
import math
import functools

import jax
import jax.numpy as jnp
from jax.experimental import pallas as pl
from jax.experimental.pallas import tpu as pltpu

# ---------------- small config (synthetic, matches module semantics) ----------------
D_MODEL = 32
FFN_DIM = 64
NUM_QUERIES = 16          # num_queries (small)
NUM_ENC_LAYERS = 2
NUM_DEC_LAYERS = 2
NUM_LEVELS = 2

# MXU input dtype: bf16 halves DMA / vreg footprint and doubles MXU rate on v6e/v7x while
# remaining supported on v5e.  Elementwise / LayerNorm / softmax math stays float32.
MXU_DTYPE = jnp.bfloat16


# ---------------- shared in-kernel helpers ----------------
def _layernorm(y, g, b, eps=1e-5):
    mu = jnp.mean(y, axis=-1, keepdims=True)
    var = jnp.mean((y - mu) ** 2, axis=-1, keepdims=True)
    return (y - mu) * jax.lax.rsqrt(var + eps) * g + b


def _mxu2(a, w):
    # [M, K] x [K, N] -> [M, N], bf16 inputs, f32 accumulation.
    return jnp.dot(a.astype(MXU_DTYPE), w.astype(MXU_DTYPE),
                   preferred_element_type=jnp.float32)


def _mxu3(a, w):
    # [B, M, K] x [K, N] -> [B, M, N] (batch folded into M by the MXU).
    return jax.lax.dot_general(a.astype(MXU_DTYPE), w.astype(MXU_DTYPE),
                               (((2,), (0,)), ((), ())),
                               preferred_element_type=jnp.float32)


def _full_spec(shape):
    nd = len(shape)
    return pl.BlockSpec(shape, lambda i, _nd=nd: (0,) * _nd)


def _cost(flops, transcendentals, in_arrays, out_bytes):
    bytes_accessed = int(out_bytes) + sum(int(a.size) * a.dtype.itemsize for a in in_arrays)
    return pl.CostEstimate(flops=int(flops), transcendentals=int(transcendentals),
                           bytes_accessed=int(bytes_accessed))


# ---------------- Pallas kernels ----------------
def _enc_prop_kernel(src_ref, keep_ref, propT_ref, ref_ref,
                     ew1_ref, eb1_ref, ew2_ref, evec_ref,
                     pw_ref, pvec_ref, bw1_ref, bw2_ref, bw3_ref,
                     logit_ref, coordT_ref, *, n_enc, n_batch, n_tok, d_model):
    # Single program handling all batch elements:
    #   encoder FFN+residual+LN stack (batch folded into M)   -> memory
    #   * keep mask  (gen_encoder_output_proposals masking)   -> output_memory
    #   LayerNorm(enc_output(output_memory))                  -> om
    #   logits = ref_feature . om^T   (ContrastiveAssign, lane-dense [B, 1, N])
    #   coordT = (bbox_MLP(om) + output_proposals)^T          (lane-dense [B, 4, N])
    x = src_ref[...].astype(jnp.float32)                               # [B*N, D]
    for l in range(n_enc):
        h = jnp.maximum(_mxu2(x, ew1_ref[l]) + eb1_ref[l], 0.0)        # [B*N, F]
        y = x + _mxu2(h, ew2_ref[l]) + evec_ref[l, 0:1]
        x = _layernorm(y, evec_ref[l, 1:2], evec_ref[l, 2:3])

    # gen_encoder_output_proposals: zero masked / invalid / padded rows (mask computed in glue).
    om_in = x * keep_ref[...]
    om = _layernorm(_mxu2(om_in, pw_ref[...]) + pvec_ref[0:1],
                    pvec_ref[1:2], pvec_ref[2:3])                      # [B*N, D]

    # bbox MLP hidden layers (still batch-folded in M).
    h = jnp.maximum(_mxu2(om, bw1_ref[...]) + pvec_ref[3:4], 0.0)
    h = jnp.maximum(_mxu2(h, bw2_ref[...]) + pvec_ref[4:5], 0.0)

    om3 = om.reshape(n_batch, n_tok, d_model)
    h3 = h.reshape(n_batch, n_tok, d_model)
    for b in range(n_batch):
        # class logits: [1, D] x [N, D]^T -> [1, N]  (lane-dense store, N = 128).
        logit_ref[b] = jax.lax.dot_general(
            ref_ref[b].astype(MXU_DTYPE), om3[b].astype(MXU_DTYPE),
            (((1,), (1,)), ((), ())), preferred_element_type=jnp.float32)
        # bbox final layer, written transposed: [D, 4]^T x [N, D]^T -> [4, N]
        # (final bias + output_proposals already folded into propT in the wrapper;
        #  inf for masked/invalid rows propagates, matching torch).
        yb = jax.lax.dot_general(
            bw3_ref[...].astype(MXU_DTYPE), h3[b].astype(MXU_DTYPE),
            (((0,), (1,)), ((), ())), preferred_element_type=jnp.float32)
        coordT_ref[b] = (yb + propT_ref[b]).astype(coordT_ref.dtype)


def _decoder_kernel(tgt_ref, wqkv_ref, wo_ref, w1_ref, w2_ref, vec_ref, b1_ref,
                    hs_ref, *, n_layers, scale):
    # All decoder layers (single-head query self-attention + FFN, residual + LN), all batch
    # elements, in one program.  Emits every layer's hidden state (the `hs` stack).
    x = tgt_ref[...].astype(jnp.float32)                               # [B, NQ, D]
    for l in range(n_layers):
        # three lane-0-aligned projections instead of slicing a fused [NQ, 3D] result.
        q = _mxu3(x, wqkv_ref[l, 0]) + vec_ref[l, 0:1]
        k = _mxu3(x, wqkv_ref[l, 1]) + vec_ref[l, 1:2]
        v = _mxu3(x, wqkv_ref[l, 2]) + vec_ref[l, 2:3]
        s = jax.lax.dot_general(q.astype(MXU_DTYPE), k.astype(MXU_DTYPE),
                                (((2,), (2,)), ((0,), (0,))),
                                preferred_element_type=jnp.float32) * scale     # [B, NQ, NQ]
        s = s - jnp.max(s, axis=-1, keepdims=True)
        p = jnp.exp(s)
        p = p * pl.reciprocal(jnp.sum(p, axis=-1, keepdims=True), approx=True)
        a = jax.lax.dot_general(p.astype(MXU_DTYPE), v.astype(MXU_DTYPE),
                                (((2,), (1,)), ((0,), (0,))),
                                preferred_element_type=jnp.float32)             # [B, NQ, D]
        y = _layernorm(x + _mxu3(a, wo_ref[l]) + vec_ref[l, 3:4],
                       vec_ref[l, 4:5], vec_ref[l, 5:6])
        h = jnp.maximum(_mxu3(y, w1_ref[l]) + b1_ref[l], 0.0)
        x = _layernorm(y + _mxu3(h, w2_ref[l]) + vec_ref[l, 6:7],
                       vec_ref[l, 7:8], vec_ref[l, 8:9])
        hs_ref[l] = x.astype(hs_ref.dtype)


# ---------------- pallas_call wrappers ----------------
def enc_proposal_forward(src2d, keep2d, propT, ref_feat, params, n_batch, n_tok):
    M, D = src2d.shape
    Le = NUM_ENC_LAYERS
    F = params["enc_w1"].shape[-1]
    kern = functools.partial(_enc_prop_kernel, n_enc=Le, n_batch=n_batch,
                             n_tok=n_tok, d_model=D)
    flops = (Le * (2 * M * D * F + 2 * M * F * D)     # encoder FFN
             + 2 * M * D * D                          # enc_output
             + 2 * (2 * M * D * D) + 2 * M * D * 4    # bbox MLP
             + 2 * n_batch * n_tok * D)               # class logits
    transcendentals = M * (Le + 1)                    # one rsqrt per LayerNorm row
    in_arrays = (src2d, keep2d, propT, ref_feat,
                 params["enc_w1"], params["enc_b1"], params["enc_w2"], params["enc_vecD"],
                 params["enc_output_w"], params["prop_vecD"],
                 params["bbox_w1"], params["bbox_w2"], params["bbox_w3"])
    out_bytes = 4 * (n_batch * 1 * n_tok + n_batch * 4 * n_tok)
    logits, coordT = pl.pallas_call(
        kern,
        out_shape=(jax.ShapeDtypeStruct((n_batch, 1, n_tok), jnp.float32),
                   jax.ShapeDtypeStruct((n_batch, 4, n_tok), jnp.float32)),
        grid=(1,),   # single program: grid collapsed, batch folded into the matmul M-dim
        in_specs=[_full_spec(a.shape) for a in in_arrays],
        out_specs=(_full_spec((n_batch, 1, n_tok)), _full_spec((n_batch, 4, n_tok))),
        compiler_params=pltpu.CompilerParams(dimension_semantics=("arbitrary",)),
        cost_estimate=_cost(flops, transcendentals, in_arrays, out_bytes),
    )(*in_arrays)
    return logits, coordT


def decoder_forward(tgt, params):
    B, NQ, D = tgt.shape
    L = NUM_DEC_LAYERS
    F = params["dec_w1"].shape[-1]
    M = B * NQ
    kern = functools.partial(_decoder_kernel, n_layers=L, scale=1.0 / math.sqrt(D))
    flops = L * (3 * 2 * M * D * D                    # q, k, v projections
                 + 2 * B * NQ * NQ * D * 2            # scores + p @ v
                 + 2 * M * D * D                      # out projection
                 + 2 * M * D * F + 2 * M * F * D)     # FFN
    transcendentals = L * (B * NQ * NQ + 3 * M)
    in_arrays = (tgt, params["dec_wqkv"], params["dec_wo"], params["dec_w1"],
                 params["dec_w2"], params["dec_vecD"], params["dec_b1"])
    out_bytes = 4 * L * M * D
    return pl.pallas_call(
        kern,
        out_shape=jax.ShapeDtypeStruct((L, B, NQ, D), jnp.float32),
        grid=(1,),
        in_specs=[_full_spec(a.shape) for a in in_arrays],
        out_specs=_full_spec((L, B, NQ, D)),
        compiler_params=pltpu.CompilerParams(dimension_semantics=("arbitrary",)),
        cost_estimate=_cost(flops, transcendentals, in_arrays, out_bytes),
    )(*in_arrays)


# ---------------- deterministic parameter init (synthetic weights) ----------------
def init_params(key, D=D_MODEL, F=FFN_DIM, NQ=NUM_QUERIES,
                n_enc=NUM_ENC_LAYERS, n_dec=NUM_DEC_LAYERS, L=NUM_LEVELS):
    keys = iter(jax.random.split(key, 64))

    def xav(shape):
        lim = math.sqrt(6.0 / (shape[-2] + shape[-1]))
        return jax.random.uniform(next(keys), shape, jnp.float32, -lim, lim)

    def nrm(shape):
        return jax.random.normal(next(keys), shape, jnp.float32)

    wdt = MXU_DTYPE
    zD = jnp.zeros((1, D), jnp.float32)
    oD = jnp.ones((1, D), jnp.float32)

    p = {}
    p["level_embed"] = nrm((L, D))                 # nn.Parameter(num_levels, d_model) (unused here)
    p["tgt_embed"] = nrm((NQ, D))                  # nn.Embedding(num_queries, d_model)

    # encoder layer stacks [L, ...]; matmul weights stored in the MXU input dtype.
    p["enc_w1"] = jnp.stack([xav((D, F)) for _ in range(n_enc)]).astype(wdt)
    p["enc_b1"] = jnp.zeros((n_enc, 1, F), jnp.float32)
    p["enc_w2"] = jnp.stack([xav((F, D)) for _ in range(n_enc)]).astype(wdt)
    # packed per-layer D-width vectors: [ffn_b2, ln_gamma, ln_beta]
    p["enc_vecD"] = jnp.tile(jnp.concatenate([zD, oD, zD], axis=0)[None], (n_enc, 1, 1))

    # two-stage proposal head
    p["enc_output_w"] = xav((D, D)).astype(wdt)
    p["bbox_w1"] = xav((D, D)).astype(wdt)
    p["bbox_w2"] = xav((D, D)).astype(wdt)
    p["bbox_w3"] = xav((D, 4)).astype(wdt)
    p["bbox_b3"] = jnp.zeros((4,), jnp.float32)
    # packed: [enc_output_b, enc_norm_gamma, enc_norm_beta, bbox_b1, bbox_b2]
    p["prop_vecD"] = jnp.concatenate([zD, oD, zD, zD, zD], axis=0)

    # decoder layer stacks; q/k/v weights kept un-fused and lane-0-aligned: [L, 3, D, D]
    p["dec_wqkv"] = jnp.stack(
        [jnp.stack([xav((D, D)) for _ in range(3)]) for _ in range(n_dec)]).astype(wdt)
    p["dec_wo"] = jnp.stack([xav((D, D)) for _ in range(n_dec)]).astype(wdt)
    p["dec_w1"] = jnp.stack([xav((D, F)) for _ in range(n_dec)]).astype(wdt)
    p["dec_b1"] = jnp.zeros((n_dec, 1, F), jnp.float32)
    p["dec_w2"] = jnp.stack([xav((F, D)) for _ in range(n_dec)]).astype(wdt)
    # packed per-layer D-width vectors: [bq, bk, bv, bo, g1, be1, ffn_b2, g2, be2]
    p["dec_vecD"] = jnp.tile(
        jnp.concatenate([zD, zD, zD, zD, oD, zD, zD, oD, zD], axis=0)[None], (n_dec, 1, 1))
    return p


# ---------------- JAX glue reproducing the module's forward ----------------
def gen_encoder_output_proposals(mask_flatten, spatial_shapes):
    """Proposal boxes + validity for the real (un-padded) tokens; masking itself is fused in-kernel."""
    bs, n = mask_flatten.shape
    proposals = []
    cur = 0
    for lvl, (H, W) in enumerate(spatial_shapes):
        mask_l = mask_flatten[:, cur:cur + H * W].reshape(bs, H, W)
        valid_H = jnp.sum(~mask_l[:, :, 0], axis=1).astype(jnp.float32)
        valid_W = jnp.sum(~mask_l[:, 0, :], axis=1).astype(jnp.float32)
        gy, gx = jnp.meshgrid(jnp.arange(H, dtype=jnp.float32),
                              jnp.arange(W, dtype=jnp.float32), indexing="ij")
        grid = jnp.stack([gx, gy], axis=-1)                                    # [H, W, 2]
        scale = jnp.stack([valid_W, valid_H], axis=-1).reshape(bs, 1, 1, 2)
        grid = (grid[None] + 0.5) / scale                                      # [bs, H, W, 2]
        wh = jnp.ones_like(grid) * 0.05 * (2.0 ** lvl)
        proposals.append(jnp.concatenate([grid, wh], axis=-1).reshape(bs, H * W, 4))
        cur += H * W
    props = jnp.concatenate(proposals, axis=1)                                 # [bs, n, 4]
    valid = jnp.all((props > 0.01) & (props < 0.99), axis=-1)
    props = jnp.log(props / (1.0 - props))                                     # inverse sigmoid
    props = jnp.where(mask_flatten[..., None], jnp.inf, props)
    props = jnp.where(~valid[..., None], jnp.inf, props)
    keep = (~mask_flatten) & valid                                             # rows kept in output_memory
    return props, keep


def get_two_stage_proposal(params, src_flatten, mask_flatten, spatial_shapes, ref_dict):
    bs, n_real, d = src_flatten.shape
    # pad the flattened sequence to a lane-dense length (80 -> 128); padded tokens behave exactly
    # like key_padding_mask tokens (memory zeroed, proposals = inf) and are excluded from top_k.
    n_pad = ((n_real + 127) // 128) * 128
    pad = n_pad - n_real
    props, keep = gen_encoder_output_proposals(mask_flatten, spatial_shapes)
    props = jnp.pad(props, ((0, 0), (0, pad), (0, 0)), constant_values=jnp.inf)
    keep = jnp.pad(keep, ((0, 0), (0, pad)))                                   # False on padded tokens
    src_p = jnp.pad(src_flatten, ((0, 0), (0, pad), (0, 0)))

    # lane-dense transposed proposals with the bbox head's final bias folded in (exact).
    propT = jnp.transpose(props, (0, 2, 1)) + params["bbox_b3"].reshape(1, 4, 1)   # [bs, 4, n_pad]
    keep_bd = jnp.broadcast_to(keep.astype(jnp.float32)[:, :, None],
                               (bs, n_pad, d)).reshape(bs * n_pad, d)

    # Fused: encoder stack + output_memory masking + enc_output/LN + enc_out_class_embed
    # + enc_out_bbox_embed (+ proposals) in a single Pallas kernel; `memory`/`om` never leave VMEM.
    logits, coordT = enc_proposal_forward(
        src_p.reshape(bs * n_pad, d), keep_bd, propT,
        ref_dict["encoded_ref_feature"], params, bs, n_pad)

    topk = NUM_QUERIES
    topk_logits = logits[:, 0, :]                                              # [bs, n_pad]
    # the artificial lane-padding tokens must never be selected (real masked tokens keep torch behavior)
    topk_logits = jnp.where(jnp.arange(n_pad)[None, :] >= n_real, -jnp.inf, topk_logits)
    # TODO(synk): torch.topk has no clean Pallas equivalent; done with lax.top_k in glue.
    _, topk_proposals = jax.lax.top_k(topk_logits, topk)                       # [bs, topk]

    coord = jnp.transpose(coordT, (0, 2, 1))                                   # [bs, n_pad, 4]
    idx4 = jnp.broadcast_to(topk_proposals[..., None], (bs, topk, 4))
    refpoint_embed = jax.lax.stop_gradient(jnp.take_along_axis(coord, idx4, axis=1))
    init_box_proposal = jax.nn.sigmoid(jnp.take_along_axis(props, idx4, axis=1))
    # tgt_undetach gather is dead code when learnable_tgt_init=True (tgt is overwritten below); skipped.
    tgt = jnp.broadcast_to(params["tgt_embed"][None], (bs, topk, d))
    return refpoint_embed, tgt, init_box_proposal


def deformable_transformer_forward(params, src_flatten, lvl_pos_embed_flatten,
                                   level_start_index, spatial_shapes, valid_ratios,
                                   mask_flatten, prompt_type):
    bs, n, d = src_flatten.shape

    # ---- universal-prompt reference features (default path: zeros) ----
    # TODO(synk): fine/coarse grained prompt embeddings are not defined in __init__; only the
    # default zeros path is reproduced.  pad_mask / self_attn_mask are constructed but unused,
    # matching the reference.
    crop_region_features = jnp.zeros((bs, 1, d), jnp.float32)
    pad_mask = jnp.ones((bs, 1), dtype=bool)
    self_attn_mask = jnp.ones((bs, 1, 1), jnp.float32)
    ref_dict = dict(encoded_ref_feature=crop_region_features, pad_mask=pad_mask,
                    self_attn_mask=self_attn_mask, prompt_type="universal_prompt")

    # ---- fused encoder + two-stage proposal head (single pallas_call) ----
    # TODO(synk): MSDeformAttn sampling (data-dependent bilinear gather across levels, consuming
    # lvl_pos_embed_flatten / level_start_index / valid_ratios) has no clean BlockSpec expression;
    # encoder layers here run their FFN + LayerNorm sub-blocks only.
    refpoint_embed, tgt, _init_box_proposal = get_two_stage_proposal(
        params, src_flatten, mask_flatten, spatial_shapes, ref_dict)

    # ---- decoder ----
    # TODO(synk): deformable cross-attention and iterative box refinement live in the external
    # decoder config; decoder layers here run query self-attention + FFN fused in one Pallas kernel,
    # so `references` is a broadcast of the initial refpoints.
    hs = decoder_forward(tgt, params)                       # [num_dec_layers, bs, num_queries, d_model]
    ref0 = jax.nn.sigmoid(refpoint_embed)
    references = jnp.broadcast_to(ref0[None], (NUM_DEC_LAYERS + 1, bs, NUM_QUERIES, 4))
    return hs, references, ref_dict


# ---------------- main ----------------
if __name__ == "__main__":
    key = jax.random.PRNGKey(0)
    k_p, k_src, k_pos = jax.random.split(key, 3)

    bs = 2
    spatial_shapes = [(8, 8), (4, 4)]
    n = sum(h * w for h, w in spatial_shapes)
    level_start_index = [0, spatial_shapes[0][0] * spatial_shapes[0][1]]

    params = init_params(k_p)
    src_flatten = jax.random.normal(k_src, (bs, n, D_MODEL), jnp.float32)
    lvl_pos_embed_flatten = jax.random.normal(k_pos, (bs, n, D_MODEL), jnp.float32)
    mask_flatten = jnp.zeros((bs, n), dtype=bool)
    valid_ratios = jnp.ones((bs, NUM_LEVELS, 2), jnp.float32)

    hs, references, ref_dict = deformable_transformer_forward(
        params, src_flatten, lvl_pos_embed_flatten, level_start_index,
        spatial_shapes, valid_ratios, mask_flatten, prompt_type="universal_prompt")
    jax.block_until_ready((hs, references, ref_dict["encoded_ref_feature"]))

    assert hs.shape == (NUM_DEC_LAYERS, bs, NUM_QUERIES, D_MODEL)
    assert references.shape == (NUM_DEC_LAYERS + 1, bs, NUM_QUERIES, 4)
    assert bool(jnp.all(jnp.isfinite(hs))) and bool(jnp.all(jnp.isfinite(references)))
    print("KERNEL_OK")
</pallas_src>

<mosaic_0001>
module attributes {stable_mosaic.version = 11 : i64} {
  func.func @_enc_prop_kernel(%arg0: i32, %arg1: memref<256x32xf32, #tpu.memory_space<vmem>>, %arg2: memref<256x32xf32, #tpu.memory_space<vmem>>, %arg3: memref<2x4x128xf32, #tpu.memory_space<vmem>>, %arg4: memref<2x1x32xf32, #tpu.memory_space<vmem>>, %arg5: memref<2x32x64xbf16, #tpu.memory_space<vmem>>, %arg6: memref<2x1x64xf32, #tpu.memory_space<vmem>>, %arg7: memref<2x64x32xbf16, #tpu.memory_space<vmem>>, %arg8: memref<2x3x32xf32, #tpu.memory_space<vmem>>, %arg9: memref<32x32xbf16, #tpu.memory_space<vmem>>, %arg10: memref<5x32xf32, #tpu.memory_space<vmem>>, %arg11: memref<32x32xbf16, #tpu.memory_space<vmem>>, %arg12: memref<32x32xbf16, #tpu.memory_space<vmem>>, %arg13: memref<32x4xbf16, #tpu.memory_space<vmem>>, %arg14: memref<2x1x128xf32, #tpu.memory_space<vmem>>, %arg15: memref<2x4x128xf32, #tpu.memory_space<vmem>>) attributes {dimension_semantics = [#tpu.dimension_semantics<arbitrary>], iteration_bounds = array<i64: 1>, scalar_prefetch = 0 : i64, scratch_operands = 0 : i64, tpu.core_type = #tpu.core_type<tc>, window_params = [{pipeline_mode = #tpu.pipeline_mode<synchronous>, transform_indices = @transform_0, window_bounds = array<i64: 256, 32>}, {pipeline_mode = #tpu.pipeline_mode<synchronous>, transform_indices = @transform_1, window_bounds = array<i64: 256, 32>}, {pipeline_mode = #tpu.pipeline_mode<synchronous>, transform_indices = @transform_2, window_bounds = array<i64: 2, 4, 128>}, {pipeline_mode = #tpu.pipeline_mode<synchronous>, transform_indices = @transform_3, window_bounds = array<i64: 2, 1, 32>}, {pipeline_mode = #tpu.pipeline_mode<synchronous>, transform_indices = @transform_4, window_bounds = array<i64: 2, 32, 64>}, {pipeline_mode = #tpu.pipeline_mode<synchronous>, transform_indices = @transform_5, window_bounds = array<i64: 2, 1, 64>}, {pipeline_mode = #tpu.pipeline_mode<synchronous>, transform_indices = @transform_6, window_bounds = array<i64: 2, 64, 32>}, {pipeline_mode = #tpu.pipeline_mode<synchronous>, transform_indices = @transform_7, window_bounds = array<i64: 2, 3, 32>}, {pipeline_mode = #tpu.pipeline_mode<synchronous>, transform_indices = @transform_8, window_bounds = array<i64: 32, 32>}, {pipeline_mode = #tpu.pipeline_mode<synchronous>, transform_indices = @transform_9, window_bounds = array<i64: 5, 32>}, {pipeline_mode = #tpu.pipeline_mode<synchronous>, transform_indices = @transform_10, window_bounds = array<i64: 32, 32>}, {pipeline_mode = #tpu.pipeline_mode<synchronous>, transform_indices = @transform_11, window_bounds = array<i64: 32, 32>}, {pipeline_mode = #tpu.pipeline_mode<synchronous>, transform_indices = @transform_12, window_bounds = array<i64: 32, 4>}, {pipeline_mode = #tpu.pipeline_mode<synchronous>, transform_indices = @transform_13, window_bounds = array<i64: 2, 1, 128>}, {pipeline_mode = #tpu.pipeline_mode<synchronous>, transform_indices = @transform_14, window_bounds = array<i64: 2, 4, 128>}]} {
    %c0 = arith.constant 0 : index
    %c0_0 = arith.constant 0 : index
    %0 = vector.load %arg1[%c0, %c0_0] : memref<256x32xf32, #tpu.memory_space<vmem>>, vector<256x32xf32>
    %c0_1 = arith.constant 0 : index
    %c0_2 = arith.constant 0 : index
    %c0_3 = arith.constant 0 : index
    %1 = vector.load %arg5[%c0_1, %c0_2, %c0_3] : memref<2x32x64xbf16, #tpu.memory_space<vmem>>, vector<1x32x64xbf16>
    %2 = vector.shape_cast %1 : vector<1x32x64xbf16> to vector<32x64xbf16>
    %3 = arith.truncf %0 : vector<256x32xf32> to vector<256x32xbf16>
    %cst = arith.constant dense<0.000000e+00> : vector<256x64xf32>
    %4 = tpu.matmul %3, %2, %cst {dimension_numbers = #tpu.dot_dimension_numbers<[1], [0], [0], [1], [0, 0, 1, 1], [], []>} : vector<256x32xbf16>, vector<32x64xbf16>, vector<256x64xf32> -> vector<256x64xf32>
    %c0_4 = arith.constant 0 : index
    %c0_5 = arith.constant 0 : index
    %c0_6 = arith.constant 0 : index
    %5 = vector.load %arg6[%c0_4, %c0_5, %c0_6] : memref<2x1x64xf32, #tpu.memory_space<vmem>>, vector<1x1x64xf32>
    %6 = vector.shape_cast %5 : vector<1x1x64xf32> to vector<1x64xf32>
    %7 = vector.broadcast %6 : vector<1x64xf32> to vector<256x64xf32>
    %8 = arith.addf %4, %7 : vector<256x64xf32>
    %cst_7 = arith.constant 0.000000e+00 : f32
    %9 = vector.broadcast %cst_7 : f32 to vector<256x64xf32>
    %10 = arith.maximumf %8, %9 : vector<256x64xf32>
    %c0_8 = arith.constant 0 : index
    %c0_9 = arith.constant 0 : index
    %c0_10 = arith.constant 0 : index
    %11 = vector.load %arg7[%c0_8, %c0_9, %c0_10] : memref<2x64x32xbf16, #tpu.memory_space<vmem>>, vector<1x64x32xbf16>
    %12 = vector.shape_cast %11 : vector<1x64x32xbf16> to vector<64x32xbf16>
    %13 = arith.truncf %10 : vector<256x64xf32> to vector<256x64xbf16>
    %cst_11 = arith.constant dense<0.000000e+00> : vector<256x32xf32>
    %14 = tpu.matmul %13, %12, %cst_11 {dimension_numbers = #tpu.dot_dimension_numbers<[1], [0], [0], [1], [0, 0, 1, 1], [], []>} : vector<256x64xbf16>, vector<64x32xbf16>, vector<256x32xf32> -> vector<256x32xf32>
    %15 = arith.addf %0, %14 : vector<256x32xf32>
    %c0_12 = arith.constant 0 : index
    %c0_13 = arith.constant 0 : index
    %c0_14 = arith.constant 0 : index
    %16 = vector.load %arg8[%c0_12, %c0_13, %c0_14] : memref<2x3x32xf32, #tpu.memory_space<vmem>>, vector<1x1x32xf32>
    %17 = vector.shape_cast %16 : vector<1x1x32xf32> to vector<1x32xf32>
    %18 = vector.broadcast %17 : vector<1x32xf32> to vector<256x32xf32>
    %19 = arith.addf %15, %18 : vector<256x32xf32>
    %c0_15 = arith.constant 0 : index
    %c1 = arith.constant 1 : index
    %c0_16 = arith.constant 0 : index
    %20 = vector.load %arg8[%c0_15, %c1, %c0_16] : memref<2x3x32xf32, #tpu.memory_space<vmem>>, vector<1x1x32xf32>
    %21 = vector.shape_cast %20 : vector<1x1x32xf32> to vector<1x32xf32>
    %c0_17 = arith.constant 0 : index
    %c2 = arith.constant 2 : index
    %c0_18 = arith.constant 0 : index
    %22 = vector.load %arg8[%c0_17, %c2, %c0_18] : memref<2x3x32xf32, #tpu.memory_space<vmem>>, vector<1x1x32xf32>
    %23 = vector.shape_cast %22 : vector<1x1x32xf32> to vector<1x32xf32>
    %cst_19 = arith.constant dense<0.000000e+00> : vector<256xf32>
    %24 = vector.multi_reduction <add>, %19, %cst_19 [1] : vector<256x32xf32> to vector<256xf32>
    %25 = vector.shape_cast %24 : vector<256xf32> to vector<256x1xf32>
    %cst_20 = arith.constant 3.200000e+01 : f32
    %26 = vector.broadcast %cst_20 : f32 to vector<256x1xf32>
    %27 = arith.divf %25, %26 : vector<256x1xf32>
    %28 = vector.broadcast %27 : vector<256x1xf32> to vector<256x32xf32>
    %29 = arith.subf %19, %28 : vector<256x32xf32>
    %30 = arith.mulf %29, %29 : vector<256x32xf32>
    %cst_21 = arith.constant dense<0.000000e+00> : vector<256xf32>
    %31 = vector.multi_reduction <add>, %30, %cst_21 [1] : vector<256x32xf32> to vector<256xf32>
    %32 = vector.shape_cast %31 : vector<256xf32> to vector<256x1xf32>
    %cst_22 = arith.constant 3.200000e+01 : f32
    %33 = vector.broadcast %cst_22 : f32 to vector<256x1xf32>
    %34 = arith.divf %32, %33 : vector<256x1xf32>
    %35 = vector.broadcast %27 : vector<256x1xf32> to vector<256x32xf32>
    %36 = arith.subf %19, %35 : vector<256x32xf32>
    %cst_23 = arith.constant 9.99999974E-6 : f32
    %37 = vector.broadcast %cst_23 : f32 to vector<256x1xf32>
    %38 = arith.addf %34, %37 : vector<256x1xf32>
    %39 = math.rsqrt %38 : vector<256x1xf32>
    %40 = vector.broadcast %39 : vector<256x1xf32> to vector<256x32xf32>
    %41 = arith.mulf %36, %40 : vector<256x32xf32>
    %42 = vector.broadcast %21 : vector<1x32xf32> to vector<256x32xf32>
    %43 = arith.mulf %41, %42 : vector<256x32xf32>
    %44 = vector.broadcast %23 : vector<1x32xf32> to vector<256x32xf32>
    %45 = arith.addf %43, %44 : vector<256x32xf32>
    %c1_24 = arith.constant 1 : index
    %c0_25 = arith.constant 0 : index
    %c0_26 = arith.constant 0 : index
    %46 = vector.load %arg5[%c1_24, %c0_25, %c0_26] : memref<2x32x64xbf16, #tpu.memory_space<vmem>>, vector<1x32x64xbf16>
    %47 = vector.shape_cast %46 : vector<1x32x64xbf16> to vector<32x64xbf16>
    %48 = arith.truncf %45 : vector<256x32xf32> to vector<256x32xbf16>
    %cst_27 = arith.constant dense<0.000000e+00> : vector<256x64xf32>
    %49 = tpu.matmul %48, %47, %cst_27 {dimension_numbers = #tpu.dot_dimension_numbers<[1], [0], [0], [1], [0, 0, 1, 1], [], []>} : vector<256x32xbf16>, vector<32x64xbf16>, vector<256x64xf32> -> vector<256x64xf32>
    %c1_28 = arith.constant 1 : index
    %c0_29 = arith.constant 0 : index
    %c0_30 = arith.constant 0 : index
    %50 = vector.load %arg6[%c1_28, %c0_29, %c0_30] : memref<2x1x64xf32, #tpu.memory_space<vmem>>, vector<1x1x64xf32>
    %51 = vector.shape_cast %50 : vector<1x1x64xf32> to vector<1x64xf32>
    %52 = vector.broadcast %51 : vector<1x64xf32> to vector<256x64xf32>
    %53 = arith.addf %49, %52 : vector<256x64xf32>
    %cst_31 = arith.constant 0.000000e+00 : f32
    %54 = vector.broadcast %cst_31 : f32 to vector<256x64xf32>
    %55 = arith.maximumf %53, %54 : vector<256x64xf32>
    %c1_32 = arith.constant 1 : index
    %c0_33 = arith.constant 0 : index
    %c0_34 = arith.constant 0 : index
    %56 = vector.load %arg7[%c1_32, %c0_33, %c0_34] : memref<2x64x32xbf16, #tpu.memory_space<vmem>>, vector<1x64x32xbf16>
    %57 = vector.shape_cast %56 : vector<1x64x32xbf16> to vector<64x32xbf16>
    %58 = arith.truncf %55 : vector<256x64xf32> to vector<256x64xbf16>
    %cst_35 = arith.constant dense<0.000000e+00> : vector<256x32xf32>
    %59 = tpu.matmul %58, %57, %cst_35 {dimension_numbers = #tpu.dot_dimension_numbers<[1], [0], [0], [1], [0, 0, 1, 1], [], []>} : vector<256x64xbf16>, vector<64x32xbf16>, vector<256x32xf32> -> vector<256x32xf32>
    %60 = arith.addf %45, %59 : vector<256x32xf32>
    %c1_36 = arith.constant 1 : index
    %c0_37 = arith.constant 0 : index
    %c0_38 = arith.constant 0 : index
    %61 = vector.load %arg8[%c1_36, %c0_37, %c0_38] : memref<2x3x32xf32, #tpu.memory_space<vmem>>, vector<1x1x32xf32>
    %62 = vector.shape_cast %61 : vector<1x1x32xf32> to vector<1x32xf32>
    %63 = vector.broadcast %62 : vector<1x32xf32> to vector<256x32xf32>
    %64 = arith.addf %60, %63 : vector<256x32xf32>
    %c1_39 = arith.constant 1 : index
    %c1_40 = arith.constant 1 : index
    %c0_41 = arith.constant 0 : index
    %65 = vector.load %arg8[%c1_39, %c1_40, %c0_41] : memref<2x3x32xf32, #tpu.memory_space<vmem>>, vector<1x1x32xf32>
    %66 = vector.shape_cast %65 : vector<1x1x32xf32> to vector<1x32xf32>
    %c1_42 = arith.constant 1 : index
    %c2_43 = arith.constant 2 : index
    %c0_44 = arith.constant 0 : index
    %67 = vector.load %arg8[%c1_42, %c2_43, %c0_44] : memref<2x3x32xf32, #tpu.memory_space<vmem>>, vector<1x1x32xf32>
    %68 = vector.shape_cast %67 : vector<1x1x32xf32> to vector<1x32xf32>
    %cst_45 = arith.constant dense<0.000000e+00> : vector<256xf32>
    %69 = vector.multi_reduction <add>, %64, %cst_45 [1] : vector<256x32xf32> to vector<256xf32>
    %70 = vector.shape_cast %69 : vector<256xf32> to vector<256x1xf32>
    %cst_46 = arith.constant 3.200000e+01 : f32
    %71 = vector.broadcast %cst_46 : f32 to vector<256x1xf32>
    %72 = arith.divf %70, %71 : vector<256x1xf32>
    %73 = vector.broadcast %72 : vector<256x1xf32> to vector<256x32xf32>
    %74 = arith.subf %64, %73 : vector<256x32xf32>
    %75 = arith.mulf %74, %74 : vector<256x32xf32>
    %cst_47 = arith.constant dense<0.000000e+00> : vector<256xf32>
    %76 = vector.multi_reduction <add>, %75, %cst_47 [1] : vector<256x32xf32> to vector<256xf32>
    %77 = vector.shape_cast %76 : vector<256xf32> to vector<256x1xf32>
    %cst_48 = arith.constant 3.200000e+01 : f32
    %78 = vector.broadcast %cst_48 : f32 to vector<256x1xf32>
    %79 = arith.divf %77, %78 : vector<256x1xf32>
    %80 = vector.broadcast %72 : vector<256x1xf32> to vector<256x32xf32>
    %81 = arith.subf %64, %80 : vector<256x32xf32>
    %cst_49 = arith.constant 9.99999974E-6 : f32
    %82 = vector.broadcast %cst_49 : f32 to vector<256x1xf32>
    %83 = arith.addf %79, %82 : vector<256x1xf32>
    %84 = math.rsqrt %83 : vector<256x1xf32>
    %85 = vector.broadcast %84 : vector<256x1xf32> to vector<256x32xf32>
    %86 = arith.mulf %81, %85 : vector<256x32xf32>
    %87 = vector.broadcast %66 : vector<1x32xf32> to vector<256x32xf32>
    %88 = arith.mulf %86, %87 : vector<256x32xf32>
    %89 = vector.broadcast %68 : vector<1x32xf32> to vector<256x32xf32>
    %90 = arith.addf %88, %89 : vector<256x32xf32>
    %c0_50 = arith.constant 0 : index
    %c0_51 = arith.constant 0 : index
    %91 = vector.load %arg2[%c0_50, %c0_51] : memref<256x32xf32, #tpu.memory_space<vmem>>, vector<256x32xf32>
    %92 = arith.mulf %90, %91 : vector<256x32xf32>
    %c0_52 = arith.constant 0 : index
    %c0_53 = arith.constant 0 : index
    %93 = vector.load %arg9[%c0_52, %c0_53] : memref<32x32xbf16, #tpu.memory_space<vmem>>, vector<32x32xbf16>
    %94 = arith.truncf %92 : vector<256x32xf32> to vector<256x32xbf16>
    %cst_54 = arith.constant dense<0.000000e+00> : vector<256x32xf32>
    %95 = tpu.matmul %94, %93, %cst_54 {dimension_numbers = #tpu.dot_dimension_numbers<[1], [0], [0], [1], [0, 0, 1, 1], [], []>} : vector<256x32xbf16>, vector<32x32xbf16>, vector<256x32xf32> -> vector<256x32xf32>
    %c0_55 = arith.constant 0 : index
    %c0_56 = arith.constant 0 : index
    %96 = vector.load %arg10[%c0_55, %c0_56] : memref<5x32xf32, #tpu.memory_space<vmem>>, vector<1x32xf32>
    %97 = vector.broadcast %96 : vector<1x32xf32> to vector<256x32xf32>
    %98 = arith.addf %95, %97 : vector<256x32xf32>
    %c1_57 = arith.constant 1 : index
    %c0_58 = arith.constant 0 : index
    %99 = vector.load %arg10[%c1_57, %c0_58] : memref<5x32xf32, #tpu.memory_space<vmem>>, vector<1x32xf32>
    %c2_59 = arith.constant 2 : index
    %c0_60 = arith.constant 0 : index
    %100 = vector.load %arg10[%c2_59, %c0_60] : memref<5x32xf32, #tpu.memory_space<vmem>>, vector<1x32xf32>
    %cst_61 = arith.constant dense<0.000000e+00> : vector<256xf32>
    %101 = vector.multi_reduction <add>, %98, %cst_61 [1] : vector<256x32xf32> to vector<256xf32>
    %102 = vector.shape_cast %101 : vector<256xf32> to vector<256x1xf32>
    %cst_62 = arith.constant 3.200000e+01 : f32
    %103 = vector.broadcast %cst_62 : f32 to vector<256x1xf32>
    %104 = arith.divf %102, %103 : vector<256x1xf32>
    %105 = vector.broadcast %104 : vector<256x1xf32> to vector<256x32xf32>
    %106 = arith.subf %98, %105 : vector<256x32xf32>
    %107 = arith.mulf %106, %106 : vector<256x32xf32>
    %cst_63 = arith.constant dense<0.000000e+00> : vector<256xf32>
    %108 = vector.multi_reduction <add>, %107, %cst_63 [1] : vector<256x32xf32> to vector<256xf32>
    %109 = vector.shape_cast %108 : vector<256xf32> to vector<256x1xf32>
    %cst_64 = arith.constant 3.200000e+01 : f32
    %110 = vector.broadcast %cst_64 : f32 to vector<256x1xf32>
    %111 = arith.divf %109, %110 : vector<256x1xf32>
    %112 = vector.broadcast %104 : vector<256x1xf32> to vector<256x32xf32>
    %113 = arith.subf %98, %112 : vector<256x32xf32>
    %cst_65 = arith.constant 9.99999974E-6 : f32
    %114 = vector.broadcast %cst_65 : f32 to vector<256x1xf32>
    %115 = arith.addf %111, %114 : vector<256x1xf32>
    %116 = math.rsqrt %115 : vector<256x1xf32>
    %117 = vector.broadcast %116 : vector<256x1xf32> to vector<256x32xf32>
    %118 = arith.mulf %113, %117 : vector<256x32xf32>
    %119 = vector.broadcast %99 : vector<1x32xf32> to vector<256x32xf32>
    %120 = arith.mulf %118, %119 : vector<256x32xf32>
    %121 = vector.broadcast %100 : vector<1x32xf32> to vector<256x32xf32>
    %122 = arith.addf %120, %121 : vector<256x32xf32>
    %c0_66 = arith.constant 0 : index
    %c0_67 = arith.constant 0 : index
    %123 = vector.load %arg11[%c0_66, %c0_67] : memref<32x32xbf16, #tpu.memory_space<vmem>>, vector<32x32xbf16>
    %124 = arith.truncf %122 : vector<256x32xf32> to vector<256x32xbf16>
    %cst_68 = arith.constant dense<0.000000e+00> : vector<256x32xf32>
    %125 = tpu.matmul %124, %123, %cst_68 {dimension_numbers = #tpu.dot_dimension_numbers<[1], [0], [0], [1], [0, 0, 1, 1], [], []>} : vector<256x32xbf16>, vector<32x32xbf16>, vector<256x32xf32> -> vector<256x32xf32>
    %c3 = arith.constant 3 : index
    %c0_69 = arith.constant 0 : index
    %126 = vector.load %arg10[%c3, %c0_69] : memref<5x32xf32, #tpu.memory_space<vmem>>, vector<1x32xf32>
    %127 = vector.broadcast %126 : vector<1x32xf32> to vector<256x32xf32>
    %128 = arith.addf %125, %127 : vector<256x32xf32>
    %cst_70 = arith.constant 0.000000e+00 : f32
    %129 = vector.broadcast %cst_70 : f32 to vector<256x32xf32>
    %130 = arith.maximumf %128, %129 : vector<256x32xf32>
    %c0_71 = arith.constant 0 : index
    %c0_72 = arith.constant 0 : index
    %131 = vector.load %arg12[%c0_71, %c0_72] : memref<32x32xbf16, #tpu.memory_space<vmem>>, vector<32x32xbf16>
    %132 = arith.truncf %130 : vector<256x32xf32> to vector<256x32xbf16>
    %cst_73 = arith.constant dense<0.000000e+00> : vector<256x32xf32>
    %133 = tpu.matmul %132, %131, %cst_73 {dimension_numbers = #tpu.dot_dimension_numbers<[1], [0], [0], [1], [0, 0, 1, 1], [], []>} : vector<256x32xbf16>, vector<32x32xbf16>, vector<256x32xf32> -> vector<256x32xf32>
    %c4 = arith.constant 4 : index
    %c0_74 = arith.constant 0 : index
    %134 = vector.load %arg10[%c4, %c0_74] : memref<5x32xf32, #tpu.memory_space<vmem>>, vector<1x32xf32>
    %135 = vector.broadcast %134 : vector<1x32xf32> to vector<256x32xf32>
    %136 = arith.addf %133, %135 : vector<256x32xf32>
    %cst_75 = arith.constant 0.000000e+00 : f32
    %137 = vector.broadcast %cst_75 : f32 to vector<256x32xf32>
    %138 = arith.maximumf %136, %137 : vector<256x32xf32>
    %139 = vector.shape_cast %122 : vector<256x32xf32> to vector<2x128x32xf32>
    %140 = vector.shape_cast %138 : vector<256x32xf32> to vector<2x128x32xf32>
    %c0_76 = arith.constant 0 : index
    %c0_77 = arith.constant 0 : index
    %c0_78 = arith.constant 0 : index
    %141 = vector.load %arg4[%c0_76, %c0_77, %c0_78] : memref<2x1x32xf32, #tpu.memory_space<vmem>>, vector<1x1x32xf32>
    %142 = vector.shape_cast %141 : vector<1x1x32xf32> to vector<1x32xf32>
    %143 = arith.truncf %142 : vector<1x32xf32> to vector<1x32xbf16>
    %144 = vector.extract_strided_slice %139 {offsets = [0, 0, 0], sizes = [1, 128, 32], strides = [1, 1, 1]} : vector<2x128x32xf32> to vector<1x128x32xf32>
    %145 = vector.shape_cast %144 : vector<1x128x32xf32> to vector<128x32xf32>
    %146 = arith.truncf %145 : vector<128x32xf32> to vector<128x32xbf16>
    %cst_79 = arith.constant dense<0.000000e+00> : vector<1x128xf32>
    %147 = tpu.matmul %143, %146, %cst_79 {dimension_numbers = #tpu.dot_dimension_numbers<[1], [1], [0], [0], [0, 0, 1, 0], [], []>} : vector<1x32xbf16>, vector<128x32xbf16>, vector<1x128xf32> -> vector<1x128xf32>
    %c0_80 = arith.constant 0 : index
    %c0_81 = arith.constant 0 : index
    %c0_82 = arith.constant 0 : index
    %148 = vector.load %arg14[%c0_80, %c0_81, %c0_82] : memref<2x1x128xf32, #tpu.memory_space<vmem>>, vector<1x1x128xf32>
    %149 = vector.shape_cast %148 : vector<1x1x128xf32> to vector<1x128xf32>
    %150 = vector.shape_cast %147 : vector<1x128xf32> to vector<1x1x128xf32>
    tpu.vector_store %arg14[%c0_80, %c0_81, %c0_82], %150 {strides = array<i32>} : memref<2x1x128xf32, #tpu.memory_space<vmem>>, vector<1x1x128xf32>,
    %c0_83 = arith.constant 0 : index
    %c0_84 = arith.constant 0 : index
    %151 = vector.load %arg13[%c0_83, %c0_84] : memref<32x4xbf16, #tpu.memory_space<vmem>>, vector<32x4xbf16>
    %152 = vector.extract_strided_slice %140 {offsets = [0, 0, 0], sizes = [1, 128, 32], strides = [1, 1, 1]} : vector<2x128x32xf32> to vector<1x128x32xf32>
    %153 = vector.shape_cast %152 : vector<1x128x32xf32> to vector<128x32xf32>
    %154 = arith.truncf %153 : vector<128x32xf32> to vector<128x32xbf16>
    %cst_85 = arith.constant dense<0.000000e+00> : vector<4x128xf32>
    %155 = tpu.matmul %151, %154, %cst_85 {dimension_numbers = #tpu.dot_dimension_numbers<[0], [1], [1], [0], [0, 1, 1, 0], [], []>} : vector<32x4xbf16>, vector<128x32xbf16>, vector<4x128xf32> -> vector<4x128xf32>
    %c0_86 = arith.constant 0 : index
    %c0_87 = arith.constant 0 : index
    %c0_88 = arith.constant 0 : index
    %156 = vector.load %arg3[%c0_86, %c0_87, %c0_88] : memref<2x4x128xf32, #tpu.memory_space<vmem>>, vector<1x4x128xf32>
    %157 = vector.shape_cast %156 : vector<1x4x128xf32> to vector<4x128xf32>
    %158 = arith.addf %155, %157 : vector<4x128xf32>
    %c0_89 = arith.constant 0 : index
    %c0_90 = arith.constant 0 : index
    %c0_91 = arith.constant 0 : index
    %159 = vector.load %arg15[%c0_89, %c0_90, %c0_91] : memref<2x4x128xf32, #tpu.memory_space<vmem>>, vector<1x4x128xf32>
    %160 = vector.shape_cast %159 : vector<1x4x128xf32> to vector<4x128xf32>
    %161 = vector.shape_cast %158 : vector<4x128xf32> to vector<1x4x128xf32>
    tpu.vector_store %arg15[%c0_89, %c0_90, %c0_91], %161 {strides = array<i32>} : memref<2x4x128xf32, #tpu.memory_space<vmem>>, vector<1x4x128xf32>,
    %c1_92 = arith.constant 1 : index
    %c0_93 = arith.constant 0 : index
    %c0_94 = arith.constant 0 : index
    %162 = vector.load %arg4[%c1_92, %c0_93, %c0_94] : memref<2x1x32xf32, #tpu.memory_space<vmem>>, vector<1x1x32xf32>
    %163 = vector.shape_cast %162 : vector<1x1x32xf32> to vector<1x32xf32>
    %164 = arith.truncf %163 : vector<1x32xf32> to vector<1x32xbf16>
    %165 = vector.extract_strided_slice %139 {offsets = [1, 0, 0], sizes = [1, 128, 32], strides = [1, 1, 1]} : vector<2x128x32xf32> to vector<1x128x32xf32>
    %166 = vector.shape_cast %165 : vector<1x128x32xf32> to vector<128x32xf32>
    %167 = arith.truncf %166 : vector<128x32xf32> to vector<128x32xbf16>
    %cst_95 = arith.constant dense<0.000000e+00> : vector<1x128xf32>
    %168 = tpu.matmul %164, %167, %cst_95 {dimension_numbers = #tpu.dot_dimension_numbers<[1], [1], [0], [0], [0, 0, 1, 0], [], []>} : vector<1x32xbf16>, vector<128x32xbf16>, vector<1x128xf32> -> vector<1x128xf32>
    %c1_96 = arith.constant 1 : index
    %c0_97 = arith.constant 0 : index
    %c0_98 = arith.constant 0 : index
    %169 = vector.load %arg14[%c1_96, %c0_97, %c0_98] : memref<2x1x128xf32, #tpu.memory_space<vmem>>, vector<1x1x128xf32>
    %170 = vector.shape_cast %169 : vector<1x1x128xf32> to vector<1x128xf32>
    %171 = vector.shape_cast %168 : vector<1x128xf32> to vector<1x1x128xf32>
    tpu.vector_store %arg14[%c1_96, %c0_97, %c0_98], %171 {strides = array<i32>} : memref<2x1x128xf32, #tpu.memory_space<vmem>>, vector<1x1x128xf32>,
    %c0_99 = arith.constant 0 : index
    %c0_100 = arith.constant 0 : index
    %172 = vector.load %arg13[%c0_99, %c0_100] : memref<32x4xbf16, #tpu.memory_space<vmem>>, vector<32x4xbf16>
    %173 = vector.extract_strided_slice %140 {offsets = [1, 0, 0], sizes = [1, 128, 32], strides = [1, 1, 1]} : vector<2x128x32xf32> to vector<1x128x32xf32>
    %174 = vector.shape_cast %173 : vector<1x128x32xf32> to vector<128x32xf32>
    %175 = arith.truncf %174 : vector<128x32xf32> to vector<128x32xbf16>
    %cst_101 = arith.constant dense<0.000000e+00> : vector<4x128xf32>
    %176 = tpu.matmul %172, %175, %cst_101 {dimension_numbers = #tpu.dot_dimension_numbers<[0], [1], [1], [0], [0, 1, 1, 0], [], []>} : vector<32x4xbf16>, vector<128x32xbf16>, vector<4x128xf32> -> vector<4x128xf32>
    %c1_102 = arith.constant 1 : index
    %c0_103 = arith.constant 0 : index
    %c0_104 = arith.constant 0 : index
    %177 = vector.load %arg3[%c1_102, %c0_103, %c0_104] : memref<2x4x128xf32, #tpu.memory_space<vmem>>, vector<1x4x128xf32>
    %178 = vector.shape_cast %177 : vector<1x4x128xf32> to vector<4x128xf32>
    %179 = arith.addf %176, %178 : vector<4x128xf32>
    %c1_105 = arith.constant 1 : index
    %c0_106 = arith.constant 0 : index
    %c0_107 = arith.constant 0 : index
    %180 = vector.load %arg15[%c1_105, %c0_106, %c0_107] : memref<2x4x128xf32, #tpu.memory_space<vmem>>, vector<1x4x128xf32>
    %181 = vector.shape_cast %180 : vector<1x4x128xf32> to vector<4x128xf32>
    %182 = vector.shape_cast %179 : vector<4x128xf32> to vector<1x4x128xf32>
    tpu.vector_store %arg15[%c1_105, %c0_106, %c0_107], %182 {strides = array<i32>} : memref<2x4x128xf32, #tpu.memory_space<vmem>>, vector<1x4x128xf32>,
    return
  }
  func.func @transform_0(%arg0: i32) -> (i32, i32) {
    %c0_i32 = arith.constant 0 : i32
    %c0_i32_0 = arith.constant 0 : i32
    %c0_i32_1 = arith.constant 0 : i32
    return %c0_i32, %c0_i32_0 : i32, i32
  }
  func.func @transform_1(%arg0: i32) -> (i32, i32) {
    %c0_i32 = arith.constant 0 : i32
    %c0_i32_0 = arith.constant 0 : i32
    %c0_i32_1 = arith.constant 0 : i32
    return %c0_i32, %c0_i32_0 : i32, i32
  }
  func.func @transform_2(%arg0: i32) -> (i32, i32, i32) {
    %c0_i32 = arith.constant 0 : i32
    %c0_i32_0 = arith.constant 0 : i32
    %c0_i32_1 = arith.constant 0 : i32
    %c0_i32_2 = arith.constant 0 : i32
    return %c0_i32, %c0_i32_0, %c0_i32_1 : i32, i32, i32
  }
  func.func @transform_3(%arg0: i32) -> (i32, i32, i32) {
    %c0_i32 = arith.constant 0 : i32
    %c0_i32_0 = arith.constant 0 : i32
    %c0_i32_1 = arith.constant 0 : i32
    %c0_i32_2 = arith.constant 0 : i32
    return %c0_i32, %c0_i32_0, %c0_i32_1 : i32, i32, i32
  }
  func.func @transform_4(%arg0: i32) -> (i32, i32, i32) {
    %c0_i32 = arith.constant 0 : i32
    %c0_i32_0 = arith.constant 0 : i32
    %c0_i32_1 = arith.constant 0 : i32
    %c0_i32_2 = arith.constant 0 : i32
    return %c0_i32, %c0_i32_0, %c0_i32_1 : i32, i32, i32
  }
  func.func @transform_5(%arg0: i32) -> (i32, i32, i32) {
    %c0_i32 = arith.constant 0 : i32
    %c0_i32_0 = arith.constant 0 : i32
    %c0_i32_1 = arith.constant 0 : i32
    %c0_i32_2 = arith.constant 0 : i32
    return %c0_i32, %c0_i32_0, %c0_i32_1 : i32, i32, i32
  }
  func.func @transform_6(%arg0: i32) -> (i32, i32, i32) {
    %c0_i32 = arith.constant 0 : i32
    %c0_i32_0 = arith.constant 0 : i32
    %c0_i32_1 = arith.constant 0 : i32
    %c0_i32_2 = arith.constant 0 : i32
    return %c0_i32, %c0_i32_0, %c0_i32_1 : i32, i32, i32
  }
  func.func @transform_7(%arg0: i32) -> (i32, i32, i32) {
    %c0_i32 = arith.constant 0 : i32
    %c0_i32_0 = arith.constant 0 : i32
    %c0_i32_1 = arith.constant 0 : i32
    %c0_i32_2 = arith.constant 0 : i32
    return %c0_i32, %c0_i32_0, %c0_i32_1 : i32, i32, i32
  }
  func.func @transform_8(%arg0: i32) -> (i32, i32) {
    %c0_i32 = arith.constant 0 : i32
    %c0_i32_0 = arith.constant 0 : i32
    %c0_i32_1 = arith.constant 0 : i32
    return %c0_i32, %c0_i32_0 : i32, i32
  }
  func.func @transform_9(%arg0: i32) -> (i32, i32) {
    %c0_i32 = arith.constant 0 : i32
    %c0_i32_0 = arith.constant 0 : i32
    %c0_i32_1 = arith.constant 0 : i32
    return %c0_i32, %c0_i32_0 : i32, i32
  }
  func.func @transform_10(%arg0: i32) -> (i32, i32) {
    %c0_i32 = arith.constant 0 : i32
    %c0_i32_0 = arith.constant 0 : i32
    %c0_i32_1 = arith.constant 0 : i32
    return %c0_i32, %c0_i32_0 : i32, i32
  }
  func.func @transform_11(%arg0: i32) -> (i32, i32) {
    %c0_i32 = arith.constant 0 : i32
    %c0_i32_0 = arith.constant 0 : i32
    %c0_i32_1 = arith.constant 0 : i32
    return %c0_i32, %c0_i32_0 : i32, i32
  }
  func.func @transform_12(%arg0: i32) -> (i32, i32) {
    %c0_i32 = arith.constant 0 : i32
    %c0_i32_0 = arith.constant 0 : i32
    %c0_i32_1 = arith.constant 0 : i32
    return %c0_i32, %c0_i32_0 : i32, i32
  }
  func.func @transform_13(%arg0: i32) -> (i32, i32, i32) {
    %c0_i32 = arith.constant 0 : i32
    %c0_i32_0 = arith.constant 0 : i32
    %c0_i32_1 = arith.constant 0 : i32
    %c0_i32_2 = arith.constant 0 : i32
    return %c0_i32, %c0_i32_0, %c0_i32_1 : i32, i32, i32
  }
  func.func @transform_14(%arg0: i32) -> (i32, i32, i32) {
    %c0_i32 = arith.constant 0 : i32
    %c0_i32_0 = arith.constant 0 : i32
    %c0_i32_1 = arith.constant 0 : i32
    %c0_i32_2 = arith.constant 0 : i32
    return %c0_i32, %c0_i32_0, %c0_i32_1 : i32, i32, i32
  }
}

</mosaic_0001>

<bundles_post_ra>
// kernel: tpu_custom_call.1
= control target key start
LH: loop header
LB: loop body
LE: loop exit
PB: predicated region body
PF: predicated region fallthrough
CT: control target
= control target key end

     0   :  { %20 = vsyncpa [#allocation3], 0  ;;  %vm117_vm0 = vcmask 261120   ;;  %s8079_s0 = inlined_call_operand.vmem [shape: f32[256,32], index: 0, kind: input, shape index: {}]   ;;  %s8080_s1 = inlined_call_operand.vmem [shape: f32[256,32], index: 1, kind: input, shape index: {}]   ;;  %s8081_s2 = inlined_call_operand.vmem [shape: f32[2,4,128], index: 2, kind: input, shape index: {}]   ;;  %s8082_s3 = inlined_call_operand.vmem [shape: f32[2,1,32], index: 3, kind: input, shape index: {}]   ;;  %s8083_s4 = inlined_call_operand.vmem [shape: bf16[2,32,64], index: 4, kind: input, shape index: {}]   ;;  %s8084_s5 = inlined_call_operand.vmem [shape: f32[2,1,64], index: 5, kind: input, shape index: {}]   ;;  %s8085_s6 = inlined_call_operand.vmem [shape: bf16[2,64,32], index: 6, kind: input, shape index: {}]   ;;  %s8086_s7 = inlined_call_operand.vmem [shape: f32[2,3,32], index: 7, kind: input, shape index: {}]   ;;  %s8087_s8 = inlined_call_operand.vmem [shape: bf16[32,32], index: 8, kind: input, shape index: {}]   ;;  %s8088_s9 = inlined_call_operand.vmem [shape: f32[5,32], index: 9, kind: input, shape index: {}]   ;;  %s8089_s10 = inlined_call_operand.vmem [shape: bf16[32,32], index: 10, kind: input, shape index: {}]   ;;  %s8090_s11 = inlined_call_operand.vmem [shape: bf16[32,32], index: 11, kind: input, shape index: {}]   ;;  %s8091_s12 = inlined_call_operand.vmem [shape: bf16[32,4], index: 12, kind: input, shape index: {}]   ;;  %s8092_s13 = inlined_call_operand.hbm [shape: f32[2,1,128], index: 13, kind: output, shape index: {0}]   ;;  %s8093_s14 = inlined_call_operand.hbm [shape: f32[2,4,128], index: 14, kind: output, shape index: {1}]  }
   0x1   :  { %v4428_v0 = vld [vmem:[%s8083_s4 + $0x8] sm:$0xff]  ;;  %v4427_v1 = vld [vmem:[%s8083_s4] sm:$0xff] }
   0x2   :  { %172 = vmatpush.bf16.msra.mxu0 %v4428_v0  ;;  %v4828_v2 = vld [vmem:[%s8079_s0] sm:$0xff]  ;;  %v4833_v3 = vld [vmem:[%s8079_s0 + $0x8] sm:$0xff] }
   0x3   :  { %v85_v4 = vpack.c.bf16 %v4833_v3, %v4828_v2 }
   0x6   :  { %173 = vmatpush.bf16.msra.mxu0 %v4427_v1 }
   0x7   :  { %21 = vsyncpa [#allocation5], 0  ;;  %v4841_v5 = vld [vmem:[%s8079_s0 + $0x10] sm:$0xff]  ;;  %v4846_v6 = vld [vmem:[%s8079_s0 + $0x18] sm:$0xff]  ;;  %vm335_vm1 = vcmask 523264   ;;  %s4739_s19 = smov 16  }
   0x8   :  { %v86_v7 = vpack.c.bf16 %v4846_v6, %v4841_v5  ;;  %v4854_v8 = vld [vmem:[%s8079_s0 + $0x20] sm:$0xff]  ;;  %v4859_v9 = vld [vmem:[%s8079_s0 + $0x28] sm:$0xff]  ;;  %v4867_v11 = vld [vmem:[%s8079_s0 + $0x30] sm:$0xff]  ;;  %s4740_s20 = smov 1   ;;  %s4741_s21 = smov [#allocation4]  }
   0x9   :  { %4213 = vmatmul.msk.bf16.vlgmr.msra.gmra.mxu0 %vm117_vm0, %v85_v4  ;;  %v87_v10 = vpack.c.bf16 %v4859_v9, %v4854_v8  ;;  %v4872_v12 = vld [vmem:[%s8079_s0 + $0x38] sm:$0xff]  ;;  %v4880_v14 = vld [vmem:[%s8079_s0 + $0x40] sm:$0xff]  ;;  %v4885_v15 = vld [vmem:[%s8079_s0 + $0x48] sm:$0xff]  ;;  %s4186_s22 = sshll.u32 %s4741_s21, 4  ;;  %s4188_s24 = sshll.u32 %s8093_s14, 4  ;;  %s4187_s22 = int_to_ptr.vmem [resolvable:$true] %s4186_s22  ;;  %s4189_s24 = int_to_ptr.hbm [resolvable:$true] %s4188_s24 }
   0xa   :  { %v88_v13 = vpack.c.bf16 %v4872_v12, %v4867_v11  ;;  %v89_v16 = vpack.c.bf16 %v4885_v15, %v4880_v14  ;;  %v4432_v17 = vld [vmem:[%s8085_s6 + $0x18] sm:$0xff]  ;;  %v4431_v18 = vld [vmem:[%s8085_s6 + $0x10] sm:$0xff]  ;;  %v4430_v19 = vld [vmem:[%s8085_s6 + $0x8] sm:$0xff] }
   0xb   :  { %388 = vmatpush.bf16.msra.mxu1 %v4432_v17  ;;  %4449 = vmatpush.bf16.msra.mxu3 %v4432_v17  ;;  %v4429_v20 = vld [vmem:[%s8085_s6] sm:$0xff]  ;;  %v4905_v21 = vld [vmem:[%s8079_s0 + $0x50] sm:$0xff]  ;;  %v4910_v22 = vld [vmem:[%s8079_s0 + $0x58] sm:$0xff] }
   0xc   :  { %v90_v23 = vpack.c.bf16 %v4910_v22, %v4905_v21  ;;  %v4918_v24 = vld [vmem:[%s8079_s0 + $0x60] sm:$0xff]  ;;  %v4923_v25 = vld [vmem:[%s8079_s0 + $0x68] sm:$0xff]  ;;  %v4938_v34 = vld [vmem:[%s8079_s0 + $0x70] sm:$0xff] }
   0xd   :  { %v91_v26 = vpack.c.bf16 %v4923_v25, %v4918_v24  ;;  %v4931_v28 = vld [vmem:[%s8084_s5] ss:$0 sm:$0xff]  ;;  %v4943_v35 = vld [vmem:[%s8079_s0 + $0x78] sm:$0xff]  ;;  %v4962_v52 = vld [vmem:[%s8079_s0 + $0x88] sm:$0xff] }
   0xe   :  { %v92_v36 = vpack.c.bf16 %v4943_v35, %v4938_v34  ;;  %v4957_v51 = vld [vmem:[%s8079_s0 + $0x80] sm:$0xff] }
   0xf   :  { %389 = vmatpush.bf16.msra.mxu1 %v4431_v18  ;;  %4450 = vmatpush.bf16.msra.mxu3 %v4431_v18  ;;  %v93_v53 = vpack.c.bf16 %v4962_v52, %v4957_v51 }
  0x13   :  { %390 = vmatpush.bf16.msra.mxu1 %v4430_v19  ;;  %4451 = vmatpush.bf16.msra.mxu3 %v4430_v19 }
  0x17   :  { %391 = vmatpush.bf16.msra.mxu1 %v4429_v20  ;;  %4452 = vmatpush.bf16.msra.mxu3 %v4429_v20  ;;  %v4979_v20 = vld [vmem:[%s8079_s0 + $0x90] sm:$0xff] }
  0x19   :  { %4214 = vmatmul.msk.bf16.gmra.mxu0 %vm117_vm0, %v86_v7 }
  0x29   :  { %4215 = vmatmul.msk.bf16.gmra.mxu0 %vm117_vm0, %v87_v10 }
  0x39   :  { %4216 = vmatmul.msk.bf16.gmra.mxu0 %vm117_vm0, %v88_v13 }
  0x49   :  { %4217 = vmatmul.msk.bf16.gmra.mxu0 %vm117_vm0, %v89_v16 }
  0x59   :  { %4218 = vmatmul.msk.bf16.gmra.mxu0 %vm117_vm0, %v90_v23  ;;  %v4984_v23 = vld [vmem:[%s8079_s0 + $0x98] sm:$0xff] }
  0x69   :  { %4219 = vmatmul.msk.bf16.gmra.mxu0 %vm117_vm0, %v91_v26 }
  0x79   :  { %4220 = vmatmul.msk.bf16.gmra.mxu0 %vm117_vm0, %v92_v36 }
  0x86   :  { %v175_v27 = vpop.f32.mrf.mxu0 }
  0x87   :  { %v176_v29 = vadd.f32 %v4931_v28, %v175_v27  ;;  %v94_v27 = vpack.c.bf16 %v4984_v23, %v4979_v20 }
  0x89   :  { %v255_v32 = vmax.f32 %v176_v29, 0.0  ;;  %4221 = vmatmul.msk.bf16.gmra.mxu0 %vm117_vm0, %v93_v53 }
  0x8e   :  { %v177_v30 = vpop.f32.mrf.mxu0 }
  0x8f   :  { %v178_v31 = vadd.f32 %v4931_v28, %v177_v30 }
  0x91   :  { %v256_v33 = vmax.f32 %v178_v31, 0.0 }
  0x93   :  { %v295_v37 = vpack.c.bf16 %v256_v33, %v255_v32 }
  0x95   :  { %4245 = vmatmul.msk.bf16.vlgmr.msra.gmra.mxu1 %vm335_vm1, %v295_v37  ;;  %v4995_v37 = vld [vmem:[%s8079_s0 + $0xa0] sm:$0xff] }
  0x96   :  { %v180_v38 = vpop.f32.mrf.mxu0 }
  0x97   :  { %v181_v39 = vadd.f32 %v4931_v28, %v180_v38  ;;  %v5000_v38 = vld [vmem:[%s8079_s0 + $0xa8] sm:$0xff] }
  0x99   :  { %v257_v42 = vmax.f32 %v181_v39, 0.0  ;;  %4222 = vmatmul.msk.bf16.gmra.mxu0 %vm117_vm0, %v94_v27 }
  0x9e   :  { %v182_v40 = vpop.f32.mrf.mxu0 }
  0x9f   :  { %v183_v41 = vadd.f32 %v4931_v28, %v182_v40  ;;  %v95_v40 = vpack.c.bf16 %v5000_v38, %v4995_v37 }
  0xa1   :  { %v258_v43 = vmax.f32 %v183_v41, 0.0 }
  0xa3   :  { %v296_v44 = vpack.c.bf16 %v258_v43, %v257_v42  ;;  %v5009_v42 = vld [vmem:[%s8086_s7] ss:$0 sm:$0xff] }
  0xa5   :  { %4246 = vmatmul.msk.bf16.gmra.mxu1 %vm335_vm1, %v296_v44 }
  0xa6   :  { %v185_v45 = vpop.f32.mrf.mxu0 }
  0xa7   :  { %v186_v46 = vadd.f32 %v4931_v28, %v185_v45 }
  0xa9   :  { %v259_v49 = vmax.f32 %v186_v46, 0.0  ;;  %4223 = vmatmul.msk.bf16.gmra.mxu0 %vm117_vm0, %v95_v40 }
  0xae   :  { %v187_v47 = vpop.f32.mrf.mxu0 }
  0xaf   :  { %v188_v48 = vadd.f32 %v4931_v28, %v187_v47 }
  0xb1   :  { %v260_v50 = vmax.f32 %v188_v48, 0.0 }
  0xb3   :  { %v297_v54 = vpack.c.bf16 %v260_v50, %v259_v49 }
  0xb5   :  { %4247 = vmatmul.msk.bf16.gmra.mxu1 %vm335_vm1, %v297_v54 }
  0xb6   :  { %v190_v55 = vpop.f32.mrf.mxu0 }
  0xb7   :  { %v191_v56 = vadd.f32 %v4931_v28, %v190_v55 }
  0xb9   :  { %v261_v59 = vmax.f32 %v191_v56, 0.0  ;;  %v5028_v56 = vld [vmem:[%s8079_s0 + $0xb8] sm:$0xff] }
  0xbe   :  { %v192_v57 = vpop.f32.mrf.mxu0 }
  0xbf   :  { %v193_v58 = vadd.f32 %v4931_v28, %v192_v57 }
  0xc1   :  { %v262_v60 = vmax.f32 %v193_v58, 0.0 }
  0xc3   :  { %v298_v61 = vpack.c.bf16 %v262_v60, %v261_v59 }
  0xc5   :  { %4248 = vmatmul.msk.bf16.gmra.mxu1 %vm335_vm1, %v298_v61 }
  0xc6   :  { %v195_v62 = vpop.f32.mrf.mxu0 }
  0xc7   :  { %v196_v63 = vadd.f32 %v4931_v28, %v195_v62 }
  0xc9   :  { %v263_v1 = vmax.f32 %v196_v63, 0.0 }
  0xce   :  { %v197_v0 = vpop.f32.mrf.mxu0 }
  0xcf   :  { %v198_v4 = vadd.f32 %v4931_v28, %v197_v0 }
  0xd1   :  { %v264_v7 = vmax.f32 %v198_v4, 0.0 }
  0xd3   :  { %v299_v10 = vpack.c.bf16 %v264_v7, %v263_v1 }
  0xd5   :  { %4249 = vmatmul.msk.bf16.gmra.mxu1 %vm335_vm1, %v299_v10 }
  0xd6   :  { %v200_v13 = vpop.f32.mrf.mxu0 }
  0xd7   :  { %v201_v16 = vadd.f32 %v4931_v28, %v200_v13 }
  0xd9   :  { %v265_v18 = vmax.f32 %v201_v16, 0.0 }
  0xde   :  { %v202_v17 = vpop.f32.mrf.mxu0 }
  0xdf   :  { %v203_v19 = vadd.f32 %v4931_v28, %v202_v17 }
  0xe1   :  { %v266_v26 = vmax.f32 %v203_v19, 0.0 }
  0xe3   :  { %v300_v29 = vpack.c.bf16 %v266_v26, %v265_v18 }
  0xe5   :  { %4250 = vmatmul.msk.bf16.gmra.mxu1 %vm335_vm1, %v300_v29 }
  0xe6   :  { %v205_v30 = vpop.f32.mrf.mxu0 }
  0xe7   :  { %v206_v31 = vadd.f32 %v4931_v28, %v205_v30 }
  0xe9   :  { %v267_v33 = vmax.f32 %v206_v31, 0.0 }
  0xee   :  { %v207_v32 = vpop.f32.mrf.mxu0 }
  0xef   :  { %v208_v36 = vadd.f32 %v4931_v28, %v207_v32  ;;  %v4737_v32 = vmov 32.0  }
  0xf0   :  { %4474 = vrcp.f32 %v4737_v32 }
  0xf1   :  { %v268_v39 = vmax.f32 %v208_v36, 0.0 }
  0xf3   :  { %v301_v41 = vpack.c.bf16 %v268_v39, %v267_v33 }
  0xf5   :  { %4251 = vmatmul.msk.bf16.gmra.mxu1 %vm335_vm1, %v301_v41  ;;  %v5079_v41 = vld [vmem:[%s8079_s0 + $0xc8] sm:$0xff] }
  0xf6   :  { %v210_v43 = vpop.f32.mrf.mxu0  ;;  %v4475_v40 = vpop.eup %4474 }
  0xf7   :  { %v211_v47 = vadd.f32 %v4931_v28, %v210_v43  ;;  %vm642_vm2 = vweird.f32 %v4475_v40 }
  0xf9   :  { %v269_v53 = vmax.f32 %v211_v47, 0.0 }
  0xfe   :  { %v212_v49 = vpop.f32.mrf.mxu0 }
  0xff   :  { %v213_v54 = vadd.f32 %v4931_v28, %v212_v49 }
 0x101   :  { %v270_v57 = vmax.f32 %v213_v54, 0.0 }
 0x106   :  { %v215_v31 = vpop.f32.mrf.mxu0 }
 0x10e   :  { %v217_v33 = vpop.f32.mrf.mxu0 }
 0x10f   :  { %v218_v39 = vadd.f32 %v4931_v28, %v217_v33 }
 0x111   :  { %v272_v43 = vmax.f32 %v218_v39, 0.0  ;;  %v78_v39 = vld [vmem:[%s8079_s0 + $0xe8] sm:$0xff] }
 0x112   :  { %v393_v44 = vpop.f32.mrf.mxu1 }
 0x113   :  { %v473_v45 = vadd.f32 %v393_v44, %v4828_v2  ;;  %v5023_v2 = vld [vmem:[%s8079_s0 + $0xb0] sm:$0xff] }
 0x114   :  { %v96_v58 = vpack.c.bf16 %v5028_v56, %v5023_v2 }
 0x115   :  { %v5013_v46 = vadd.f32 %v5009_v42, %v473_v45  ;;  %v638_v45 = vmul.f32 32.0, %v4475_v40 }
 0x116   :  { %4224 = vmatmul.msk.bf16.gmra.mxu0 %vm117_vm0, %v96_v58 }
 0x117   :  { %v541_v48 = vsel %vm117_vm0, %v5013_v46, 0.0  ;;  %v639_v49 = vsub.f32 1.0, %v638_v45 }
 0x118   :  { %542 = vadd.xlane.f32.xlu0 %v541_v48  ;;  %v220_v48 = vpop.f32.mrf.mxu0 }
 0x11a   :  { %v395_v50 = vpop.f32.mrf.mxu1 }
 0x11b   :  { %v474_v55 = vadd.f32 %v395_v50, %v4833_v3  ;;  %v302_v3 = vpack.c.bf16 %v270_v57, %v269_v53  ;;  %v640_v50 = vmul.f32 %v4475_v40, %v639_v49  ;;  %v221_v53 = vadd.f32 %v4931_v28, %v220_v48 }
 0x11d   :  { %v5033_v59 = vadd.f32 %v5009_v42, %v474_v55  ;;  %4252 = vmatmul.msk.bf16.gmra.mxu1 %vm335_vm1, %v302_v3  ;;  %v641_v57 = vadd.f32 %v4475_v40, %v640_v50  ;;  %v273_v58 = vmax.f32 %v221_v53, 0.0 }
 0x11f   :  { %v544_v60 = vsel %vm117_vm0, %v5033_v59, 0.0 }
 0x120   :  { %545 = vadd.xlane.f32.xlu0 %v544_v60  ;;  %v222_v54 = vpop.f32.mrf.mxu0  ;;  %v75_v60 = vld [vmem:[%s8079_s0 + $0xd0] sm:$0xff] }
 0x121   :  { %v223_v3 = vadd.f32 %v4931_v28, %v222_v54 }
 0x122   :  { %v398_v61 = vpop.f32.mrf.mxu1 }
 0x123   :  { %v475_v62 = vadd.f32 %v398_v61, %v4841_v5  ;;  %v76_v61 = vld [vmem:[%s8079_s0 + $0xd8] sm:$0xff] }
 0x125   :  { %v5041_v63 = vadd.f32 %v5009_v42, %v475_v62  ;;  %v274_v62 = vmax.f32 %v223_v3, 0.0 }
 0x127   :  { %v547_v0 = vsel %vm117_vm0, %v5041_v63, 0.0 }
 0x128   :  { %548 = vadd.xlane.f32.xlu1 %v547_v0  ;;  %v98_v0 = vpack.c.bf16 %v76_v61, %v75_v60 }
 0x12a   :  { %v400_v1 = vpop.f32.mrf.mxu1 }
 0x12b   :  { %v476_v4 = vadd.f32 %v400_v1, %v4846_v6  ;;  %v5093_v1 = vsel %vm642_vm2, %v4475_v40, %v641_v57 }
 0x12d   :  { %v5047_v7 = vadd.f32 %v5009_v42, %v476_v4  ;;  %v304_v4 = vpack.c.bf16 %v274_v62, %v273_v58 }
 0x12f   :  { %v550_v10 = vsel %vm117_vm0, %v5047_v7, 0.0 }
 0x130   :  { %551 = vadd.xlane.f32.xlu1 %v550_v10 }
 0x132   :  { %v403_v13 = vpop.f32.mrf.mxu1 }
 0x133   :  { %v477_v5 = vadd.f32 %v403_v13, %v4854_v8 }
 0x135   :  { %v5053_v16 = vadd.f32 %v5009_v42, %v477_v5  ;;  %v225_v5 = vpop.f32.mrf.mxu0 }
 0x137   :  { %v553_v17 = vsel %vm117_vm0, %v5053_v16, 0.0 }
 0x138   :  { %554 = vadd.xlane.f32.xlu2 %v553_v17 }
 0x13a   :  { %v405_v18 = vpop.f32.mrf.mxu1 }
 0x13b   :  { %v478_v6 = vadd.f32 %v405_v18, %v4859_v9  ;;  %v216_v9 = vadd.f32 %v4931_v28, %v215_v31 }
 0x13d   :  { %v5059_v19 = vadd.f32 %v5009_v42, %v478_v6  ;;  %v271_v36 = vmax.f32 %v216_v9, 0.0  ;;  %v227_v32 = vpop.f32.mrf.mxu0 }
 0x13e   :  { %v228_v33 = vadd.f32 %v4931_v28, %v227_v32 }
 0x13f   :  { %v556_v26 = vsel %vm117_vm0, %v5059_v19, 0.0  ;;  %v303_v47 = vpack.c.bf16 %v272_v43, %v271_v36 }
 0x140   :  { %557 = vadd.xlane.f32.xlu2 %v556_v26  ;;  %v226_v26 = vadd.f32 %v4931_v28, %v225_v5  ;;  %v276_v43 = vmax.f32 %v228_v33, 0.0 }
 0x141   :  { %4253 = vmatmul.msk.bf16.gmra.mxu1 %vm335_vm1, %v303_v47 }
 0x142   :  { %v408_v27 = vpop.f32.mrf.mxu1  ;;  %v275_v9 = vmax.f32 %v226_v26, 0.0 }
 0x143   :  { %v479_v8 = vadd.f32 %v408_v27, %v4867_v11  ;;  %v5074_v11 = vld [vmem:[%s8079_s0 + $0xc0] sm:$0xff] }
 0x144   :  { %v97_v44 = vpack.c.bf16 %v5079_v41, %v5074_v11 }
 0x145   :  { %v5065_v29 = vadd.f32 %v5009_v42, %v479_v8 }
 0x146   :  { %4225 = vmatmul.msk.bf16.gmra.mxu0 %vm117_vm0, %v97_v44 }
 0x147   :  { %v559_v30 = vsel %vm117_vm0, %v5065_v29, 0.0 }
 0x148   :  { %560 = vadd.xlane.f32.xlu2 %v559_v30 }
 0x14a   :  { %v410_v55 = vpop.f32.mrf.mxu1 }
 0x14b   :  { %v480_v27 = vadd.f32 %v410_v55, %v4872_v12  ;;  %v77_v12 = vld [vmem:[%s8079_s0 + $0xe0] sm:$0xff] }
 0x14c   :  { %v99_v44 = vpack.c.bf16 %v78_v39, %v77_v12  ;;  %v79_v12 = vld [vmem:[%s8079_s0 + $0xf0] sm:$0xff]  ;;  %v80_v39 = vld [vmem:[%s8079_s0 + $0xf8] sm:$0xff] }
 0x14d   :  { %v5112_v36 = vadd.f32 %v5009_v42, %v480_v27 }
 0x14f   :  { %v562_v49 = vsel %vm117_vm0, %v5112_v36, 0.0 }
 0x151   :  { %4254 = vmatmul.msk.bf16.gmra.mxu1 %vm335_vm1, %v304_v4 }
 0x152   :  { %v413_v17 = vpop.f32.mrf.mxu1 }
 0x153   :  { %v481_v47 = vadd.f32 %v413_v17, %v4880_v14 }
 0x155   :  { %v5133_v57 = vadd.f32 %v5009_v42, %v481_v47 }
 0x156   :  { %4226 = vmatmul.msk.bf16.gmra.mxu0 %vm117_vm0, %v98_v0 }
 0x157   :  { %v565_v62 = vsel %vm117_vm0, %v5133_v57, 0.0 }
 0x15a   :  { %v415_v40 = vpop.f32.mrf.mxu1 }
 0x15b   :  { %v482_v60 = vadd.f32 %v415_v40, %v4885_v15 }
 0x15d   :  { %v5148_v17 = vadd.f32 %v5009_v42, %v482_v60 }
 0x162   :  { %v418_v58 = vpop.f32.mrf.mxu1 }
 0x163   :  { %v483_v27 = vadd.f32 %v418_v58, %v4905_v21 }
 0x165   :  { %v5162_v33 = vadd.f32 %v5009_v42, %v483_v27 }
 0x166   :  { %4227 = vmatmul.msk.bf16.gmra.mxu0 %vm117_vm0, %v99_v44  ;;  %v100_v44 = vpack.c.bf16 %v80_v39, %v79_v12  ;;  %v4433_v12 = vld [vmem:[%s8083_s4 + $0x10] sm:$0xff] }
 0x176   :  { %4228 = vmatmul.msk.bf16.gmra.mxu0 %vm117_vm0, %v100_v44 }
 0x18b   :  { %v543_v10 = vpop.xlane.xlu0 %542 }
 0x18c   :  { %v644_v13 = vmul.f32 %v5093_v1, %v543_v10 }
 0x18e   :  { %v5099_v18 = vsub.f32 %v5013_v46, %v644_v13 }
 0x190   :  { %v708_v6 = vmul.f32 %v5099_v18, %v5099_v18 }
 0x192   :  { %v740_v8 = vsel %vm117_vm0, %v708_v6, 0.0 }
 0x193   :  { %741 = vadd.xlane.f32.xlu0 %v740_v8  ;;  %v546_v30 = vpop.xlane.xlu0 %545  ;;  %v230_v54 = vpop.f32.mrf.mxu0 }
 0x194   :  { %v645_v31 = vmul.f32 %v5093_v1, %v546_v30  ;;  %v231_v3 = vadd.f32 %v4931_v28, %v230_v54  ;;  %v568_v30 = vsel %vm117_vm0, %v5148_v17, 0.0 }
 0x196   :  { %v5109_v46 = vsub.f32 %v5033_v59, %v645_v31  ;;  %v305_v59 = vpack.c.bf16 %v276_v43, %v275_v9  ;;  %v277_v10 = vmax.f32 %v231_v3, 0.0  ;;  %v420_v31 = vpop.f32.mrf.mxu1 }
 0x197   :  { %v484_v40 = vadd.f32 %v420_v31, %v4910_v22  ;;  %v4434_v31 = vld [vmem:[%s8083_s4 + $0x18] sm:$0xff]  ;;  %s4738_s4 = smov [#allocation2]  }
 0x198   :  { %v709_v45 = vmul.f32 %v5109_v46, %v5109_v46  ;;  %4255 = vmatmul.msk.bf16.gmra.mxu1 %vm335_vm1, %v305_v59  ;;  %1410 = vmatpush.bf16.msra.mxu2 %v4434_v31  ;;  %s4173_s17 = sshll.u32 %s4738_s4, 4  ;;  %s4174_s17 = int_to_ptr.vmem [resolvable:$true] %s4173_s17 }
 0x19a   :  { %v743_v48 = vsel %vm117_vm0, %v709_v45, 0.0 }
 0x19b   :  { %v549_v50 = vpop.xlane.xlu1 %548  ;;  %744 = vadd.xlane.f32.xlu1 %v743_v48  ;;  %563 = vadd.xlane.f32.xlu0 %v562_v49  ;;  %v232_v4 = vpop.f32.mrf.mxu0  ;;  %v5182_v49 = vadd.f32 %v5009_v42, %v484_v40 }
 0x19c   :  { %v646_v53 = vmul.f32 %v5093_v1, %v549_v50  ;;  %v233_v13 = vadd.f32 %v4931_v28, %v232_v4  ;;  %1411 = vmatpush.bf16.msra.mxu2 %v4433_v12 }
 0x19d   :  { %v574_v54 = vsel %vm117_vm0, %v5182_v49, 0.0 }
 0x19e   :  { %v5130_v55 = vsub.f32 %v5041_v63, %v646_v53  ;;  %v278_v15 = vmax.f32 %v233_v13, 0.0  ;;  %v423_v47 = vpop.f32.mrf.mxu1 }
 0x19f   :  { %v485_v50 = vadd.f32 %v423_v47, %v4918_v24 }
 0x1a0   :  { %v710_v14 = vmul.f32 %v5130_v55, %v5130_v55  ;;  %v306_v26 = vpack.c.bf16 %v278_v15, %v277_v10 }
 0x1a1   :  { %v5195_v3 = vadd.f32 %v5009_v42, %v485_v50 }
 0x1a2   :  { %v746_v61 = vsel %vm117_vm0, %v710_v14, 0.0 }
 0x1a3   :  { %747 = vadd.xlane.f32.xlu1 %v746_v61  ;;  %v552_v0 = vpop.xlane.xlu1 %551  ;;  %566 = vadd.xlane.f32.xlu0 %v565_v62 }
 0x1a4   :  { %v647_v63 = vmul.f32 %v5093_v1, %v552_v0  ;;  %v577_v0 = vsel %vm117_vm0, %v5195_v3, 0.0 }
 0x1a6   :  { %v5145_v5 = vsub.f32 %v5047_v7, %v647_v63  ;;  %v425_v60 = vpop.f32.mrf.mxu1 }
 0x1a7   :  { %v486_v61 = vadd.f32 %v425_v60, %v4923_v25 }
 0x1a8   :  { %v711_v6 = vmul.f32 %v5145_v5, %v5145_v5  ;;  %4256 = vmatmul.msk.bf16.gmra.mxu1 %vm335_vm1, %v306_v26 }
 0x1a9   :  { %v5204_v63 = vadd.f32 %v5009_v42, %v486_v61 }
 0x1aa   :  { %v749_v8 = vsel %vm117_vm0, %v711_v6, 0.0 }
 0x1ab   :  { %v555_v32 = vpop.xlane.xlu2 %554  ;;  %750 = vadd.xlane.f32.xlu2 %v749_v8  ;;  %569 = vadd.xlane.f32.xlu1 %v568_v30  ;;  %v580_v10 = vsel %vm117_vm0, %v5204_v63, 0.0 }
 0x1ac   :  { %v648_v7 = vmul.f32 %v5093_v1, %v555_v32 }
 0x1ae   :  { %v5159_v9 = vsub.f32 %v5053_v16, %v648_v7  ;;  %v571_v16 = vsel %vm117_vm0, %v5162_v33, 0.0 }
 0x1b0   :  { %v712_v21 = vmul.f32 %v5159_v9, %v5159_v9 }
 0x1b2   :  { %v752_v43 = vsel %vm117_vm0, %v712_v21, 0.0 }
 0x1b3   :  { %v558_v45 = vpop.xlane.xlu2 %557  ;;  %753 = vadd.xlane.f32.xlu2 %v752_v43  ;;  %572 = vadd.xlane.f32.xlu1 %v571_v16 }
 0x1b4   :  { %v649_v59 = vmul.f32 %v5093_v1, %v558_v45 }
 0x1b6   :  { %v5179_v48 = vsub.f32 %v5059_v19, %v649_v59 }
 0x1b8   :  { %v713_v22 = vmul.f32 %v5179_v48, %v5179_v48 }
 0x1ba   :  { %v755_v53 = vsel %vm117_vm0, %v713_v22, 0.0 }
 0x1bb   :  { %v561_v14 = vpop.xlane.xlu2 %560  ;;  %756 = vadd.xlane.f32.xlu0 %v755_v53  ;;  %575 = vadd.xlane.f32.xlu2 %v574_v54 }
 0x1bc   :  { %v650_v58 = vmul.f32 %v5093_v1, %v561_v14 }
 0x1be   :  { %v5192_v19 = vsub.f32 %v5065_v29, %v650_v58  ;;  %v428_v29 = vpop.f32.mrf.mxu1 }
 0x1bf   :  { %v487_v4 = vadd.f32 %v428_v29, %v4938_v34 }
 0x1c0   :  { %v714_v24 = vmul.f32 %v5192_v19, %v5192_v19 }
 0x1c1   :  { %v5210_v13 = vadd.f32 %v5009_v42, %v487_v4 }
 0x1c2   :  { %v758_v62 = vsel %vm117_vm0, %v714_v24, 0.0 }
 0x1c3   :  { %759 = vadd.xlane.f32.xlu0 %v758_v62  ;;  %578 = vadd.xlane.f32.xlu2 %v577_v0  ;;  %v583_v25 = vsel %vm117_vm0, %v5210_v13, 0.0  ;;  %v235_v15 = vpop.f32.mrf.mxu0 }
 0x1c4   :  { %v236_v26 = vadd.f32 %v4931_v28, %v235_v15 }
 0x1c6   :  { %v279_v8 = vmax.f32 %v236_v26, 0.0  ;;  %v430_v16 = vpop.f32.mrf.mxu1 }
 0x1cb   :  { %581 = vadd.xlane.f32.xlu0 %v580_v10  ;;  %v237_v6 = vpop.f32.mrf.mxu0 }
 0x1cc   :  { %v238_v27 = vadd.f32 %v4931_v28, %v237_v6 }
 0x1ce   :  { %v280_v30 = vmax.f32 %v238_v27, 0.0  ;;  %v433_v15 = vpop.f32.mrf.mxu1 }
 0x1d0   :  { %v307_v34 = vpack.c.bf16 %v280_v30, %v279_v8 }
 0x1d2   :  { %4257 = vmatmul.msk.bf16.gmra.mxu1 %vm335_vm1, %v307_v34 }
 0x1d3   :  { %584 = vadd.xlane.f32.xlu0 %v583_v25  ;;  %v240_v21 = vpop.f32.mrf.mxu0 }
 0x1d4   :  { %v241_v47 = vadd.f32 %v4931_v28, %v240_v21 }
 0x1d6   :  { %v281_v58 = vmax.f32 %v241_v47, 0.0 }
 0x1db   :  { %v242_v59 = vpop.f32.mrf.mxu0 }
 0x1dc   :  { %v243_v22 = vadd.f32 %v4931_v28, %v242_v59 }
 0x1de   :  { %v282_v60 = vmax.f32 %v243_v22, 0.0 }
 0x1e0   :  { %v308_v62 = vpack.c.bf16 %v282_v60, %v281_v58 }
 0x1e2   :  { %4258 = vmatmul.msk.bf16.gmra.mxu1 %vm335_vm1, %v308_v62  ;;  %v5271_v62 = vld [vmem:[%s8086_s7 + $0x1] ss:$0 sm:$0xff] }
 0x1e3   :  { %v245_v6 = vpop.f32.mrf.mxu0 }
 0x1e4   :  { %v246_v22 = vadd.f32 %v4931_v28, %v245_v6 }
 0x1eb   :  { %v247_v59 = vpop.f32.mrf.mxu0 }
 0x206   :  { %v742_v32 = vpop.xlane.xlu0 %741 }
 0x207   :  { %v836_v7 = vmul.f32 %v742_v32, %v5093_v1  ;;  %v488_v32 = vadd.f32 %v430_v16, %v4943_v35 }
 0x209   :  { %v868_v39 = vadd.f32 1e-05, %v836_v7 }
 0x20b   :  { %4476 = vrsqrt.f32 %v868_v39  ;;  %vm906_vm4 = vweird.f32 %v868_v39 }
 0x20e   :  { %v745_v40 = vpop.xlane.xlu1 %744  ;;  %v564_v43 = vpop.xlane.xlu0 %563 }
 0x20f   :  { %v837_v44 = vmul.f32 %v745_v40, %v5093_v1  ;;  %v651_v45 = vmul.f32 %v5093_v1, %v564_v43 }
 0x211   :  { %v4477_v50 = vpop.eup %4476  ;;  %v869_v53 = vadd.f32 1e-05, %v837_v44  ;;  %v5229_v54 = vsub.f32 %v5112_v36, %v651_v45 }
 0x212   :  { %v901_v14 = vmul.f32 %v4477_v50, %v868_v39  ;;  %vm907_vm3 = vweird.f32 %v4477_v50  ;;  %v5256_v39 = vadd.f32 %v5009_v42, %v488_v32 }
 0x213   :  { %4478 = vrsqrt.f32 %v869_v53  ;;  %v715_v24 = vmul.f32 %v5229_v54, %v5229_v54  ;;  %vm5246_vm5 = vmor %vm906_vm4, %vm907_vm3  ;;  %vm916_vm7 = vweird.f32 %v869_v53 }
 0x214   :  { %v902_v61 = vmul.f32 %v4477_v50, %v901_v14  ;;  %v248_v14 = vadd.f32 %v4931_v28, %v247_v59  ;;  %v586_v6 = vsel %vm117_vm0, %v5256_v39, 0.0 }
 0x215   :  { %v761_v0 = vsel %vm117_vm0, %v715_v24, 0.0  ;;  %v435_v24 = vpop.f32.mrf.mxu1 }
 0x216   :  { %v903_v29 = vmul.f32 0.5, %v902_v61  ;;  %v748_v4 = vpop.xlane.xlu1 %747  ;;  %v567_v10 = vpop.xlane.xlu0 %566  ;;  %762 = vadd.xlane.f32.xlu1 %v761_v0 }
 0x217   :  { %v838_v36 = vmul.f32 %v748_v4, %v5093_v1  ;;  %v652_v25 = vmul.f32 %v5093_v1, %v567_v10  ;;  %v283_v4 = vmax.f32 %v246_v22, 0.0  ;;  %v284_v10 = vmax.f32 %v248_v14, 0.0 }
 0x218   :  { %v904_v26 = vsub.f32 1.5, %v903_v29 }
 0x219   :  { %v4479_v27 = vpop.eup %4478  ;;  %v5237_v8 = vadd.f32 1e-05, %v838_v36  ;;  %v5240_v30 = vsub.f32 %v5133_v57, %v652_v25  ;;  %v489_v25 = vadd.f32 %v433_v15, %v4957_v51  ;;  %v309_v32 = vpack.c.bf16 %v284_v10, %v283_v4 }
 0x21a   :  { %v905_v34 = vmul.f32 %v4477_v50, %v904_v26  ;;  %v911_v31 = vmul.f32 %v4479_v27, %v869_v53  ;;  %vm917_vm6 = vweird.f32 %v4479_v27 }
 0x21b   :  { %4480 = vrsqrt.f32 %v5237_v8  ;;  %v716_v7 = vmul.f32 %v5240_v30, %v5240_v30  ;;  %vm918_vm8 = vmor %vm916_vm7, %vm917_vm6  ;;  %4259 = vmatmul.msk.bf16.gmra.mxu1 %vm335_vm1, %v309_v32  ;;  %vm926_vm10 = vweird.f32 %v5237_v8 }
 0x21c   :  { %v912_v21 = vmul.f32 %v4479_v27, %v911_v31  ;;  %v909_v57 = vsel %vm5246_vm5, %v4477_v50, %v905_v34  ;;  %v5288_v31 = vld [vmem:[%s8086_s7 + $0x2] ss:$0 sm:$0xff] }
 0x21d   :  { %v764_v40 = vsel %vm117_vm0, %v716_v7, 0.0  ;;  %v1220_v61 = vmul.f32 %v909_v57, %v5099_v18 }
 0x21e   :  { %v913_v43 = vmul.f32 0.5, %v912_v21  ;;  %v751_v44 = vpop.xlane.xlu2 %750  ;;  %v570_v45 = vpop.xlane.xlu1 %569  ;;  %765 = vadd.xlane.f32.xlu1 %v764_v40  ;;  %v5295_v40 = vadd.f32 %v5009_v42, %v489_v25 }
 0x21f   :  { %v839_v35 = vmul.f32 %v751_v44, %v5093_v1  ;;  %v653_v16 = vmul.f32 %v5093_v1, %v570_v45  ;;  %v1253_v34 = vmul.f32 %v5271_v62, %v1220_v61 }
 0x220   :  { %v914_v47 = vsub.f32 1.5, %v913_v43  ;;  %v589_v4 = vsel %vm117_vm0, %v5295_v40, 0.0 }
 0x221   :  { %v5260_v58 = vpop.eup %4480  ;;  %v5262_v50 = vadd.f32 1e-05, %v839_v35  ;;  %v5265_v60 = vsub.f32 %v5148_v17, %v653_v16  ;;  %v5303_v45 = vadd.f32 %v5288_v31, %v1253_v34  ;;  %v250_v34 = vpop.f32.mrf.mxu0 }
 0x222   :  { %v915_v0 = vmul.f32 %v4479_v27, %v914_v47  ;;  %v921_v29 = vmul.f32 %v5260_v58, %v5237_v8  ;;  %vm927_vm9 = vweird.f32 %v5260_v58  ;;  %v438_v47 = vpop.f32.mrf.mxu1 }
 0x223   :  { %4482 = vrsqrt.f32 %v5262_v50  ;;  %v717_v17 = vmul.f32 %v5265_v60, %v5265_v60  ;;  %vm5317_vm11 = vmor %vm926_vm10, %vm927_vm9  ;;  %vm936_vm13 = vweird.f32 %v5262_v50 }
 0x224   :  { %v919_v36 = vsel %vm918_vm8, %v4479_v27, %v915_v0  ;;  %v922_v18 = vmul.f32 %v5260_v58, %v921_v29  ;;  %v490_v0 = vadd.f32 %v435_v24, %v4962_v52 }
 0x225   :  { %v767_v53 = vsel %vm117_vm0, %v717_v17, 0.0  ;;  %v1221_v26 = vmul.f32 %v919_v36, %v5109_v46 }
 0x226   :  { %v923_v27 = vmul.f32 0.5, %v922_v18  ;;  %v754_v7 = vpop.xlane.xlu2 %753  ;;  %v573_v21 = vpop.xlane.xlu1 %572  ;;  %768 = vadd.xlane.f32.xlu2 %v767_v53  ;;  %587 = vadd.xlane.f32.xlu1 %v586_v6 }
 0x227   :  { %v840_v51 = vmul.f32 %v754_v7, %v5093_v1  ;;  %v654_v15 = vmul.f32 %v5093_v1, %v573_v21  ;;  %v1254_v12 = vmul.f32 %v5271_v62, %v1221_v26 }
 0x228   :  { %v924_v46 = vsub.f32 1.5, %v923_v27 }
 0x229   :  { %v4483_v57 = vpop.eup %4482  ;;  %v5297_v43 = vadd.f32 1e-05, %v840_v51  ;;  %v5300_v44 = vsub.f32 %v5162_v33, %v654_v15  ;;  %v5306_v35 = vadd.f32 %v5288_v31, %v1254_v12  ;;  %v491_v51 = vadd.f32 %v438_v47, %v4979_v20 }
 0x22a   :  { %v925_v16 = vmul.f32 %v5260_v58, %v924_v46  ;;  %v931_v59 = vmul.f32 %v4483_v57, %v5262_v50  ;;  %vm937_vm12 = vweird.f32 %v4483_v57  ;;  %v440_v15 = vpop.f32.mrf.mxu1 }
 0x22b   :  { %4484 = vrsqrt.f32 %v5297_v43  ;;  %v1323_v22 = vpack.c.bf16 %v5306_v35, %v5303_v45  ;;  %v718_v33 = vmul.f32 %v5300_v44, %v5300_v44  ;;  %vm938_vm14 = vmor %vm936_vm13, %vm937_vm12  ;;  %vm946_vm2 = vweird.f32 %v5297_v43 }
 0x22c   :  { %v932_v14 = vmul.f32 %v4483_v57, %v931_v59  ;;  %v929_v17 = vsel %vm5317_vm11, %v5260_v58, %v925_v16  ;;  %v5339_v58 = vadd.f32 %v5009_v42, %v490_v0 }
 0x22d   :  { %4274 = vmatmul.msk.bf16.vlgmr.msra.gmra.mxu2 %vm117_vm0, %v1323_v22  ;;  %v770_v29 = vsel %vm117_vm0, %v718_v33, 0.0  ;;  %v1222_v26 = vmul.f32 %v929_v17, %v5130_v55 }
 0x22e   :  { %v933_v10 = vmul.f32 0.5, %v932_v14  ;;  %v757_v8 = vpop.xlane.xlu0 %756  ;;  %v576_v36 = vpop.xlane.xlu2 %575  ;;  %771 = vadd.xlane.f32.xlu2 %v770_v29  ;;  %590 = vadd.xlane.f32.xlu1 %v589_v4  ;;  %v592_v50 = vsel %vm117_vm0, %v5339_v58, 0.0  ;;  %v5361_v14 = vadd.f32 %v5009_v42, %v491_v51 }
 0x22f   :  { %v841_v18 = vmul.f32 %v757_v8, %v5093_v1  ;;  %v655_v52 = vmul.f32 %v5093_v1, %v576_v36  ;;  %v1255_v46 = vmul.f32 %v5271_v62, %v1222_v26  ;;  %v252_v4 = vpop.f32.mrf.mxu0 }
 0x230   :  { %v934_v24 = vsub.f32 1.5, %v933_v10  ;;  %v253_v36 = vadd.f32 %v4931_v28, %v252_v4 }
 0x231   :  { %v5331_v25 = vpop.eup %4484  ;;  %v5333_v6 = vadd.f32 1e-05, %v841_v18  ;;  %v5336_v53 = vsub.f32 %v5182_v49, %v655_v52  ;;  %v5368_v0 = vadd.f32 %v5288_v31, %v1255_v46 }
 0x232   :  { %v935_v32 = vmul.f32 %v4483_v57, %v934_v24  ;;  %v941_v27 = vmul.f32 %v5331_v25, %v5297_v43  ;;  %vm947_vm15 = vweird.f32 %v5331_v25  ;;  %v492_v24 = vadd.f32 %v440_v15, %v4984_v23  ;;  %v443_v51 = vpop.f32.mrf.mxu1 }
 0x233   :  { %4486 = vrsqrt.f32 %v5333_v6  ;;  %v719_v7 = vmul.f32 %v5336_v53, %v5336_v53  ;;  %v286_v26 = vmax.f32 %v253_v36, 0.0  ;;  %vm5384_vm3 = vmor %vm946_vm2, %vm947_vm15  ;;  %vm956_vm5 = vweird.f32 %v5333_v6 }
 0x234   :  { %v939_v49 = vsel %vm938_vm14, %v4483_v57, %v935_v32  ;;  %v942_v21 = vmul.f32 %v5331_v25, %v941_v27  ;;  %v251_v57 = vadd.f32 %v4931_v28, %v250_v34  ;;  %v595_v32 = vsel %vm117_vm0, %v5361_v14, 0.0 }
 0x235   :  { %v773_v55 = vsel %vm117_vm0, %v719_v7, 0.0  ;;  %v1223_v12 = vmul.f32 %v939_v49, %v5145_v5  ;;  %v5397_v15 = vadd.f32 %v5009_v42, %v492_v24 }
 0x236   :  { %v943_v16 = vmul.f32 0.5, %v942_v21  ;;  %v5355_v59 = vpop.xlane.xlu0 %759  ;;  %v579_v22 = vpop.xlane.xlu2 %578  ;;  %774 = vadd.xlane.f32.xlu0 %v773_v55  ;;  %593 = vadd.xlane.f32.xlu2 %v592_v50  ;;  %v285_v8 = vmax.f32 %v251_v57, 0.0 }
 0x237   :  { %v656_v20 = vmul.f32 %v5093_v1, %v579_v22  ;;  %v1256_v47 = vmul.f32 %v5271_v62, %v1223_v12  ;;  %v493_v22 = vadd.f32 %v443_v51, %v4995_v37  ;;  %v842_v34 = vmul.f32 %v5355_v59, %v5093_v1 }
 0x238   :  { %v944_v33 = vsub.f32 1.5, %v943_v16  ;;  %v310_v7 = vpack.c.bf16 %v286_v26, %v285_v8  ;;  %v598_v16 = vsel %vm117_vm0, %v5397_v15, 0.0 }
 0x239   :  { %v4487_v61 = vpop.eup %4486  ;;  %v5365_v5 = vsub.f32 %v5195_v3, %v656_v20  ;;  %v5371_v29 = vadd.f32 %v5288_v31, %v1256_v47 }
 0x23a   :  { %v945_v17 = vmul.f32 %v5331_v25, %v944_v33  ;;  %v951_v10 = vmul.f32 %v4487_v61, %v5333_v6  ;;  %vm957_vm4 = vweird.f32 %v4487_v61  ;;  %4260 = vmatmul.msk.bf16.vlgmr.msra.gmra.mxu3 %vm335_vm1, %v310_v7  ;;  %v445_v4 = vpop.f32.mrf.mxu1 }
 0x23b   :  { %v1324_v18 = vpack.c.bf16 %v5371_v29, %v5368_v0  ;;  %v720_v3 = vmul.f32 %v5365_v5, %v5365_v5  ;;  %vm958_vm6 = vmor %vm956_vm5, %vm957_vm4  ;;  %v494_v8 = vadd.f32 %v445_v4, %v5000_v38 }
 0x23c   :  { %v952_v52 = vmul.f32 %v4487_v61, %v951_v10  ;;  %v949_v43 = vsel %vm5384_vm3, %v5331_v25, %v945_v17 }
 0x23d   :  { %4275 = vmatmul.msk.bf16.gmra.mxu2 %vm117_vm0, %v1324_v18  ;;  %v776_v28 = vsel %vm117_vm0, %v720_v3, 0.0  ;;  %v1224_v25 = vmul.f32 %v949_v43, %v5159_v9  ;;  %v5437_v18 = vadd.f32 %v5009_v42, %v494_v8 }
 0x23e   :  { %v953_v27 = vmul.f32 0.5, %v952_v52  ;;  %v582_v23 = vpop.xlane.xlu0 %581  ;;  %777 = vadd.xlane.f32.xlu0 %v776_v28  ;;  %596 = vadd.xlane.f32.xlu2 %v595_v32  ;;  %v874_v28 = vadd.f32 1e-05, %v842_v34 }
 0x23f   :  { %v657_v49 = vmul.f32 %v5093_v1, %v582_v23  ;;  %v1257_v20 = vmul.f32 %v5271_v62, %v1224_v25  ;;  %v604_v24 = vsel %vm117_vm0, %v5437_v18, 0.0  ;;  %v4437_v25 = vld [vmem:[%s8085_s6 + $0x30] sm:$0xff] }
 0x240   :  { %v954_v21 = vsub.f32 1.5, %v953_v27  ;;  %4488 = vrsqrt.f32 %v874_v28  ;;  %vm966_vm8 = vweird.f32 %v874_v28 }
 0x241   :  { %v5401_v55 = vsub.f32 %v5204_v63, %v657_v49 }
 0x242   :  { %v955_v50 = vmul.f32 %v4487_v61, %v954_v21  ;;  %v448_v3 = vpop.f32.mrf.mxu1 }
 0x243   :  { %v721_v12 = vmul.f32 %v5401_v55, %v5401_v55  ;;  %v495_v52 = vadd.f32 %v448_v3, %v5023_v2 }
 0x244   :  { %v959_v46 = vsel %vm958_vm6, %v4487_v61, %v955_v50  ;;  %v5419_v61 = vadd.f32 %v5288_v31, %v1257_v20 }
 0x245   :  { %v779_v57 = vsel %vm117_vm0, %v721_v12, 0.0  ;;  %v1225_v63 = vmul.f32 %v959_v46, %v5179_v48  ;;  %v5425_v48 = vadd.f32 %v5009_v42, %v493_v22  ;;  %v5443_v38 = vadd.f32 %v5009_v42, %v495_v52  ;;  %v4438_v42 = vld [vmem:[%s8085_s6 + $0x38] sm:$0xff]  ;;  %v4436_v22 = vld [vmem:[%s8085_s6 + $0x28] sm:$0xff] }
 0x246   :  { %v585_v9 = vpop.xlane.xlu0 %584  ;;  %780 = vadd.xlane.f32.xlu1 %v779_v57  ;;  %599 = vadd.xlane.f32.xlu0 %v598_v16  ;;  %v4489_v32 = vpop.eup %4488 }
 0x247   :  { %v658_v6 = vmul.f32 %v5093_v1, %v585_v9  ;;  %v1258_v47 = vmul.f32 %v5271_v62, %v1225_v63  ;;  %v601_v36 = vsel %vm117_vm0, %v5425_v48, 0.0  ;;  %v607_v26 = vsel %vm117_vm0, %v5443_v38, 0.0  ;;  %1626 = vmatpush.bf16.msrb.mxu3 %v4438_v42 }
 0x248   :  { %v961_v43 = vmul.f32 %v4489_v32, %v874_v28  ;;  %vm967_vm7 = vweird.f32 %v4489_v32 }
 0x249   :  { %v5416_v33 = vsub.f32 %v5210_v13, %v658_v6  ;;  %v5422_v37 = vadd.f32 %v5288_v31, %v1258_v47  ;;  %vm968_vm9 = vmor %vm966_vm8, %vm967_vm7 }
 0x24a   :  { %v962_v27 = vmul.f32 %v4489_v32, %v961_v43  ;;  %v450_v47 = vpop.f32.mrf.mxu1 }
 0x24b   :  { %v1325_v17 = vpack.c.bf16 %v5422_v37, %v5419_v61  ;;  %v722_v10 = vmul.f32 %v5416_v33, %v5416_v33  ;;  %1627 = vmatpush.bf16.msrb.mxu3 %v4437_v25 }
 0x24c   :  { %v963_v49 = vmul.f32 0.5, %v962_v27 }
 0x24d   :  { %4276 = vmatmul.msk.bf16.gmra.mxu2 %vm117_vm0, %v1325_v17  ;;  %v782_v13 = vsel %vm117_vm0, %v722_v10, 0.0  ;;  %v4435_v10 = vld [vmem:[%s8085_s6 + $0x20] sm:$0xff] }
 0x24e   :  { %783 = vadd.xlane.f32.xlu1 %v782_v13  ;;  %602 = vadd.xlane.f32.xlu0 %v601_v36  ;;  %v964_v21 = vsub.f32 1.5, %v963_v49 }
 0x24f   :  { %1628 = vmatpush.bf16.msrb.mxu3 %v4436_v22 }
 0x250   :  { %v965_v46 = vmul.f32 %v4489_v32, %v964_v21 }
 0x252   :  { %v969_v63 = vsel %vm968_vm9, %v4489_v32, %v965_v46  ;;  %v453_v42 = vpop.f32.mrf.mxu1 }
 0x253   :  { %v1226_v52 = vmul.f32 %v969_v63, %v5192_v19  ;;  %1629 = vmatpush.bf16.msrb.mxu3 %v4435_v10 }
 0x256   :  { %605 = vadd.xlane.f32.xlu1 %v604_v24 }
 0x25e   :  { %608 = vadd.xlane.f32.xlu1 %v607_v26 }
 0x289   :  { %v763_v2 = vpop.xlane.xlu1 %762 }
 0x28a   :  { %v843_v23 = vmul.f32 %v763_v2, %v5093_v1 }
 0x28c   :  { %v875_v7 = vadd.f32 1e-05, %v843_v23 }
 0x28e   :  { %4490 = vrsqrt.f32 %v875_v7  ;;  %vm976_vm11 = vweird.f32 %v875_v7 }
 0x291   :  { %v766_v51 = vpop.xlane.xlu1 %765 }
 0x292   :  { %v844_v59 = vmul.f32 %v766_v51, %v5093_v1 }
 0x294   :  { %v4491_v50 = vpop.eup %4490  ;;  %v876_v12 = vadd.f32 1e-05, %v844_v59 }
 0x295   :  { %v971_v16 = vmul.f32 %v4491_v50, %v875_v7  ;;  %vm977_vm10 = vweird.f32 %v4491_v50 }
 0x296   :  { %4492 = vrsqrt.f32 %v876_v12  ;;  %vm978_vm12 = vmor %vm976_vm11, %vm977_vm10  ;;  %vm986_vm14 = vweird.f32 %v876_v12 }
 0x297   :  { %v972_v57 = vmul.f32 %v4491_v50, %v971_v16 }
 0x299   :  { %v973_v20 = vmul.f32 0.5, %v972_v57  ;;  %v769_v9 = vpop.xlane.xlu2 %768  ;;  %v588_v6 = vpop.xlane.xlu1 %587 }
 0x29a   :  { %v845_v4 = vmul.f32 %v769_v9, %v5093_v1  ;;  %v659_v17 = vmul.f32 %v5093_v1, %v588_v6 }
 0x29b   :  { %v974_v8 = vsub.f32 1.5, %v973_v20  ;;  %v496_v20 = vadd.f32 %v450_v47, %v5028_v56 }
 0x29c   :  { %v4493_v13 = vpop.eup %4492  ;;  %v877_v36 = vadd.f32 1e-05, %v845_v4  ;;  %v5466_v3 = vsub.f32 %v5256_v39, %v659_v17  ;;  %v1259_v39 = vmul.f32 %v5271_v62, %v1226_v52 }
 0x29d   :  { %v975_v24 = vmul.f32 %v4491_v50, %v974_v8  ;;  %v981_v26 = vmul.f32 %v4493_v13, %v876_v12  ;;  %vm987_vm13 = vweird.f32 %v4493_v13 }
 0x29e   :  { %4494 = vrsqrt.f32 %v877_v36  ;;  %v723_v34 = vmul.f32 %v5466_v3, %v5466_v3  ;;  %vm5494_vm15 = vmor %vm986_vm14, %vm987_vm13  ;;  %vm996_vm3 = vweird.f32 %v877_v36 }
 0x29f   :  { %v979_v28 = vsel %vm978_vm12, %v4491_v50, %v975_v24  ;;  %v982_v32 = vmul.f32 %v4493_v13, %v981_v26 }
 0x2a0   :  { %v785_v43 = vsel %vm117_vm0, %v723_v34, 0.0  ;;  %v1227_v27 = vmul.f32 %v979_v28, %v5229_v54  ;;  %v5483_v54 = vadd.f32 %v5288_v31, %v1259_v39  ;;  %v455_v34 = vpop.f32.mrf.mxu1 }
 0x2a1   :  { %v983_v2 = vmul.f32 0.5, %v982_v32  ;;  %v772_v23 = vpop.xlane.xlu2 %771  ;;  %v591_v19 = vpop.xlane.xlu1 %590  ;;  %786 = vadd.xlane.f32.xlu2 %v785_v43 }
 0x2a2   :  { %v846_v7 = vmul.f32 %v772_v23, %v5093_v1  ;;  %v660_v49 = vmul.f32 %v5093_v1, %v591_v19  ;;  %v1260_v21 = vmul.f32 %v5271_v62, %v1227_v27  ;;  %v497_v23 = vadd.f32 %v453_v42, %v5074_v11 }
 0x2a3   :  { %v984_v51 = vsub.f32 1.5, %v983_v2 }
 0x2a4   :  { %v4495_v59 = vpop.eup %4494  ;;  %v5477_v25 = vadd.f32 1e-05, %v846_v7  ;;  %v5480_v50 = vsub.f32 %v5295_v40, %v660_v49  ;;  %v5486_v46 = vadd.f32 %v5288_v31, %v1260_v21 }
 0x2a5   :  { %v985_v16 = vmul.f32 %v4493_v13, %v984_v51  ;;  %v991_v22 = vmul.f32 %v4495_v59, %v877_v36  ;;  %vm997_vm2 = vweird.f32 %v4495_v59 }
 0x2a6   :  { %4496 = vrsqrt.f32 %v5477_v25  ;;  %v1326_v57 = vpack.c.bf16 %v5486_v46, %v5483_v54  ;;  %v724_v63 = vmul.f32 %v5480_v50, %v5480_v50  ;;  %vm998_vm4 = vmor %vm996_vm3, %vm997_vm2  ;;  %vm1006_vm6 = vweird.f32 %v5477_v25 }
 0x2a7   :  { %v992_v40 = vmul.f32 %v4495_v59, %v991_v22  ;;  %v989_v4 = vsel %vm5494_vm15, %v4493_v13, %v985_v16  ;;  %v5514_v13 = vld [vmem:[%s8086_s7] ss:$0 sm:$0xff] }
 0x2a8   :  { %4277 = vmatmul.msk.bf16.gmra.mxu2 %vm117_vm0, %v1326_v57  ;;  %v788_v6 = vsel %vm117_vm0, %v724_v63, 0.0  ;;  %v5517_v28 = vadd.f32 %v5514_v13, %v496_v20  ;;  %v1228_v32 = vmul.f32 %v989_v4, %v5240_v30  ;;  %v5538_v57 = vld [vmem:[%s8084_s5 + $0x1] ss:$0 sm:$0xff] }
 0x2a9   :  { %v993_v17 = vmul.f32 0.5, %v992_v40  ;;  %v775_v10 = vpop.xlane.xlu0 %774  ;;  %v594_v8 = vpop.xlane.xlu2 %593  ;;  %789 = vadd.xlane.f32.xlu2 %v788_v6 }
 0x2aa   :  { %v847_v12 = vmul.f32 %v775_v10, %v5093_v1  ;;  %v661_v52 = vmul.f32 %v5093_v1, %v594_v8  ;;  %v610_v30 = vsel %vm117_vm0, %v5517_v28, 0.0  ;;  %v1261_v49 = vmul.f32 %v5271_v62, %v1228_v32  ;;  %v458_v8 = vpop.f32.mrf.mxu1 }
 0x2ab   :  { %v994_v56 = vsub.f32 1.5, %v993_v17  ;;  %v498_v10 = vadd.f32 %v455_v34, %v5079_v41 }
 0x2ac   :  { %v5504_v47 = vpop.eup %4496  ;;  %v5506_v24 = vadd.f32 1e-05, %v847_v12  ;;  %v5509_v26 = vsub.f32 %v5339_v58, %v661_v52  ;;  %v5549_v9 = vadd.f32 %v5288_v31, %v1261_v49 }
 0x2ad   :  { %v995_v43 = vmul.f32 %v4495_v59, %v994_v56  ;;  %v1001_v27 = vmul.f32 %v5504_v47, %v5477_v25  ;;  %vm1007_vm5 = vweird.f32 %v5504_v47 }
 0x2ae   :  { %4498 = vrsqrt.f32 %v5506_v24  ;;  %v725_v58 = vmul.f32 %v5509_v26, %v5509_v26  ;;  %vm5565_vm7 = vmor %vm1006_vm6, %vm1007_vm5  ;;  %vm1016_vm9 = vweird.f32 %v5506_v24 }
 0x2af   :  { %v999_v39 = vsel %vm998_vm4, %v4495_v59, %v995_v43  ;;  %v1002_v2 = vmul.f32 %v5504_v47, %v1001_v27 }
 0x2b0   :  { %v1413_v19 = vpop.f32.mrf.mxu2  ;;  %v791_v7 = vsel %vm117_vm0, %v725_v58, 0.0  ;;  %v1229_v36 = vmul.f32 %v999_v39, %v5265_v60  ;;  %v5541_v60 = vadd.f32 %v5514_v13, %v497_v23 }
 0x2b1   :  { %v1003_v21 = vmul.f32 0.5, %v1002_v2  ;;  %v778_v51 = vpop.xlane.xlu0 %777  ;;  %v597_v16 = vpop.xlane.xlu2 %596  ;;  %792 = vadd.xlane.f32.xlu0 %v791_v7  ;;  %611 = vadd.xlane.f32.xlu2 %v610_v30  ;;  %v1414_v56 = vadd.f32 %v5538_v57, %v1413_v19  ;;  %v5580_v7 = vadd.f32 %v5514_v13, %v498_v10 }
 0x2b2   :  { %v848_v59 = vmul.f32 %v778_v51, %v5093_v1  ;;  %v662_v22 = vmul.f32 %v5093_v1, %v597_v16  ;;  %v1262_v11 = vmul.f32 %v5271_v62, %v1229_v36  ;;  %v613_v34 = vsel %vm117_vm0, %v5541_v60, 0.0  ;;  %v460_v10 = vpop.f32.mrf.mxu1 }
 0x2b3   :  { %v1004_v42 = vsub.f32 1.5, %v1003_v21  ;;  %v1493_v36 = vmax.f32 %v1414_v56, 0.0 }
 0x2b4   :  { %v4499_v63 = vpop.eup %4498  ;;  %v5543_v40 = vadd.f32 1e-05, %v848_v59  ;;  %v5546_v20 = vsub.f32 %v5361_v14, %v662_v22  ;;  %v5552_v6 = vadd.f32 %v5288_v31, %v1262_v11 }
 0x2b5   :  { %v1005_v4 = vmul.f32 %v5504_v47, %v1004_v42  ;;  %v1011_v17 = vmul.f32 %v4499_v63, %v5506_v24  ;;  %vm1017_vm8 = vweird.f32 %v4499_v63 }
 0x2b6   :  { %4500 = vrsqrt.f32 %v5543_v40  ;;  %v1327_v14 = vpack.c.bf16 %v5552_v6, %v5549_v9  ;;  %v726_v12 = vmul.f32 %v5546_v20, %v5546_v20  ;;  %vm1018_vm10 = vmor %vm1016_vm9, %vm1017_vm8  ;;  %vm1026_vm12 = vweird.f32 %v5543_v40 }
 0x2b7   :  { %v1012_v52 = vmul.f32 %v4499_v63, %v1011_v17  ;;  %v1009_v27 = vsel %vm5565_vm7, %v5504_v47, %v1005_v4 }
 0x2b8   :  { %v1415_v43 = vpop.f32.mrf.mxu2  ;;  %4278 = vmatmul.msk.bf16.gmra.mxu2 %vm117_vm0, %v1327_v14  ;;  %v794_v41 = vsel %vm117_vm0, %v726_v12, 0.0  ;;  %v1230_v16 = vmul.f32 %v1009_v27, %v5300_v44  ;;  %v616_v44 = vsel %vm117_vm0, %v5580_v7, 0.0 }
 0x2b9   :  { %v1013_v25 = vmul.f32 0.5, %v1012_v52  ;;  %v1416_v58 = vadd.f32 %v5538_v57, %v1415_v43  ;;  %v781_v39 = vpop.xlane.xlu1 %780  ;;  %v600_v2 = vpop.xlane.xlu0 %599  ;;  %795 = vadd.xlane.f32.xlu0 %v794_v41  ;;  %614 = vadd.xlane.f32.xlu2 %v613_v34 }
 0x2ba   :  { %v849_v23 = vmul.f32 %v781_v39, %v5093_v1  ;;  %v663_v19 = vmul.f32 %v5093_v1, %v600_v2 }
 0x2bb   :  { %v1014_v30 = vsub.f32 1.5, %v1013_v25  ;;  %v1494_v49 = vmax.f32 %v1416_v58, 0.0 }
 0x2bc   :  { %v5582_v21 = vpop.eup %4500  ;;  %v5584_v47 = vadd.f32 1e-05, %v849_v23  ;;  %v5587_v51 = vsub.f32 %v5397_v15, %v663_v19  ;;  %v4669_v15 = vld [vmem:[%s8079_s0 + $0xd0] sm:$0xff] }
 0x2bd   :  { %v1015_v59 = vmul.f32 %v4499_v63, %v1014_v30  ;;  %v1021_v22 = vmul.f32 %v5582_v21, %v5543_v40  ;;  %v1534_v11 = vpack.c.bf16 %v1494_v49, %v1493_v36  ;;  %v499_v24 = vadd.f32 %v4669_v15, %v458_v8 }
 0x2be   :  { %4502 = vrsqrt.f32 %v5584_v47  ;;  %v727_v42 = vmul.f32 %v5587_v51, %v5587_v51  ;;  %vm1027_vm11 = vweird.f32 %v5582_v21  ;;  %vm1036_vm15 = vweird.f32 %v5584_v47 }
 0x2bf   :  { %v1019_v4 = vsel %vm1018_vm10, %v4499_v63, %v1015_v59  ;;  %v1022_v17 = vmul.f32 %v5582_v21, %v1021_v22  ;;  %4314 = vmatmul.msk.bf16.vlgmr.msrb.gmra.mxu3 %vm335_vm1, %v1534_v11  ;;  %v1263_v63 = vmul.f32 %v5271_v62, %v1230_v16  ;;  %v5620_v39 = vadd.f32 %v5514_v13, %v499_v24  ;;  %vm5634_vm13 = vmor %vm1026_vm12, %vm1027_vm11 }
 0x2c0   :  { %v1418_v14 = vpop.f32.mrf.mxu2  ;;  %v797_v12 = vsel %vm117_vm0, %v727_v42, 0.0  ;;  %v1231_v52 = vmul.f32 %v1019_v4, %v5336_v53 }
 0x2c1   :  { %v1023_v56 = vmul.f32 0.5, %v1022_v17  ;;  %v5606_v32 = vpop.xlane.xlu1 %783  ;;  %v603_v43 = vpop.xlane.xlu0 %602  ;;  %798 = vadd.xlane.f32.xlu1 %v797_v12  ;;  %617 = vadd.xlane.f32.xlu0 %v616_v44  ;;  %v5614_v58 = vadd.f32 %v5288_v31, %v1263_v63  ;;  %v1419_v16 = vadd.f32 %v5538_v57, %v1418_v14  ;;  %v619_v42 = vsel %vm117_vm0, %v5620_v39, 0.0 }
 0x2c2   :  { %v664_v41 = vmul.f32 %v5093_v1, %v603_v43  ;;  %v1264_v34 = vmul.f32 %v5271_v62, %v1231_v52  ;;  %v463_v12 = vpop.f32.mrf.mxu1 }
 0x2c3   :  { %v1024_v27 = vsub.f32 1.5, %v1023_v56  ;;  %v1495_v14 = vmax.f32 %v1419_v16, 0.0 }
 0x2c4   :  { %v4503_v8 = vpop.eup %4502  ;;  %v5611_v25 = vsub.f32 %v5425_v48, %v664_v41  ;;  %v5617_v53 = vadd.f32 %v5288_v31, %v1264_v34  ;;  %v4670_v48 = vld [vmem:[%s8079_s0 + $0xd8] sm:$0xff] }
 0x2c5   :  { %v1025_v2 = vmul.f32 %v5582_v21, %v1024_v27  ;;  %v1031_v23 = vmul.f32 %v4503_v8, %v5584_v47  ;;  %v500_v19 = vadd.f32 %v4670_v48, %v460_v10  ;;  %vm1037_vm14 = vweird.f32 %v4503_v8 }
 0x2c6   :  { %v1328_v30 = vpack.c.bf16 %v5617_v53, %v5614_v58  ;;  %v728_v36 = vmul.f32 %v5611_v25, %v5611_v25  ;;  %vm1038_vm2 = vmor %vm1036_vm15, %vm1037_vm14 }
 0x2c7   :  { %v1032_v49 = vmul.f32 %v4503_v8, %v1031_v23  ;;  %v1029_v4 = vsel %vm5634_vm13, %v5582_v21, %v1025_v2  ;;  %v5648_v24 = vadd.f32 %v5514_v13, %v500_v19 }
 0x2c8   :  { %v1420_v22 = vpop.f32.mrf.mxu2  ;;  %4279 = vmatmul.msk.bf16.gmra.mxu2 %vm117_vm0, %v1328_v30  ;;  %v800_v11 = vsel %vm117_vm0, %v728_v36, 0.0  ;;  %v1232_v21 = vmul.f32 %v1029_v4, %v5365_v5 }
 0x2c9   :  { %v1033_v40 = vmul.f32 0.5, %v1032_v49  ;;  %v1421_v17 = vadd.f32 %v5538_v57, %v1420_v22  ;;  %v606_v44 = vpop.xlane.xlu1 %605  ;;  %801 = vadd.xlane.f32.xlu1 %v800_v11  ;;  %620 = vadd.xlane.f32.xlu0 %v619_v42  ;;  %v622_v27 = vsel %vm117_vm0, %v5648_v24, 0.0 }
 0x2ca   :  { %v665_v15 = vmul.f32 %v5093_v1, %v606_v44  ;;  %v1265_v48 = vmul.f32 %v5271_v62, %v1232_v21  ;;  %v465_v59 = vpop.f32.mrf.mxu1 }
 0x2cb   :  { %v1034_v10 = vsub.f32 1.5, %v1033_v40  ;;  %v1496_v52 = vmax.f32 %v1421_v17, 0.0 }
 0x2cc   :  { %v5651_v63 = vsub.f32 %v5437_v18, %v665_v15  ;;  %v4671_v18 = vld [vmem:[%s8079_s0 + $0xe0] sm:$0xff]  ;;  %v5672_v49 = vadd.f32 %v5288_v31, %v1265_v48 }
 0x2cd   :  { %v1035_v56 = vmul.f32 %v4503_v8, %v1034_v10  ;;  %v1535_v43 = vpack.c.bf16 %v1496_v52, %v1495_v14  ;;  %v501_v2 = vadd.f32 %v4671_v18, %v463_v12  ;;  %v468_v12 = vpop.f32.mrf.mxu3  ;;  %v850_v18 = vmul.f32 %v5606_v32, %v5093_v1 }
 0x2ce   :  { %v729_v41 = vmul.f32 %v5651_v63, %v5651_v63 }
 0x2cf   :  { %v1039_v34 = vsel %vm1038_vm2, %v4503_v8, %v1035_v56  ;;  %4315 = vmatmul.msk.bf16.gmra.mxu3 %vm335_vm1, %v1535_v43  ;;  %v4673_v56 = vld [vmem:[%s8079_s0 + $0xf0] sm:$0xff] }
 0x2d0   :  { %v1423_v5 = vpop.f32.mrf.mxu2  ;;  %v803_v23 = vsel %vm117_vm0, %v729_v41, 0.0  ;;  %v1233_v47 = vmul.f32 %v1039_v34, %v5401_v55  ;;  %v5678_v55 = vadd.f32 %v5514_v13, %v501_v2  ;;  %v503_v43 = vadd.f32 %v4673_v56, %v468_v12 }
 0x2d1   :  { %v609_v19 = vpop.xlane.xlu1 %608  ;;  %804 = vadd.xlane.f32.xlu2 %v803_v23  ;;  %623 = vadd.xlane.f32.xlu1 %v622_v27  ;;  %v1424_v42 = vadd.f32 %v5538_v57, %v1423_v5  ;;  %v882_v2 = vadd.f32 1e-05, %v850_v18 }
 0x2d2   :  { %v666_v8 = vmul.f32 %v5093_v1, %v609_v19  ;;  %v1266_v30 = vmul.f32 %v5271_v62, %v1233_v47  ;;  %v625_v44 = vsel %vm117_vm0, %v5678_v55, 0.0  ;;  %v5703_v34 = vadd.f32 %v5514_v13, %v503_v43 }
 0x2d3   :  { %v1497_v10 = vmax.f32 %v1424_v42, 0.0  ;;  %4504 = vrsqrt.f32 %v882_v2  ;;  %vm1046_vm4 = vweird.f32 %v882_v2 }
 0x2d4   :  { %v5669_v36 = vsub.f32 %v5443_v38, %v666_v8  ;;  %v5675_v16 = vadd.f32 %v5288_v31, %v1266_v30  ;;  %v4672_v38 = vld [vmem:[%s8079_s0 + $0xe8] sm:$0xff]  ;;  %v631_v27 = vsel %vm117_vm0, %v5703_v34, 0.0 }
 0x2d5   :  { %v502_v4 = vadd.f32 %v4672_v38, %v465_v59 }
 0x2d6   :  { %v1329_v22 = vpack.c.bf16 %v5675_v16, %v5672_v49  ;;  %v730_v11 = vmul.f32 %v5669_v36, %v5669_v36 }
 0x2d7   :  { %v5694_v52 = vadd.f32 %v5514_v13, %v502_v4 }
 0x2d8   :  { %v1425_v40 = vpop.f32.mrf.mxu2  ;;  %4280 = vmatmul.msk.bf16.gmra.mxu2 %vm117_vm0, %v1329_v22  ;;  %v806_v17 = vsel %vm117_vm0, %v730_v11, 0.0 }
 0x2d9   :  { %v1426_v15 = vadd.f32 %v5538_v57, %v1425_v40  ;;  %807 = vadd.xlane.f32.xlu2 %v806_v17  ;;  %626 = vadd.xlane.f32.xlu1 %v625_v44  ;;  %v628_v41 = vsel %vm117_vm0, %v5694_v52, 0.0  ;;  %v4505_v5 = vpop.eup %4504 }
 0x2da   :  { %v1041_v23 = vmul.f32 %v4505_v5, %v882_v2  ;;  %vm1047_vm3 = vweird.f32 %v4505_v5 }
 0x2db   :  { %v1498_v14 = vmax.f32 %v1426_v15, 0.0  ;;  %vm1048_vm5 = vmor %vm1046_vm4, %vm1047_vm3 }
 0x2dc   :  { %v1042_v47 = vmul.f32 %v4505_v5, %v1041_v23 }
 0x2dd   :  { %v1536_v21 = vpack.c.bf16 %v1498_v14, %v1497_v10 }
 0x2de   :  { %v1043_v30 = vmul.f32 0.5, %v1042_v47 }
 0x2df   :  { %4316 = vmatmul.msk.bf16.gmra.mxu3 %vm335_vm1, %v1536_v21 }
 0x2e0   :  { %v1044_v59 = vsub.f32 1.5, %v1043_v30 }
 0x2e1   :  { %629 = vadd.xlane.f32.xlu2 %v628_v41 }
 0x2e2   :  { %v1045_v4 = vmul.f32 %v4505_v5, %v1044_v59 }
 0x2e4   :  { %v1049_v17 = vsel %vm1048_vm5, %v4505_v5, %v1045_v4 }
 0x2e9   :  { %632 = vadd.xlane.f32.xlu2 %v631_v27  ;;  %v1234_v27 = vmul.f32 %v1049_v17, %v5416_v33 }
 0x314   :  { %v787_v48 = vpop.xlane.xlu2 %786 }
 0x315   :  { %v851_v19 = vmul.f32 %v787_v48, %v5093_v1 }
 0x317   :  { %v883_v8 = vadd.f32 1e-05, %v851_v19 }
 0x319   :  { %4506 = vrsqrt.f32 %v883_v8  ;;  %vm1056_vm7 = vweird.f32 %v883_v8 }
 0x31c   :  { %v790_v22 = vpop.xlane.xlu2 %789 }
 0x31d   :  { %v852_v11 = vmul.f32 %v790_v22, %v5093_v1 }
 0x31f   :  { %v4507_v42 = vpop.eup %4506  ;;  %v884_v38 = vadd.f32 1e-05, %v852_v11 }
 0x320   :  { %v1051_v32 = vmul.f32 %v4507_v42, %v883_v8  ;;  %vm1057_vm6 = vweird.f32 %v4507_v42 }
 0x321   :  { %4508 = vrsqrt.f32 %v884_v38  ;;  %vm1058_vm8 = vmor %vm1056_vm7, %vm1057_vm6  ;;  %vm1066_vm10 = vweird.f32 %v884_v38 }
 0x322   :  { %v1052_v40 = vmul.f32 %v4507_v42, %v1051_v32 }
 0x324   :  { %v1053_v44 = vmul.f32 0.5, %v1052_v40  ;;  %v793_v15 = vpop.xlane.xlu0 %792  ;;  %v612_v10 = vpop.xlane.xlu2 %611 }
 0x325   :  { %v853_v14 = vmul.f32 %v793_v15, %v5093_v1  ;;  %v667_v12 = vmul.f32 %v5093_v1, %v612_v10 }
 0x326   :  { %v1054_v21 = vsub.f32 1.5, %v1053_v44 }
 0x327   :  { %v4509_v56 = vpop.eup %4508  ;;  %v5713_v43 = vadd.f32 1e-05, %v853_v14  ;;  %v5716_v41 = vsub.f32 %v5517_v28, %v667_v12  ;;  %v1267_v28 = vmul.f32 %v5271_v62, %v1234_v27  ;;  %v470_v14 = vpop.f32.mrf.mxu3  ;;  %v4674_v27 = vld [vmem:[%s8079_s0 + $0xf8] sm:$0xff] }
 0x328   :  { %v1055_v18 = vmul.f32 %v4507_v42, %v1054_v21  ;;  %v1061_v2 = vmul.f32 %v4509_v56, %v884_v38  ;;  %vm1067_vm9 = vweird.f32 %v4509_v56 }
 0x329   :  { %4510 = vrsqrt.f32 %v5713_v43  ;;  %v731_v5 = vmul.f32 %v5716_v41, %v5716_v41  ;;  %vm5746_vm11 = vmor %vm1066_vm10, %vm1067_vm9  ;;  %vm1076_vm13 = vweird.f32 %v5713_v43 }
 0x32a   :  { %v1059_v23 = vsel %vm1058_vm8, %v4507_v42, %v1055_v18  ;;  %v1062_v47 = vmul.f32 %v4509_v56, %v1061_v2  ;;  %v504_v18 = vadd.f32 %v4674_v27, %v470_v14 }
 0x32b   :  { %v1428_v48 = vpop.f32.mrf.mxu2  ;;  %v809_v19 = vsel %vm117_vm0, %v731_v5, 0.0  ;;  %v1235_v30 = vmul.f32 %v1059_v23, %v5466_v3  ;;  %v5734_v3 = vadd.f32 %v5288_v31, %v1267_v28 }
 0x32c   :  { %v1063_v59 = vmul.f32 0.5, %v1062_v47  ;;  %v796_v33 = vpop.xlane.xlu0 %795  ;;  %v615_v22 = vpop.xlane.xlu2 %614  ;;  %810 = vadd.xlane.f32.xlu0 %v809_v19  ;;  %v1429_v21 = vadd.f32 %v5538_v57, %v1428_v48 }
 0x32d   :  { %v854_v8 = vmul.f32 %v796_v33, %v5093_v1  ;;  %v668_v11 = vmul.f32 %v5093_v1, %v615_v22  ;;  %v1268_v4 = vmul.f32 %v5271_v62, %v1235_v30 }
 0x32e   :  { %v1064_v32 = vsub.f32 1.5, %v1063_v59  ;;  %v1499_v33 = vmax.f32 %v1429_v21, 0.0  ;;  %v5786_v21 = vld [vmem:[%s8086_s7 + $0x1] ss:$0 sm:$0xff] }
 0x32f   :  { %v4511_v42 = vpop.eup %4510  ;;  %v5728_v40 = vadd.f32 1e-05, %v854_v8  ;;  %v5731_v17 = vsub.f32 %v5541_v60, %v668_v11  ;;  %v5737_v44 = vadd.f32 %v5288_v31, %v1268_v4  ;;  %v5768_v4 = vadd.f32 %v5514_v13, %v504_v18 }
 0x330   :  { %v1065_v15 = vmul.f32 %v4509_v56, %v1064_v32  ;;  %v1071_v10 = vmul.f32 %v4511_v42, %v5713_v43  ;;  %vm1077_vm12 = vweird.f32 %v4511_v42 }
 0x331   :  { %4512 = vrsqrt.f32 %v5728_v40  ;;  %v1330_v62 = vpack.c.bf16 %v5737_v44, %v5734_v3  ;;  %v732_v60 = vmul.f32 %v5731_v17, %v5731_v17  ;;  %vm1078_vm14 = vmor %vm1076_vm13, %vm1077_vm12  ;;  %vm1086_vm2 = vweird.f32 %v5728_v40 }
 0x332   :  { %v1072_v12 = vmul.f32 %v4511_v42, %v1071_v10  ;;  %v1069_v38 = vsel %vm5746_vm11, %v4509_v56, %v1065_v15 }
 0x333   :  { %v1430_v2 = vpop.f32.mrf.mxu2  ;;  %4281 = vmatmul.msk.bf16.gmra.mxu2 %vm117_vm0, %v1330_v62  ;;  %v812_v5 = vsel %vm117_vm0, %v732_v60, 0.0  ;;  %v1236_v32 = vmul.f32 %v1069_v38, %v5480_v50  ;;  %v634_v50 = vsel %vm117_vm0, %v5768_v4, 0.0 }
 0x334   :  { %v1073_v23 = vmul.f32 0.5, %v1072_v12  ;;  %v1431_v47 = vadd.f32 %v5538_v57, %v1430_v2  ;;  %v799_v48 = vpop.xlane.xlu1 %798  ;;  %v618_v19 = vpop.xlane.xlu0 %617  ;;  %813 = vadd.xlane.f32.xlu0 %v812_v5 }
 0x335   :  { %v855_v30 = vmul.f32 %v799_v48, %v5093_v1  ;;  %v669_v28 = vmul.f32 %v5093_v1, %v618_v19  ;;  %v1269_v31 = vmul.f32 %v5786_v21, %v1236_v32  ;;  %v5800_v19 = vld [vmem:[%s8086_s7 + $0x2] ss:$0 sm:$0xff] }
 0x336   :  { %v1074_v59 = vsub.f32 1.5, %v1073_v23  ;;  %v1500_v22 = vmax.f32 %v1431_v47, 0.0 }
 0x337   :  { %v5760_v8 = vpop.eup %4512  ;;  %v5762_v11 = vadd.f32 1e-05, %v855_v30  ;;  %v5765_v56 = vsub.f32 %v5580_v7, %v669_v28  ;;  %v5803_v30 = vadd.f32 %v5800_v19, %v1269_v31 }
 0x338   :  { %v1075_v15 = vmul.f32 %v4511_v42, %v1074_v59  ;;  %v1081_v10 = vmul.f32 %v5760_v8, %v5728_v40  ;;  %v1537_v14 = vpack.c.bf16 %v1500_v22, %v1499_v33  ;;  %vm1087_vm15 = vweird.f32 %v5760_v8 }
 0x339   :  { %4514 = vrsqrt.f32 %v5762_v11  ;;  %v733_v62 = vmul.f32 %v5765_v56, %v5765_v56  ;;  %vm5820_vm3 = vmor %vm1086_vm2, %vm1087_vm15  ;;  %vm1096_vm5 = vweird.f32 %v5762_v11 }
 0x33a   :  { %v1079_v7 = vsel %vm1078_vm14, %v4511_v42, %v1075_v15  ;;  %v1082_v60 = vmul.f32 %v5760_v8, %v1081_v10  ;;  %4317 = vmatmul.msk.bf16.gmra.mxu3 %vm335_vm1, %v1537_v14 }
 0x33b   :  { %v1433_v13 = vpop.f32.mrf.mxu2  ;;  %v815_v43 = vsel %vm117_vm0, %v733_v62, 0.0  ;;  %v1237_v12 = vmul.f32 %v1079_v7, %v5509_v26 }
 0x33c   :  { %v1083_v42 = vmul.f32 0.5, %v1082_v60  ;;  %v802_v27 = vpop.xlane.xlu1 %801  ;;  %635 = vadd.xlane.f32.xlu0 %v634_v50  ;;  %v621_v18 = vpop.xlane.xlu0 %620  ;;  %816 = vadd.xlane.f32.xlu1 %v815_v43  ;;  %v1434_v15 = vadd.f32 %v5538_v57, %v1433_v13 }
 0x33d   :  { %v856_v2 = vmul.f32 %v802_v27, %v5093_v1  ;;  %v670_v5 = vmul.f32 %v5093_v1, %v621_v18  ;;  %v1270_v38 = vmul.f32 %v5786_v21, %v1237_v12 }
 0x33e   :  { %v1084_v23 = vsub.f32 1.5, %v1083_v42  ;;  %v1501_v27 = vmax.f32 %v1434_v15, 0.0 }
 0x33f   :  { %v4515_v26 = vpop.eup %4514  ;;  %v5792_v47 = vadd.f32 1e-05, %v856_v2  ;;  %v5795_v48 = vsub.f32 %v5620_v39, %v670_v5  ;;  %v5806_v28 = vadd.f32 %v5800_v19, %v1270_v38 }
 0x340   :  { %v1085_v59 = vmul.f32 %v5760_v8, %v1084_v23  ;;  %v1091_v33 = vmul.f32 %v4515_v26, %v5762_v11  ;;  %vm1097_vm4 = vweird.f32 %v4515_v26 }
 0x341   :  { %4516 = vrsqrt.f32 %v5792_v47  ;;  %v1331_v39 = vpack.c.bf16 %v5806_v28, %v5803_v30  ;;  %v734_v22 = vmul.f32 %v5795_v48, %v5795_v48  ;;  %vm1098_vm6 = vmor %vm1096_vm5, %vm1097_vm4  ;;  %vm1106_vm8 = vweird.f32 %v5792_v47 }
 0x342   :  { %v1092_v32 = vmul.f32 %v4515_v26, %v1091_v33  ;;  %v5818_v10 = vpop.f32.mrf.mxu3  ;;  %v1089_v60 = vsel %vm5820_vm3, %v5760_v8, %v1085_v59 }
 0x343   :  { %v1435_v62 = vpop.f32.mrf.mxu2  ;;  %4282 = vmatmul.msk.bf16.gmra.mxu2 %vm117_vm0, %v1331_v39  ;;  %v818_v7 = vsel %vm117_vm0, %v734_v22, 0.0  ;;  %v1238_v8 = vmul.f32 %v1089_v60, %v5546_v20 }
 0x344   :  { %v1093_v50 = vmul.f32 0.5, %v1092_v32  ;;  %v1436_v40 = vadd.f32 %v5538_v57, %v1435_v62  ;;  %v805_v43 = vpop.xlane.xlu2 %804  ;;  %v624_v13 = vpop.xlane.xlu1 %623  ;;  %819 = vadd.xlane.f32.xlu1 %v818_v7 }
 0x345   :  { %v857_v12 = vmul.f32 %v805_v43, %v5093_v1  ;;  %v671_v31 = vmul.f32 %v5093_v1, %v624_v13  ;;  %v1271_v11 = vmul.f32 %v5786_v21, %v1238_v8 }
 0x346   :  { %v1094_v42 = vsub.f32 1.5, %v1093_v50  ;;  %v1502_v18 = vmax.f32 %v1436_v40, 0.0 }
 0x347   :  { %v4517_v2 = vpop.eup %4516  ;;  %v889_v5 = vadd.f32 1e-05, %v857_v12  ;;  %v5833_v38 = vsub.f32 %v5648_v24, %v671_v31  ;;  %v5854_v12 = vadd.f32 %v5800_v19, %v1271_v11 }
 0x348   :  { %v1095_v23 = vmul.f32 %v4515_v26, %v1094_v42  ;;  %v1101_v59 = vmul.f32 %v4517_v2, %v5792_v47  ;;  %v1538_v33 = vpack.c.bf16 %v1502_v18, %v1501_v27  ;;  %vm1107_vm7 = vweird.f32 %v4517_v2 }
 0x349   :  { %4518 = vrsqrt.f32 %v889_v5  ;;  %v735_v39 = vmul.f32 %v5833_v38, %v5833_v38  ;;  %vm5865_vm9 = vmor %vm1106_vm8, %vm1107_vm7  ;;  %vm1116_vm11 = vweird.f32 %v889_v5 }
 0x34a   :  { %v1099_v22 = vsel %vm1098_vm6, %v4515_v26, %v1095_v23  ;;  %v1102_v32 = vmul.f32 %v4517_v2, %v1101_v59  ;;  %v5840_v15 = vpop.f32.mrf.mxu3  ;;  %4318 = vmatmul.msk.bf16.gmra.mxu3 %vm335_vm1, %v1538_v33 }
 0x34b   :  { %v1438_v24 = vpop.f32.mrf.mxu2  ;;  %v821_v20 = vsel %vm117_vm0, %v735_v39, 0.0  ;;  %v1239_v14 = vmul.f32 %v1099_v22, %v5587_v51 }
 0x34c   :  { %v1103_v62 = vmul.f32 0.5, %v1102_v32  ;;  %v5846_v7 = vpop.xlane.xlu2 %807  ;;  %v627_v60 = vpop.xlane.xlu1 %626  ;;  %822 = vadd.xlane.f32.xlu2 %v821_v20 }
 0x34d   :  { %v672_v50 = vmul.f32 %v5093_v1, %v627_v60  ;;  %v1272_v26 = vmul.f32 %v5786_v21, %v1239_v14 }
 0x34e   :  { %v1104_v40 = vsub.f32 1.5, %v1103_v62 }
 0x34f   :  { %v4519_v43 = vpop.eup %4518  ;;  %v5851_v13 = vsub.f32 %v5678_v55, %v672_v50  ;;  %v5857_v51 = vadd.f32 %v5800_v19, %v1272_v26  ;;  %v1439_v55 = vadd.f32 %v5538_v57, %v1438_v24 }
 0x350   :  { %v1105_v31 = vmul.f32 %v4517_v2, %v1104_v40  ;;  %v1111_v42 = vmul.f32 %v4519_v43, %v889_v5  ;;  %vm1117_vm10 = vweird.f32 %v4519_v43  ;;  %v5892_v5 = vld [vmem:[%s8086_s7 + $0x4] ss:$0 sm:$0xff] }
 0x351   :  { %v1332_v27 = vpack.c.bf16 %v5857_v51, %v5854_v12  ;;  %v736_v18 = vmul.f32 %v5851_v13, %v5851_v13  ;;  %v1503_v11 = vmax.f32 %v1439_v55, 0.0  ;;  %vm1118_vm12 = vmor %vm1116_vm11, %vm1117_vm10 }
 0x352   :  { %v1112_v8 = vmul.f32 %v4519_v43, %v1111_v42  ;;  %v1109_v39 = vsel %vm5865_vm9, %v4517_v2, %v1105_v31  ;;  %v5873_v32 = vpop.f32.mrf.mxu3  ;;  %v1711_v42 = vadd.f32 %v5818_v10, %v5303_v45 }
 0x353   :  { %v1440_v59 = vpop.f32.mrf.mxu2  ;;  %4283 = vmatmul.msk.bf16.gmra.mxu2 %vm117_vm0, %v1332_v27  ;;  %v824_v33 = vsel %vm117_vm0, %v736_v18, 0.0  ;;  %v1240_v50 = vmul.f32 %v1109_v39, %v5611_v25 }
 0x354   :  { %v1113_v22 = vmul.f32 0.5, %v1112_v8  ;;  %v1441_v47 = vadd.f32 %v5538_v57, %v1440_v59  ;;  %825 = vadd.xlane.f32.xlu0 %v824_v33  ;;  %v630_v20 = vpop.xlane.xlu2 %629  ;;  %v5906_v59 = vadd.f32 %v5892_v5, %v1711_v42 }
 0x355   :  { %v673_v24 = vmul.f32 %v5093_v1, %v630_v20  ;;  %v1273_v25 = vmul.f32 %v5786_v21, %v1240_v50 }
 0x356   :  { %v1114_v14 = vsub.f32 1.5, %v1113_v22  ;;  %v1504_v62 = vmax.f32 %v1441_v47, 0.0 }
 0x357   :  { %v5878_v60 = vsub.f32 %v5694_v52, %v673_v24  ;;  %v1780_v24 = vsel %vm117_vm0, %v5906_v59, 0.0 }
 0x358   :  { %v1115_v26 = vmul.f32 %v4519_v43, %v1114_v14  ;;  %v1539_v2 = vpack.c.bf16 %v1504_v62, %v1503_v11 }
 0x359   :  { %v737_v40 = vmul.f32 %v5878_v60, %v5878_v60 }
 0x35a   :  { %v1119_v31 = vsel %vm1118_vm12, %v4519_v43, %v1115_v26  ;;  %4319 = vmatmul.msk.bf16.gmra.mxu3 %vm335_vm1, %v1539_v2  ;;  %v1638_v23 = vpop.f32.mrf.mxu3 }
 0x35b   :  { %v1241_v27 = vmul.f32 %v1119_v31, %v5651_v63  ;;  %v1443_v18 = vpop.f32.mrf.mxu2  ;;  %v827_v52 = vsel %vm117_vm0, %v737_v40, 0.0  ;;  %v5900_v63 = vadd.f32 %v5800_v19, %v1273_v25  ;;  %v1714_v47 = vadd.f32 %v1638_v23, %v5371_v29 }
 0x35c   :  { %828 = vadd.xlane.f32.xlu1 %v827_v52  ;;  %v633_v8 = vpop.xlane.xlu2 %632  ;;  %v1444_v22 = vadd.f32 %v5538_v57, %v1443_v18  ;;  %v858_v18 = vmul.f32 %v5846_v7, %v5093_v1 }
 0x35d   :  { %v674_v43 = vmul.f32 %v5093_v1, %v633_v8  ;;  %v1274_v55 = vmul.f32 %v5786_v21, %v1241_v27  ;;  %v5922_v26 = vadd.f32 %v5892_v5, %v1714_v47 }
 0x35e   :  { %v1505_v62 = vmax.f32 %v1444_v22, 0.0  ;;  %v890_v52 = vadd.f32 1e-05, %v858_v18 }
 0x35f   :  { %v5897_v45 = vsub.f32 %v5703_v34, %v674_v43  ;;  %v5903_v10 = vadd.f32 %v5800_v19, %v1274_v55  ;;  %v1712_v34 = vadd.f32 %v5840_v15, %v5306_v35  ;;  %v1789_v40 = vsel %vm117_vm0, %v5922_v26, 0.0 }
 0x360   :  { %4520 = vrsqrt.f32 %v890_v52  ;;  %vm1126_vm14 = vweird.f32 %v890_v52 }
 0x361   :  { %v1333_v33 = vpack.c.bf16 %v5903_v10, %v5900_v63  ;;  %v738_v39 = vmul.f32 %v5897_v45, %v5897_v45  ;;  %v5925_v35 = vadd.f32 %v5892_v5, %v1712_v34 }
 0x362   :  { %v1641_v29 = vpop.f32.mrf.mxu3 }
 0x363   :  { %v1445_v20 = vpop.f32.mrf.mxu2  ;;  %4284 = vmatmul.msk.bf16.gmra.mxu2 %vm117_vm0, %v1333_v33  ;;  %v830_v14 = vsel %vm117_vm0, %v738_v39, 0.0  ;;  %v1715_v2 = vadd.f32 %v1641_v29, %v5419_v61  ;;  %v1783_v31 = vsel %vm117_vm0, %v5925_v35, 0.0 }
 0x364   :  { %v1446_v11 = vadd.f32 %v5538_v57, %v1445_v20  ;;  %1781 = vadd.xlane.f32.xlu1 %v1780_v24  ;;  %831 = vadd.xlane.f32.xlu2 %v830_v14 }
 0x365   :  { %v5934_v42 = vadd.f32 %v5892_v5, %v1715_v2 }
 0x366   :  { %v1506_v50 = vmax.f32 %v1446_v11, 0.0  ;;  %v4521_v61 = vpop.eup %4520 }
 0x367   :  { %v1792_v27 = vsel %vm117_vm0, %v5934_v42, 0.0  ;;  %v1121_v25 = vmul.f32 %v4521_v61, %v890_v52  ;;  %vm1127_vm13 = vweird.f32 %v4521_v61 }
 0x368   :  { %v1540_v15 = vpack.c.bf16 %v1506_v50, %v1505_v62  ;;  %vm1128_vm15 = vmor %vm1126_vm14, %vm1127_vm13 }
 0x369   :  { %v1122_v8 = vmul.f32 %v4521_v61, %v1121_v25 }
 0x36a   :  { %4320 = vmatmul.msk.bf16.gmra.mxu3 %vm335_vm1, %v1540_v15 }
 0x36b   :  { %v1123_v33 = vmul.f32 0.5, %v1122_v8 }
 0x36c   :  { %1790 = vadd.xlane.f32.xlu1 %v1789_v40  ;;  %1784 = vadd.xlane.f32.xlu2 %v1783_v31 }
 0x36d   :  { %v1124_v39 = vsub.f32 1.5, %v1123_v33 }
 0x36f   :  { %v1125_v24 = vmul.f32 %v4521_v61, %v1124_v39  ;;  %v1713_v39 = vadd.f32 %v5873_v32, %v5368_v0 }
 0x371   :  { %v1129_v11 = vsel %vm1128_vm15, %v4521_v61, %v1125_v24  ;;  %v5966_v32 = vadd.f32 %v5892_v5, %v1713_v39 }
 0x374   :  { %1793 = vadd.xlane.f32.xlu2 %v1792_v27  ;;  %v1242_v27 = vmul.f32 %v1129_v11, %v5669_v36 }
 0x39f   :  { %v811_v43 = vpop.xlane.xlu0 %810 }
 0x3a0   :  { %v859_v55 = vmul.f32 %v811_v43, %v5093_v1  ;;  %v1643_v43 = vpop.f32.mrf.mxu3 }
 0x3a2   :  { %v891_v23 = vadd.f32 1e-05, %v859_v55 }
 0x3a4   :  { %4522 = vrsqrt.f32 %v891_v23  ;;  %vm1136_vm3 = vweird.f32 %v891_v23 }
 0x3a7   :  { %v814_v22 = vpop.xlane.xlu0 %813 }
 0x3a8   :  { %v860_v34 = vmul.f32 %v814_v22, %v5093_v1 }
 0x3aa   :  { %v4523_v47 = vpop.eup %4522  ;;  %v892_v20 = vadd.f32 1e-05, %v860_v34  ;;  %v1275_v34 = vmul.f32 %v5786_v21, %v1242_v27 }
 0x3ab   :  { %v1131_v7 = vmul.f32 %v4523_v47, %v891_v23  ;;  %vm1137_vm2 = vweird.f32 %v4523_v47 }
 0x3ac   :  { %4524 = vrsqrt.f32 %v892_v20  ;;  %vm1138_vm4 = vmor %vm1136_vm3, %vm1137_vm2  ;;  %v5960_v0 = vadd.f32 %v5800_v19, %v1275_v34  ;;  %vm1146_vm6 = vweird.f32 %v892_v20 }
 0x3ad   :  { %v1132_v14 = vmul.f32 %v4523_v47, %v1131_v7 }
 0x3af   :  { %v1133_v62 = vmul.f32 0.5, %v1132_v14  ;;  %v636_v50 = vpop.xlane.xlu0 %635  ;;  %v817_v29 = vpop.xlane.xlu1 %816 }
 0x3b0   :  { %v675_v15 = vmul.f32 %v5093_v1, %v636_v50  ;;  %v861_v2 = vmul.f32 %v817_v29, %v5093_v1 }
 0x3b1   :  { %v1134_v40 = vsub.f32 1.5, %v1133_v62 }
 0x3b2   :  { %v4525_v31 = vpop.eup %4524  ;;  %v5946_v18 = vsub.f32 %v5768_v4, %v675_v15  ;;  %v893_v25 = vadd.f32 1e-05, %v861_v2 }
 0x3b3   :  { %v1135_v52 = vmul.f32 %v4523_v47, %v1134_v40  ;;  %v1141_v8 = vmul.f32 %v4525_v31, %v892_v20  ;;  %vm1147_vm5 = vweird.f32 %v4525_v31 }
 0x3b4   :  { %4526 = vrsqrt.f32 %v893_v25  ;;  %v739_v61 = vmul.f32 %v5946_v18, %v5946_v18  ;;  %vm1148_vm7 = vmor %vm1146_vm6, %vm1147_vm5  ;;  %vm1156_vm9 = vweird.f32 %v893_v25 }
 0x3b5   :  { %v1139_v55 = vsel %vm1138_vm4, %v4523_v47, %v1135_v52  ;;  %v1142_v33 = vmul.f32 %v4525_v31, %v1141_v8  ;;  %v1716_v52 = vadd.f32 %v1643_v43, %v5422_v37 }
 0x3b6   :  { %v1243_v36 = vmul.f32 %v1139_v55, %v5716_v41  ;;  %v1448_v22 = vpop.f32.mrf.mxu2  ;;  %v833_v4 = vsel %vm117_vm0, %v739_v61, 0.0  ;;  %v1786_v61 = vsel %vm117_vm0, %v5966_v32, 0.0 }
 0x3b7   :  { %v1143_v23 = vmul.f32 0.5, %v1142_v33  ;;  %834 = vadd.xlane.f32.xlu0 %v833_v4  ;;  %v820_v24 = vpop.xlane.xlu1 %819  ;;  %v1449_v40 = vadd.f32 %v5538_v57, %v1448_v22 }
 0x3b8   :  { %v862_v7 = vmul.f32 %v820_v24, %v5093_v1  ;;  %v1276_v14 = vmul.f32 %v5786_v21, %v1243_v36  ;;  %v5980_v24 = vadd.f32 %v5892_v5, %v1716_v52 }
 0x3b9   :  { %v1144_v11 = vsub.f32 1.5, %v1143_v23  ;;  %v1507_v22 = vmax.f32 %v1449_v40, 0.0 }
 0x3ba   :  { %v4527_v47 = vpop.eup %4526  ;;  %v5957_v62 = vadd.f32 1e-05, %v862_v7  ;;  %v5963_v41 = vadd.f32 %v5800_v19, %v1276_v14 }
 0x3bb   :  { %v1145_v50 = vmul.f32 %v4525_v31, %v1144_v11  ;;  %v1151_v29 = vmul.f32 %v4527_v47, %v893_v25  ;;  %vm1157_vm8 = vweird.f32 %v4527_v47 }
 0x3bc   :  { %4528 = vrsqrt.f32 %v5957_v62  ;;  %v1334_v15 = vpack.c.bf16 %v5963_v41, %v5960_v0  ;;  %vm1158_vm10 = vmor %vm1156_vm9, %vm1157_vm8  ;;  %vm1166_vm12 = vweird.f32 %v5957_v62 }
 0x3bd   :  { %v1152_v2 = vmul.f32 %v4527_v47, %v1151_v29  ;;  %v1646_v27 = vpop.f32.mrf.mxu3  ;;  %v1149_v55 = vsel %vm1148_vm7, %v4525_v31, %v1145_v50 }
 0x3be   :  { %v1450_v8 = vpop.f32.mrf.mxu2  ;;  %4285 = vmatmul.msk.bf16.gmra.mxu2 %vm117_vm0, %v1334_v15  ;;  %v1244_v43 = vmul.f32 %v1149_v55, %v5731_v17  ;;  %v1717_v17 = vadd.f32 %v1646_v27, %v5483_v54 }
 0x3bf   :  { %v1153_v33 = vmul.f32 0.5, %v1152_v2  ;;  %v1451_v39 = vadd.f32 %v5538_v57, %v1450_v8  ;;  %1787 = vadd.xlane.f32.xlu0 %v1786_v61  ;;  %v823_v36 = vpop.xlane.xlu2 %822  ;;  %v1795_v2 = vsel %vm117_vm0, %v5980_v24, 0.0 }
 0x3c0   :  { %v863_v20 = vmul.f32 %v823_v36, %v5093_v1  ;;  %v1277_v25 = vmul.f32 %v5786_v21, %v1244_v43  ;;  %v6002_v27 = vadd.f32 %v5892_v5, %v1717_v17 }
 0x3c1   :  { %v1154_v4 = vsub.f32 1.5, %v1153_v33  ;;  %v1508_v34 = vmax.f32 %v1451_v39, 0.0 }
 0x3c2   :  { %v4529_v37 = vpop.eup %4528  ;;  %v895_v23 = vadd.f32 1e-05, %v863_v20 }
 0x3c3   :  { %v1155_v7 = vmul.f32 %v4527_v47, %v1154_v4  ;;  %v1161_v31 = vmul.f32 %v4529_v37, %v5957_v62  ;;  %v1541_v57 = vpack.c.bf16 %v1508_v34, %v1507_v22  ;;  %vm1167_vm11 = vweird.f32 %v4529_v37  ;;  %v6011_v22 = vld [vmem:[%s8084_s5 + $0x1] ss:$0 sm:$0xff] }
 0x3c4   :  { %4530 = vrsqrt.f32 %v895_v23  ;;  %vm1168_vm13 = vmor %vm1166_vm12, %vm1167_vm11  ;;  %vm1176_vm15 = vweird.f32 %v895_v23 }
 0x3c5   :  { %v1159_v14 = vsel %vm1158_vm10, %v4527_v47, %v1155_v7  ;;  %v1162_v11 = vmul.f32 %v4529_v37, %v1161_v31  ;;  %v5983_v50 = vpop.f32.mrf.mxu3  ;;  %4321 = vmatmul.msk.bf16.gmra.mxu3 %vm335_vm1, %v1541_v57  ;;  %v1798_v31 = vsel %vm117_vm0, %v6002_v27, 0.0 }
 0x3c6   :  { %v1245_v29 = vmul.f32 %v1159_v14, %v5765_v56  ;;  %v1453_v15 = vpop.f32.mrf.mxu2  ;;  %v5996_v56 = vadd.f32 %v5800_v19, %v1277_v25 }
 0x3c7   :  { %v1163_v40 = vmul.f32 0.5, %v1162_v11  ;;  %1796 = vadd.xlane.f32.xlu0 %v1795_v2  ;;  %v826_v52 = vpop.xlane.xlu0 %825  ;;  %v1454_v34 = vadd.f32 %v6011_v22, %v1453_v15 }
 0x3c8   :  { %v864_v47 = vmul.f32 %v826_v52, %v5093_v1  ;;  %v1278_v8 = vmul.f32 %v5786_v21, %v1245_v29 }
 0x3c9   :  { %v1164_v61 = vsub.f32 1.5, %v1163_v40  ;;  %v1509_v15 = vmax.f32 %v1454_v34, 0.0 }
 0x3ca   :  { %v4531_v55 = vpop.eup %4530  ;;  %v5993_v33 = vadd.f32 1e-05, %v864_v47  ;;  %v5999_v54 = vadd.f32 %v5800_v19, %v1278_v8 }
 0x3cb   :  { %v1165_v39 = vmul.f32 %v4529_v37, %v1164_v61  ;;  %v1171_v36 = vmul.f32 %v4531_v55, %v895_v23  ;;  %vm1177_vm14 = vweird.f32 %v4531_v55 }
 0x3cc   :  { %4532 = vrsqrt.f32 %v5993_v33  ;;  %v1335_v20 = vpack.c.bf16 %v5999_v54, %v5996_v56  ;;  %vm1178_vm2 = vmor %vm1176_vm15, %vm1177_vm14  ;;  %vm1186_vm4 = vweird.f32 %v5993_v33 }
 0x3cd   :  { %v1172_v4 = vmul.f32 %v4531_v55, %v1171_v36  ;;  %v6014_v43 = vpop.f32.mrf.mxu3  ;;  %v1169_v57 = vsel %vm1168_vm13, %v4529_v37, %v1165_v39 }
 0x3ce   :  { %v1455_v7 = vpop.f32.mrf.mxu2  ;;  %4286 = vmatmul.msk.bf16.gmra.mxu2 %vm117_vm0, %v1335_v20  ;;  %v1246_v40 = vmul.f32 %v1169_v57, %v5795_v48 }
 0x3cf   :  { %v1173_v14 = vmul.f32 0.5, %v1172_v4  ;;  %v1456_v62 = vadd.f32 %v6011_v22, %v1455_v7  ;;  %1799 = vadd.xlane.f32.xlu0 %v1798_v31  ;;  %v829_v11 = vpop.xlane.xlu1 %828 }
 0x3d0   :  { %v865_v29 = vmul.f32 %v829_v11, %v5093_v1  ;;  %v1279_v34 = vmul.f32 %v5786_v21, %v1246_v40 }
 0x3d1   :  { %v1174_v17 = vsub.f32 1.5, %v1173_v14  ;;  %v1510_v2 = vmax.f32 %v1456_v62, 0.0 }
 0x3d2   :  { %v4533_v25 = vpop.eup %4532  ;;  %v897_v52 = vadd.f32 1e-05, %v865_v29  ;;  %v6036_v11 = vadd.f32 %v5800_v19, %v1279_v34  ;;  %v4440_v34 = vld [vmem:[%s8087_s8 + $0x8] sm:$0xff] }
 0x3d3   :  { %v1175_v47 = vmul.f32 %v4531_v55, %v1174_v17  ;;  %v1181_v8 = vmul.f32 %v4533_v25, %v5993_v33  ;;  %v1542_v37 = vpack.c.bf16 %v1510_v2, %v1509_v15  ;;  %vm1187_vm3 = vweird.f32 %v4533_v25  ;;  %2702 = vmatpush.bf16.msrb.mxu0 %v4440_v34 }
 0x3d4   :  { %4534 = vrsqrt.f32 %v897_v52  ;;  %v1718_v15 = vadd.f32 %v5983_v50, %v5486_v46  ;;  %vm6049_vm5 = vmor %vm1186_vm4, %vm1187_vm3  ;;  %vm1196_vm7 = vweird.f32 %v897_v52 }
 0x3d5   :  { %v1179_v61 = vsel %vm1178_vm2, %v4531_v55, %v1175_v47  ;;  %v1182_v39 = vmul.f32 %v4533_v25, %v1181_v8  ;;  %v6023_v36 = vpop.f32.mrf.mxu3  ;;  %4322 = vmatmul.msk.bf16.gmra.mxu3 %vm335_vm1, %v1542_v37  ;;  %v1719_v8 = vadd.f32 %v6014_v43, %v5549_v9 }
 0x3d6   :  { %v1247_v20 = vmul.f32 %v1179_v61, %v5833_v38  ;;  %v1458_v4 = vpop.f32.mrf.mxu2 }
 0x3d7   :  { %v1183_v48 = vmul.f32 0.5, %v1182_v39  ;;  %v1782_v7 = vpop.xlane.xlu1 %1781  ;;  %v6028_v31 = vpop.xlane.xlu2 %831  ;;  %v1459_v47 = vadd.f32 %v6011_v22, %v1458_v4 }
 0x3d8   :  { %v1876_v23 = vmul.f32 %v1782_v7, %v5093_v1  ;;  %v1280_v57 = vmul.f32 %v5786_v21, %v1247_v20 }
 0x3d9   :  { %v1184_v14 = vsub.f32 1.5, %v1183_v48 }
 0x3da   :  { %v4535_v55 = vpop.eup %4534  ;;  %v6033_v62 = vsub.f32 %v5906_v59, %v1876_v23  ;;  %v6039_v38 = vadd.f32 %v5800_v19, %v1280_v57  ;;  %v6066_v23 = vadd.f32 %v5892_v5, %v1718_v15 }
 0x3db   :  { %v1185_v29 = vmul.f32 %v4533_v25, %v1184_v14  ;;  %v1191_v17 = vmul.f32 %v4535_v55, %v897_v52  ;;  %vm1197_vm6 = vweird.f32 %v4535_v55 }
 0x3dc   :  { %v1336_v2 = vpack.c.bf16 %v6039_v38, %v6036_v11  ;;  %v1940_v40 = vmul.f32 %v6033_v62, %v6033_v62  ;;  %vm1198_vm8 = vmor %vm1196_vm7, %vm1197_vm6 }
 0x3dd   :  { %v1192_v59 = vmul.f32 %v4535_v55, %v1191_v17  ;;  %v6053_v37 = vpop.f32.mrf.mxu3  ;;  %v1189_v50 = vsel %vm6049_vm5, %v4533_v25, %v1185_v29  ;;  %v1511_v25 = vmax.f32 %v1459_v47, 0.0 }
 0x3de   :  { %v1460_v61 = vpop.f32.mrf.mxu2  ;;  %4287 = vmatmul.msk.bf16.gmra.mxu2 %vm117_vm0, %v1336_v2  ;;  %v1972_v46 = vsel %vm117_vm0, %v1940_v40, 0.0  ;;  %v1248_v29 = vmul.f32 %v1189_v50, %v5851_v13 }
 0x3df   :  { %v1193_v39 = vmul.f32 0.5, %v1192_v59  ;;  %v1461_v33 = vadd.f32 %v6011_v22, %v1460_v61  ;;  %1973 = vadd.xlane.f32.xlu1 %v1972_v46  ;;  %v1791_v20 = vpop.xlane.xlu1 %1790  ;;  %v1785_v4 = vpop.xlane.xlu2 %1784 }
 0x3e0   :  { %v1879_v48 = vmul.f32 %v1791_v20, %v5093_v1  ;;  %v1877_v7 = vmul.f32 %v1785_v4, %v5093_v1  ;;  %v1281_v50 = vmul.f32 %v5786_v21, %v1248_v29  ;;  %v6100_v4 = vadd.f32 %v5892_v5, %v1719_v8 }
 0x3e1   :  { %v1194_v57 = vsub.f32 1.5, %v1193_v39  ;;  %v1512_v14 = vmax.f32 %v1461_v33, 0.0 }
 0x3e2   :  { %v6070_v17 = vsub.f32 %v5922_v26, %v1879_v48  ;;  %v6073_v2 = vsub.f32 %v5925_v35, %v1877_v7  ;;  %v1801_v26 = vsel %vm117_vm0, %v6066_v23, 0.0 }
 0x3e3   :  { %v1195_v40 = vmul.f32 %v4535_v55, %v1194_v57  ;;  %v1543_v59 = vpack.c.bf16 %v1512_v14, %v1511_v25  ;;  %v1804_v25 = vsel %vm117_vm0, %v6100_v4, 0.0 }
 0x3e4   :  { %v1943_v15 = vmul.f32 %v6070_v17, %v6070_v17  ;;  %v1941_v47 = vmul.f32 %v6073_v2, %v6073_v2 }
 0x3e5   :  { %v1199_v13 = vsel %vm1198_vm8, %v4535_v55, %v1195_v40  ;;  %4323 = vmatmul.msk.bf16.gmra.mxu3 %vm335_vm1, %v1543_v59  ;;  %v1658_v55 = vpop.f32.mrf.mxu3 }
 0x3e6   :  { %v1249_v35 = vmul.f32 %v1199_v13, %v5878_v60  ;;  %v1463_v52 = vpop.f32.mrf.mxu2  ;;  %v1981_v61 = vsel %vm117_vm0, %v1943_v15, 0.0  ;;  %v1975_v46 = vsel %vm117_vm0, %v1941_v47, 0.0  ;;  %v6094_v60 = vadd.f32 %v5800_v19, %v1281_v50 }
 0x3e7   :  { %1802 = vadd.xlane.f32.xlu1 %v1801_v26  ;;  %1982 = vadd.xlane.f32.xlu0 %v1981_v61  ;;  %v1794_v39 = vpop.xlane.xlu2 %1793  ;;  %v1464_v7 = vadd.f32 %v6011_v22, %v1463_v52  ;;  %v866_v52 = vmul.f32 %v6028_v31, %v5093_v1 }
 0x3e8   :  { %1976 = vadd.xlane.f32.xlu2 %v1975_v46  ;;  %v1880_v9 = vmul.f32 %v1794_v39, %v5093_v1  ;;  %v1282_v43 = vmul.f32 %v5786_v21, %v1249_v35 }
 0x3e9   :  { %v1513_v40 = vmax.f32 %v1464_v7, 0.0  ;;  %v898_v61 = vadd.f32 1e-05, %v866_v52 }
 0x3ea   :  { %v6091_v33 = vsub.f32 %v5934_v42, %v1880_v9  ;;  %v6097_v20 = vadd.f32 %v5800_v19, %v1282_v43  ;;  %v1722_v42 = vadd.f32 %v1658_v55, %v5617_v53 }
 0x3eb   :  { %4536 = vrsqrt.f32 %v898_v61  ;;  %vm1206_vm10 = vweird.f32 %v898_v61 }
 0x3ec   :  { %v1337_v34 = vpack.c.bf16 %v6097_v20, %v6094_v60  ;;  %v1944_v48 = vmul.f32 %v6091_v33, %v6091_v33  ;;  %v6114_v15 = vadd.f32 %v5892_v5, %v1722_v42 }
 0x3ed   :  { %v1661_v47 = vpop.f32.mrf.mxu3 }
 0x3ee   :  { %v1465_v57 = vpop.f32.mrf.mxu2  ;;  %4288 = vmatmul.msk.bf16.gmra.mxu2 %vm117_vm0, %v1337_v34  ;;  %v1984_v14 = vsel %vm117_vm0, %v1944_v48, 0.0  ;;  %v1723_v53 = vadd.f32 %v1661_v47, %v5672_v49  ;;  %v1813_v13 = vsel %vm117_vm0, %v6114_v15, 0.0 }
 0x3ef   :  { %v1466_v29 = vadd.f32 %v6011_v22, %v1465_v57  ;;  %1805 = vadd.xlane.f32.xlu1 %v1804_v25  ;;  %1985 = vadd.xlane.f32.xlu0 %v1984_v14 }
 0x3f0   :  { %v6121_v26 = vadd.f32 %v5892_v5, %v1723_v53 }
 0x3f1   :  { %v1514_v59 = vmax.f32 %v1466_v29, 0.0  ;;  %v4537_v46 = vpop.eup %4536  ;;  %v1720_v29 = vadd.f32 %v6023_v36, %v5552_v6 }
 0x3f2   :  { %v1816_v35 = vsel %vm117_vm0, %v6121_v26, 0.0  ;;  %v1201_v50 = vmul.f32 %v4537_v46, %v898_v61  ;;  %vm1207_vm9 = vweird.f32 %v4537_v46 }
 0x3f3   :  { %v1544_v8 = vpack.c.bf16 %v1514_v59, %v1513_v40  ;;  %vm1208_vm11 = vmor %vm1206_vm10, %vm1207_vm9 }
 0x3f4   :  { %v1202_v39 = vmul.f32 %v4537_v46, %v1201_v50 }
 0x3f5   :  { %4324 = vmatmul.msk.bf16.gmra.mxu3 %vm335_vm1, %v1544_v8 }
 0x3f6   :  { %v1203_v55 = vmul.f32 0.5, %v1202_v39 }
 0x3f7   :  { %1814 = vadd.xlane.f32.xlu0 %v1813_v13 }
 0x3f8   :  { %v1204_v34 = vsub.f32 1.5, %v1203_v55 }
 0x3fa   :  { %v1205_v31 = vmul.f32 %v4537_v46, %v1204_v34 }
 0x3fc   :  { %v1209_v47 = vsel %vm1208_vm11, %v4537_v46, %v1205_v31  ;;  %v1663_v46 = vpop.f32.mrf.mxu3 }
 0x3fd   :  { %v1250_v52 = vmul.f32 %v1209_v47, %v5897_v45 }
 0x3ff   :  { %1817 = vadd.xlane.f32.xlu0 %v1816_v35  ;;  %v6139_v35 = vadd.f32 %v5892_v5, %v1720_v29  ;;  %v1283_v55 = vmul.f32 %v5786_v21, %v1250_v52 }
 0x401   :  { %v1807_v39 = vsel %vm117_vm0, %v6139_v35, 0.0 }
 0x42a   :  { %v835_v49 = vpop.xlane.xlu0 %834 }
 0x42b   :  { %v867_v9 = vmul.f32 %v835_v49, %v5093_v1  ;;  %v1721_v49 = vadd.f32 %v6053_v37, %v5614_v58 }
 0x42d   :  { %v899_v43 = vadd.f32 1e-05, %v867_v9 }
 0x42f   :  { %4538 = vrsqrt.f32 %v899_v43  ;;  %vm1216_vm13 = vweird.f32 %v899_v43 }
 0x432   :  { %v1788_v48 = vpop.xlane.xlu0 %1787 }
 0x433   :  { %v1878_v7 = vmul.f32 %v1788_v48, %v5093_v1 }
 0x435   :  { %v4539_v42 = vpop.eup %4538  ;;  %v6130_v57 = vsub.f32 %v5966_v32, %v1878_v7 }
 0x436   :  { %v1211_v25 = vmul.f32 %v4539_v42, %v899_v43  ;;  %vm1217_vm12 = vweird.f32 %v4539_v42 }
 0x437   :  { %v1942_v14 = vmul.f32 %v6130_v57, %v6130_v57  ;;  %vm1218_vm14 = vmor %vm1216_vm13, %vm1217_vm12 }
 0x438   :  { %v1212_v40 = vmul.f32 %v4539_v42, %v1211_v25 }
 0x439   :  { %v1978_v59 = vsel %vm117_vm0, %v1942_v14, 0.0 }
 0x43a   :  { %v1213_v8 = vmul.f32 0.5, %v1212_v40  ;;  %v1797_v53 = vpop.xlane.xlu0 %1796  ;;  %1979 = vadd.xlane.f32.xlu2 %v1978_v59 }
 0x43b   :  { %v1881_v32 = vmul.f32 %v1797_v53, %v5093_v1 }
 0x43c   :  { %v1214_v13 = vsub.f32 1.5, %v1213_v8 }
 0x43d   :  { %v6143_v6 = vsub.f32 %v5980_v24, %v1881_v32 }
 0x43e   :  { %v1215_v36 = vmul.f32 %v4539_v42, %v1214_v13 }
 0x43f   :  { %v1945_v61 = vmul.f32 %v6143_v6, %v6143_v6 }
 0x440   :  { %v1219_v50 = vsel %vm1218_vm14, %v4539_v42, %v1215_v36  ;;  %v6160_v42 = vadd.f32 %v5800_v19, %v1283_v55 }
 0x441   :  { %v1251_v9 = vmul.f32 %v1219_v50, %v5946_v18  ;;  %v1468_v45 = vpop.f32.mrf.mxu2  ;;  %v1987_v24 = vsel %vm117_vm0, %v1945_v61, 0.0  ;;  %v6166_v18 = vadd.f32 %v5892_v5, %v1721_v49 }
 0x442   :  { %v1800_v43 = vpop.xlane.xlu0 %1799  ;;  %1988 = vadd.xlane.f32.xlu1 %v1987_v24  ;;  %1808 = vadd.xlane.f32.xlu2 %v1807_v39  ;;  %v4439_v39 = vld [vmem:[%s8087_s8] sm:$0xff] }
 0x443   :  { %v1882_v34 = vmul.f32 %v1800_v43, %v5093_v1  ;;  %v1284_v48 = vmul.f32 %v5786_v21, %v1251_v9  ;;  %v1469_v21 = vadd.f32 %v6011_v22, %v1468_v45  ;;  %v1810_v29 = vsel %vm117_vm0, %v6166_v18, 0.0  ;;  %2703 = vmatpush.bf16.msrb.mxu0 %v4439_v39 }
 0x445   :  { %v6157_v7 = vsub.f32 %v6002_v27, %v1882_v34  ;;  %v6163_v58 = vadd.f32 %v5800_v19, %v1284_v48  ;;  %v1724_v27 = vadd.f32 %v1663_v46, %v5675_v16  ;;  %v1515_v59 = vmax.f32 %v1469_v21, 0.0 }
 0x447   :  { %v1338_v37 = vpack.c.bf16 %v6163_v58, %v6160_v42  ;;  %v1946_v31 = vmul.f32 %v6157_v7, %v6157_v7  ;;  %v6180_v8 = vadd.f32 %v5892_v5, %v1724_v27 }
 0x448   :  { %v1666_v25 = vpop.f32.mrf.mxu3 }
 0x449   :  { %v1470_v14 = vpop.f32.mrf.mxu2  ;;  %4289 = vmatmul.msk.bf16.gmra.mxu2 %vm117_vm0, %v1338_v37  ;;  %v1990_v19 = vsel %vm117_vm0, %v1946_v31, 0.0  ;;  %v1725_v16 = vadd.f32 %v1666_v25, %v5734_v3  ;;  %v1819_v52 = vsel %vm117_vm0, %v6180_v8, 0.0 }
 0x44a   :  { %v1471_v40 = vadd.f32 %v6011_v22, %v1470_v14  ;;  %1991 = vadd.xlane.f32.xlu1 %v1990_v19  ;;  %1811 = vadd.xlane.f32.xlu2 %v1810_v29 }
 0x44b   :  { %v6188_v50 = vadd.f32 %v5892_v5, %v1725_v16 }
 0x44c   :  { %v1516_v47 = vmax.f32 %v1471_v40, 0.0 }
 0x44d   :  { %v1822_v45 = vsel %vm117_vm0, %v6188_v50, 0.0 }
 0x44e   :  { %v1545_v53 = vpack.c.bf16 %v1516_v47, %v1515_v59 }
 0x450   :  { %v1668_v32 = vpop.f32.mrf.mxu3  ;;  %4325 = vmatmul.msk.bf16.gmra.mxu3 %vm335_vm1, %v1545_v53 }
 0x451   :  { %v1473_v13 = vpop.f32.mrf.mxu2 }
 0x452   :  { %1820 = vadd.xlane.f32.xlu1 %v1819_v52  ;;  %v1974_v36 = vpop.xlane.xlu1 %1973  ;;  %v1474_v49 = vadd.f32 %v6011_v22, %v1473_v13 }
 0x453   :  { %v2068_v61 = vmul.f32 %v1974_v36, %v5093_v1 }
 0x454   :  { %v1517_v37 = vmax.f32 %v1474_v49, 0.0 }
 0x455   :  { %v2100_v46 = vadd.f32 1e-05, %v2068_v61 }
 0x457   :  { %4540 = vrsqrt.f32 %v2100_v46  ;;  %vm2138_vm2 = vweird.f32 %v2100_v46 }
 0x458   :  { %v6194_v3 = vpop.f32.mrf.mxu3 }
 0x459   :  { %v1475_v9 = vpop.f32.mrf.mxu2 }
 0x45a   :  { %v1476_v24 = vadd.f32 %v6011_v22, %v1475_v9  ;;  %1823 = vadd.xlane.f32.xlu1 %v1822_v45  ;;  %v6199_v55 = vpop.xlane.xlu0 %1982  ;;  %v1803_v43 = vpop.xlane.xlu1 %1802 }
 0x45b   :  { %v1883_v34 = vmul.f32 %v1803_v43, %v5093_v1  ;;  %v1977_v48 = vpop.xlane.xlu2 %1976 }
 0x45c   :  { %v1518_v31 = vmax.f32 %v1476_v24, 0.0  ;;  %v2069_v21 = vmul.f32 %v1977_v48, %v5093_v1 }
 0x45d   :  { %v4541_v25 = vpop.eup %4540  ;;  %v6204_v27 = vsub.f32 %v6066_v23, %v1883_v34 }
 0x45e   :  { %v2133_v14 = vmul.f32 %v4541_v25, %v2100_v46  ;;  %v1546_v19 = vpack.c.bf16 %v1518_v31, %v1517_v37  ;;  %v2101_v29 = vadd.f32 1e-05, %v2069_v21  ;;  %vm2139_vm15 = vweird.f32 %v4541_v25 }
 0x45f   :  { %v1947_v40 = vmul.f32 %v6204_v27, %v6204_v27  ;;  %vm2140_vm3 = vmor %vm2138_vm2, %vm2139_vm15  ;;  %v1726_v31 = vadd.f32 %v1668_v32, %v5737_v44 }
 0x460   :  { %v2134_v59 = vmul.f32 %v4541_v25, %v2133_v14  ;;  %4542 = vrsqrt.f32 %v2101_v29  ;;  %v6208_v47 = vpop.f32.mrf.mxu3  ;;  %4326 = vmatmul.msk.bf16.gmra.mxu3 %vm335_vm1, %v1546_v19  ;;  %vm2148_vm5 = vweird.f32 %v2101_v29 }
 0x461   :  { %v1478_v53 = vpop.f32.mrf.mxu2  ;;  %v1993_v16 = vsel %vm117_vm0, %v1947_v40, 0.0 }
 0x462   :  { %v2135_v13 = vmul.f32 0.5, %v2134_v59  ;;  %v1806_v52 = vpop.xlane.xlu1 %1805  ;;  %1994 = vadd.xlane.f32.xlu2 %v1993_v16  ;;  %v6212_v23 = vpop.xlane.xlu0 %1985  ;;  %v1479_v24 = vadd.f32 %v6011_v22, %v1478_v53  ;;  %v6230_v59 = vld [vmem:[%s8086_s7 + $0x5] ss:$0 sm:$0xff] }
 0x463   :  { %v1884_v36 = vmul.f32 %v1806_v52, %v5093_v1  ;;  %v6237_v52 = vadd.f32 %v5892_v5, %v1726_v31 }
 0x464   :  { %v2136_v61 = vsub.f32 1.5, %v2135_v13  ;;  %v1519_v53 = vmax.f32 %v1479_v24, 0.0 }
 0x465   :  { %v6216_v39 = vsub.f32 %v6100_v4, %v1884_v36 }
 0x466   :  { %v4543_v49 = vpop.eup %4542  ;;  %v2137_v9 = vmul.f32 %v4541_v25, %v2136_v61 }
 0x467   :  { %v2143_v45 = vmul.f32 %v4543_v49, %v2101_v29  ;;  %v1948_v43 = vmul.f32 %v6216_v39, %v6216_v39  ;;  %vm2149_vm4 = vweird.f32 %v4543_v49  ;;  %v1727_v29 = vadd.f32 %v6194_v3, %v5803_v30  ;;  %v2550_v30 = vld [vmem:[%s8080_s1] sm:$0xff] }
 0x468   :  { %v2141_v34 = vsel %vm2140_vm3, %v4541_v25, %v2137_v9  ;;  %v6222_v21 = vpop.f32.mrf.mxu3  ;;  %vm2150_vm6 = vmor %vm2148_vm5, %vm2149_vm4 }
 0x469   :  { %v2144_v48 = vmul.f32 %v4543_v49, %v2143_v45  ;;  %v1480_v37 = vpop.f32.mrf.mxu2  ;;  %v1996_v14 = vsel %vm117_vm0, %v1948_v43, 0.0  ;;  %v2452_v25 = vmul.f32 %v2141_v34, %v6033_v62  ;;  %v6244_v62 = vld [vmem:[%s8086_s7 + $0x6] ss:$0 sm:$0xff]  ;;  %v1825_v34 = vsel %vm117_vm0, %v6237_v52, 0.0 }
 0x46a   :  { %v1481_v4 = vadd.f32 %v6011_v22, %v1480_v37  ;;  %v1815_v19 = vpop.xlane.xlu0 %1814  ;;  %1997 = vadd.xlane.f32.xlu2 %v1996_v14 }
 0x46b   :  { %v2145_v46 = vmul.f32 0.5, %v2144_v48  ;;  %v1887_v40 = vmul.f32 %v1815_v19, %v5093_v1  ;;  %v2485_v9 = vmul.f32 %v6230_v59, %v2452_v25  ;;  %v6268_v19 = vadd.f32 %v5892_v5, %v1727_v29 }
 0x46c   :  { %v1520_v44 = vmax.f32 %v1481_v4, 0.0 }
 0x46d   :  { %v2146_v32 = vsub.f32 1.5, %v2145_v46  ;;  %v6234_v16 = vsub.f32 %v6114_v15, %v1887_v40  ;;  %v2518_v31 = vadd.f32 %v6244_v62, %v2485_v9 }
 0x46e   :  { %v1547_v13 = vpack.c.bf16 %v1520_v44, %v1519_v53 }
 0x46f   :  { %v2147_v36 = vmul.f32 %v4543_v49, %v2146_v32  ;;  %v1951_v61 = vmul.f32 %v6234_v16, %v6234_v16 }
 0x470   :  { %4327 = vmatmul.msk.bf16.gmra.mxu3 %vm335_vm1, %v1547_v13  ;;  %v1678_v4 = vpop.f32.mrf.mxu3 }
 0x471   :  { %v2151_v15 = vsel %vm2150_vm6, %v4543_v49, %v2147_v36  ;;  %v1483_v45 = vpop.f32.mrf.mxu2  ;;  %v2005_v24 = vsel %vm117_vm0, %v1951_v61, 0.0  ;;  %v1730_v53 = vadd.f32 %v1678_v4, %v5857_v51  ;;  %v1828_v36 = vsel %vm117_vm0, %v6268_v19, 0.0 }
 0x472   :  { %v2453_v43 = vmul.f32 %v2151_v15, %v6073_v2  ;;  %2006 = vadd.xlane.f32.xlu1 %v2005_v24  ;;  %v1818_v48 = vpop.xlane.xlu0 %1817  ;;  %1826 = vadd.xlane.f32.xlu2 %v1825_v34  ;;  %v2551_v2 = vld [vmem:[%s8080_s1 + $0x8] sm:$0xff]  ;;  %v1484_v40 = vadd.f32 %v6011_v22, %v1483_v45 }
 0x473   :  { %v1888_v37 = vmul.f32 %v1818_v48, %v5093_v1  ;;  %v6280_v45 = vadd.f32 %v5892_v5, %v1730_v53 }
 0x474   :  { %v2486_v49 = vmul.f32 %v6230_v59, %v2453_v43  ;;  %v1521_v9 = vmax.f32 %v1484_v40, 0.0 }
 0x475   :  { %v6258_v14 = vsub.f32 %v6121_v26, %v1888_v37  ;;  %v2582_v26 = vmul.f32 %v2550_v30, %v2518_v31  ;;  %v1837_v43 = vsel %vm117_vm0, %v6280_v45, 0.0  ;;  %v2071_v37 = vmul.f32 %v6199_v55, %v5093_v1 }
 0x476   :  { %v2519_v3 = vadd.f32 %v6244_v62, %v2486_v49 }
 0x477   :  { %v1952_v46 = vmul.f32 %v6258_v14, %v6258_v14  ;;  %v2103_v31 = vadd.f32 1e-05, %v2071_v37 }
 0x478   :  { %v2583_v25 = vmul.f32 %v2551_v2, %v2519_v3  ;;  %v1681_v24 = vpop.f32.mrf.mxu3 }
 0x479   :  { %v1485_v44 = vpop.f32.mrf.mxu2  ;;  %v2008_v32 = vsel %vm117_vm0, %v1952_v46, 0.0  ;;  %v1731_v29 = vadd.f32 %v1681_v24, %v5900_v63  ;;  %4544 = vrsqrt.f32 %v2103_v31  ;;  %v2072_v63 = vmul.f32 %v6212_v23, %v5093_v1 }
 0x47a   :  { %v1486_v13 = vadd.f32 %v6011_v22, %v1485_v44  ;;  %2009 = vadd.xlane.f32.xlu1 %v2008_v32  ;;  %v2618_v61 = vpack.c.bf16 %v2583_v25, %v2582_v26  ;;  %1829 = vadd.xlane.f32.xlu2 %v1828_v36  ;;  %vm2168_vm8 = vweird.f32 %v2103_v31 }
 0x47b   :  { %v6287_v34 = vadd.f32 %v5892_v5, %v1731_v29  ;;  %v6295_v30 = vadd.f32 1e-05, %v2072_v63 }
 0x47c   :  { %v1522_v15 = vmax.f32 %v1486_v13, 0.0  ;;  %4341 = vmatmul.msk.bf16.vlgmr.msrb.gmra.mxu0 %vm117_vm0, %v2618_v61 }
 0x47d   :  { %v1840_v48 = vsel %vm117_vm0, %v6287_v34, 0.0  ;;  %4546 = vrsqrt.f32 %v6295_v30  ;;  %vm2178_vm15 = vweird.f32 %v6295_v30 }
 0x47e   :  { %v1548_v51 = vpack.c.bf16 %v1522_v15, %v1521_v9 }
 0x47f   :  { %v4545_v49 = vpop.eup %4544 }
 0x480   :  { %4328 = vmatmul.msk.bf16.gmra.mxu3 %vm335_vm1, %v1548_v51  ;;  %v2163_v4 = vmul.f32 %v4545_v49, %v2103_v31  ;;  %vm2169_vm7 = vweird.f32 %v4545_v49 }
 0x481   :  { %vm2170_vm9 = vmor %vm2168_vm8, %vm2169_vm7 }
 0x482   :  { %1838 = vadd.xlane.f32.xlu1 %v1837_v43  ;;  %v2164_v2 = vmul.f32 %v4545_v49, %v2163_v4 }
 0x483   :  { %v6299_v55 = vpop.eup %4546 }
 0x484   :  { %v2165_v46 = vmul.f32 0.5, %v2164_v2  ;;  %v2173_v13 = vmul.f32 %v6299_v55, %v6295_v30  ;;  %vm2179_vm13 = vweird.f32 %v6299_v55  ;;  %v1683_v30 = vpop.f32.mrf.mxu3 }
 0x485   :  { %vm6354_vm2 = vmor %vm2178_vm15, %vm2179_vm13 }
 0x486   :  { %v2166_v26 = vsub.f32 1.5, %v2165_v46  ;;  %v2174_v29 = vmul.f32 %v6299_v55, %v2173_v13 }
 0x488   :  { %v2167_v32 = vmul.f32 %v4545_v49, %v2166_v26 }
 0x48a   :  { %1841 = vadd.xlane.f32.xlu1 %v1840_v48  ;;  %v2171_v51 = vsel %vm2170_vm9, %v4545_v49, %v2167_v32 }
 0x4ad   :  { %v1980_v3 = vpop.xlane.xlu2 %1979 }
 0x4ae   :  { %v2070_v5 = vmul.f32 %v1980_v3, %v5093_v1  ;;  %v2175_v3 = vmul.f32 0.5, %v2174_v29 }
 0x4b0   :  { %v2102_v40 = vadd.f32 1e-05, %v2070_v5  ;;  %v2176_v32 = vsub.f32 1.5, %v2175_v3 }
 0x4b2   :  { %4548 = vrsqrt.f32 %v2102_v40  ;;  %vm2158_vm11 = vweird.f32 %v2102_v40 }
 0x4b5   :  { %v1989_v25 = vpop.xlane.xlu1 %1988  ;;  %v1809_v53 = vpop.xlane.xlu2 %1808 }
 0x4b6   :  { %v2073_v44 = vmul.f32 %v1989_v25, %v5093_v1  ;;  %v1885_v23 = vmul.f32 %v1809_v53, %v5093_v1 }
 0x4b8   :  { %v4549_v36 = vpop.eup %4548  ;;  %v2105_v61 = vadd.f32 1e-05, %v2073_v44  ;;  %v6306_v9 = vsub.f32 %v6139_v35, %v1885_v23  ;;  %v2455_v35 = vmul.f32 %v2171_v51, %v6070_v17  ;;  %v1728_v23 = vadd.f32 %v6208_v47, %v5806_v28 }
 0x4b9   :  { %v2153_v15 = vmul.f32 %v4549_v36, %v2102_v40  ;;  %vm2159_vm10 = vweird.f32 %v4549_v36  ;;  %v2177_v47 = vmul.f32 %v6299_v55, %v2176_v32 }
 0x4ba   :  { %4550 = vrsqrt.f32 %v2105_v61  ;;  %v1949_v24 = vmul.f32 %v6306_v9, %v6306_v9  ;;  %v2488_v53 = vmul.f32 %v6230_v59, %v2455_v35  ;;  %vm2160_vm12 = vmor %vm2158_vm11, %vm2159_vm10  ;;  %vm2188_vm3 = vweird.f32 %v2105_v61 }
 0x4bb   :  { %v2154_v43 = vmul.f32 %v4549_v36, %v2153_v15 }
 0x4bc   :  { %v1999_v48 = vsel %vm117_vm0, %v1949_v24, 0.0  ;;  %v2521_v28 = vadd.f32 %v6244_v62, %v2488_v53 }
 0x4bd   :  { %v2155_v37 = vmul.f32 0.5, %v2154_v43  ;;  %v1992_v63 = vpop.xlane.xlu1 %1991  ;;  %2000 = vadd.xlane.f32.xlu0 %v1999_v48  ;;  %v1812_v4 = vpop.xlane.xlu2 %1811 }
 0x4be   :  { %v2074_v31 = vmul.f32 %v1992_v63, %v5093_v1  ;;  %v1886_v2 = vmul.f32 %v1812_v4, %v5093_v1  ;;  %v2553_v63 = vld [vmem:[%s8080_s1 + $0x18] sm:$0xff] }
 0x4bf   :  { %v2156_v5 = vsub.f32 1.5, %v2155_v37  ;;  %v2552_v37 = vld [vmem:[%s8080_s1 + $0x10] sm:$0xff] }
 0x4c0   :  { %v4551_v46 = vpop.eup %4550  ;;  %v6316_v49 = vsub.f32 %v6166_v18, %v1886_v2  ;;  %v6319_v44 = vadd.f32 1e-05, %v2074_v31  ;;  %v2555_v31 = vld [vmem:[%s8080_s1 + $0x28] sm:$0xff] }
 0x4c1   :  { %v2157_v26 = vmul.f32 %v4549_v36, %v2156_v5  ;;  %v2183_v25 = vmul.f32 %v4551_v46, %v2105_v61  ;;  %vm2189_vm14 = vweird.f32 %v4551_v46  ;;  %v1729_v61 = vadd.f32 %v6222_v21, %v5854_v12 }
 0x4c2   :  { %v1950_v17 = vmul.f32 %v6316_v49, %v6316_v49  ;;  %4552 = vrsqrt.f32 %v6319_v44  ;;  %vm2190_vm4 = vmor %vm2188_vm3, %vm2189_vm14 }
 0x4c3   :  { %v2161_v13 = vsel %vm2160_vm12, %v4549_v36, %v2157_v26  ;;  %v2184_v15 = vmul.f32 %v4551_v46, %v2183_v25  ;;  %v2585_v26 = vmul.f32 %v2553_v63, %v2521_v28  ;;  %v1732_v28 = vadd.f32 %v1683_v30, %v5903_v10 }
 0x4c4   :  { %v2454_v18 = vmul.f32 %v2161_v13, %v6130_v57  ;;  %v2002_v24 = vsel %vm117_vm0, %v1950_v17, 0.0  ;;  %v6336_v57 = vld [vmem:[%s8086_s7 + $0x4] ss:$0 sm:$0xff] }
 0x4c5   :  { %v2185_v40 = vmul.f32 0.5, %v2184_v15  ;;  %v1821_v51 = vpop.xlane.xlu1 %1820  ;;  %2003 = vadd.xlane.f32.xlu0 %v2002_v24  ;;  %v6339_v48 = vadd.f32 %v6336_v57, %v1728_v23  ;;  %v6381_v21 = vadd.f32 %v6336_v57, %v1729_v61 }
 0x4c6   :  { %v2487_v29 = vmul.f32 %v6230_v59, %v2454_v18  ;;  %v1889_v43 = vmul.f32 %v1821_v51, %v5093_v1 }
 0x4c7   :  { %v2186_v36 = vsub.f32 1.5, %v2185_v40  ;;  %v1831_v53 = vsel %vm117_vm0, %v6339_v48, 0.0 }
 0x4c8   :  { %v6349_v4 = vsub.f32 %v6180_v8, %v1889_v43  ;;  %v2520_v35 = vadd.f32 %v6244_v62, %v2487_v29  ;;  %v2181_v8 = vsel %vm6354_vm2, %v6299_v55, %v2177_v47  ;;  %v6365_v17 = vpop.eup %4552 }
 0x4c9   :  { %v2187_v2 = vmul.f32 %v4551_v46, %v2186_v36  ;;  %v2456_v55 = vmul.f32 %v2181_v8, %v6091_v33  ;;  %v2193_v24 = vmul.f32 %v6365_v17, %v6319_v44  ;;  %v2554_v8 = vld [vmem:[%s8080_s1 + $0x20] sm:$0xff]  ;;  %vm2199_vm5 = vweird.f32 %v6365_v17 }
 0x4ca   :  { %v1953_v3 = vmul.f32 %v6349_v4, %v6349_v4  ;;  %v2584_v5 = vmul.f32 %v2552_v37, %v2520_v35 }
 0x4cb   :  { %v2191_v25 = vsel %vm2190_vm4, %v4551_v46, %v2187_v2  ;;  %v2489_v40 = vmul.f32 %v6230_v59, %v2456_v55  ;;  %v2194_v51 = vmul.f32 %v6365_v17, %v2193_v24 }
 0x4cc   :  { %v2457_v23 = vmul.f32 %v2191_v25, %v6143_v6  ;;  %v1488_v32 = vpop.f32.mrf.mxu2  ;;  %v2011_v13 = vsel %vm117_vm0, %v1953_v3, 0.0  ;;  %v2619_v15 = vpack.c.bf16 %v2585_v26, %v2584_v5 }
 0x4cd   :  { %v1824_v18 = vpop.xlane.xlu1 %1823  ;;  %2012 = vadd.xlane.f32.xlu2 %v2011_v13  ;;  %1832 = vadd.xlane.f32.xlu0 %v1831_v53  ;;  %v1489_v29 = vadd.f32 %v6011_v22, %v1488_v32  ;;  %v2522_v10 = vadd.f32 %v6244_v62, %v2489_v40  ;;  %v2195_v3 = vmul.f32 0.5, %v2194_v51 }
 0x4ce   :  { %v1890_v46 = vmul.f32 %v1824_v18, %v5093_v1  ;;  %4342 = vmatmul.msk.bf16.gmra.mxu0 %vm117_vm0, %v2619_v15  ;;  %v2490_v12 = vmul.f32 %v6230_v59, %v2457_v23 }
 0x4cf   :  { %v1523_v5 = vmax.f32 %v1489_v29, 0.0  ;;  %v2586_v61 = vmul.f32 %v2554_v8, %v2522_v10  ;;  %v2196_v23 = vsub.f32 1.5, %v2195_v3 }
 0x4d0   :  { %v6378_v6 = vsub.f32 %v6188_v50, %v1890_v46  ;;  %v1834_v50 = vsel %vm117_vm0, %v6381_v21, 0.0  ;;  %v2523_v37 = vadd.f32 %v6244_v62, %v2490_v12 }
 0x4d1   :  { %v2197_v46 = vmul.f32 %v6365_v17, %v2196_v23 }
 0x4d2   :  { %v1954_v33 = vmul.f32 %v6378_v6, %v6378_v6  ;;  %v2587_v25 = vmul.f32 %v2555_v31, %v2523_v37 }
 0x4d3   :  { %v1686_v43 = vpop.f32.mrf.mxu3 }
 0x4d4   :  { %v1490_v47 = vpop.f32.mrf.mxu2  ;;  %v2014_v36 = vsel %vm117_vm0, %v1954_v33, 0.0  ;;  %v1733_v13 = vadd.f32 %v1686_v43, %v5960_v0  ;;  %v2620_v18 = vpack.c.bf16 %v2587_v25, %v2586_v61 }
 0x4d5   :  { %v1491_v63 = vadd.f32 %v6011_v22, %v1490_v47  ;;  %2015 = vadd.xlane.f32.xlu2 %v2014_v36  ;;  %1835 = vadd.xlane.f32.xlu0 %v1834_v50  ;;  %v1995_v35 = vpop.xlane.xlu2 %1994  ;;  %v6403_v22 = vadd.f32 %v6336_v57, %v1732_v28 }
 0x4d6   :  { %v2075_v2 = vmul.f32 %v1995_v35, %v5093_v1  ;;  %v6415_v12 = vadd.f32 %v6336_v57, %v1733_v13 }
 0x4d7   :  { %v1524_v26 = vmax.f32 %v1491_v63, 0.0  ;;  %v1843_v15 = vsel %vm117_vm0, %v6403_v22, 0.0 }
 0x4d8   :  { %v2107_v30 = vadd.f32 1e-05, %v2075_v2  ;;  %v1846_v29 = vsel %vm117_vm0, %v6415_v12, 0.0 }
 0x4d9   :  { %v1549_v53 = vpack.c.bf16 %v1524_v26, %v1523_v5 }
 0x4da   :  { %4554 = vrsqrt.f32 %v2107_v30  ;;  %vm2208_vm8 = vweird.f32 %v2107_v30 }
 0x4db   :  { %v1688_v32 = vpop.f32.mrf.mxu3  ;;  %4329 = vmatmul.msk.bf16.gmra.mxu3 %vm335_vm1, %v1549_v53  ;;  %vm2198_vm1 = vweird.f32 %v6319_v44 }
 0x4dc   :  { %vm2200_vm6 = vmor %vm2198_vm1, %vm2199_vm5 }
 0x4dd   :  { %1844 = vadd.xlane.f32.xlu2 %v1843_v15  ;;  %v6409_v55 = vpop.xlane.xlu2 %1997  ;;  %v2201_v40 = vsel %vm2200_vm6, %v6365_v17, %v2197_v46 }
 0x4de   :  { %4343 = vmatmul.msk.bf16.gmra.mxu0 %vm117_vm0, %v2620_v18  ;;  %v2458_v47 = vmul.f32 %v2201_v40, %v6157_v7  ;;  %v1734_v18 = vadd.f32 %v1688_v32, %v5963_v41 }
 0x4e0   :  { %v4555_v24 = vpop.eup %4554  ;;  %v2491_v63 = vmul.f32 %v6230_v59, %v2458_v47 }
 0x4e1   :  { %v2203_v0 = vmul.f32 %v4555_v24, %v2107_v30  ;;  %vm2209_vm7 = vweird.f32 %v4555_v24  ;;  %v2556_v30 = vld [vmem:[%s8080_s1 + $0x30] sm:$0xff] }
 0x4e2   :  { %vm2210_vm9 = vmor %vm2208_vm8, %vm2209_vm7  ;;  %v2524_v26 = vadd.f32 %v6244_v62, %v2491_v63 }
 0x4e3   :  { %v2204_v33 = vmul.f32 %v4555_v24, %v2203_v0  ;;  %v1691_v51 = vpop.f32.mrf.mxu3 }
 0x4e4   :  { %v2588_v61 = vmul.f32 %v2556_v30, %v2524_v26  ;;  %v1735_v32 = vadd.f32 %v1691_v51, %v5996_v56 }
 0x4e5   :  { %v2205_v43 = vmul.f32 0.5, %v2204_v33  ;;  %1847 = vadd.xlane.f32.xlu2 %v1846_v29  ;;  %v6421_v28 = vpop.xlane.xlu1 %2006  ;;  %v1827_v36 = vpop.xlane.xlu2 %1826  ;;  %v6462_v33 = vadd.f32 %v6336_v57, %v1734_v18 }
 0x4e6   :  { %v1891_v44 = vmul.f32 %v1827_v36, %v5093_v1 }
 0x4e7   :  { %v2206_v50 = vsub.f32 1.5, %v2205_v43  ;;  %v1849_v47 = vsel %vm117_vm0, %v6462_v33, 0.0 }
 0x4e8   :  { %v6426_v17 = vsub.f32 %v6237_v52, %v1891_v44  ;;  %v6475_v44 = vadd.f32 %v6336_v57, %v1735_v32 }
 0x4e9   :  { %v2207_v37 = vmul.f32 %v4555_v24, %v2206_v50 }
 0x4ea   :  { %v1955_v2 = vmul.f32 %v6426_v17, %v6426_v17  ;;  %v1852_v63 = vsel %vm117_vm0, %v6475_v44, 0.0 }
 0x4eb   :  { %v2211_v35 = vsel %vm2210_vm9, %v4555_v24, %v2207_v37  ;;  %v6429_v31 = vpop.f32.mrf.mxu3 }
 0x4ec   :  { %v2459_v7 = vmul.f32 %v2211_v35, %v6204_v27  ;;  %v2017_v3 = vsel %vm117_vm0, %v1955_v2, 0.0  ;;  %v2557_v27 = vld [vmem:[%s8080_s1 + $0x38] sm:$0xff] }
 0x4ed   :  { %v6434_v10 = vpop.xlane.xlu1 %2009  ;;  %2018 = vadd.xlane.f32.xlu0 %v2017_v3  ;;  %v1830_v52 = vpop.xlane.xlu2 %1829 }
 0x4ee   :  { %v2492_v5 = vmul.f32 %v6230_v59, %v2459_v7  ;;  %v1892_v8 = vmul.f32 %v1830_v52, %v5093_v1 }
 0x4f0   :  { %v2525_v25 = vadd.f32 %v6244_v62, %v2492_v5  ;;  %v6448_v53 = vsub.f32 %v6268_v19, %v1892_v8  ;;  %v2076_v5 = vmul.f32 %v6409_v55, %v5093_v1 }
 0x4f2   :  { %v2589_v23 = vmul.f32 %v2557_v27, %v2525_v25  ;;  %v1956_v13 = vmul.f32 %v6448_v53, %v6448_v53  ;;  %v2108_v52 = vadd.f32 1e-05, %v2076_v5 }
 0x4f3   :  { %v6453_v46 = vpop.f32.mrf.mxu3 }
 0x4f4   :  { %v2621_v15 = vpack.c.bf16 %v2589_v23, %v2588_v61  ;;  %v2020_v0 = vsel %vm117_vm0, %v1956_v13, 0.0  ;;  %4556 = vrsqrt.f32 %v2108_v52  ;;  %vm2218_vm11 = vweird.f32 %v2108_v52 }
 0x4f5   :  { %v1839_v24 = vpop.xlane.xlu1 %1838  ;;  %2021 = vadd.xlane.f32.xlu0 %v2020_v0 }
 0x4f6   :  { %v1895_v40 = vmul.f32 %v1839_v24, %v5093_v1  ;;  %4344 = vmatmul.msk.bf16.gmra.mxu0 %vm117_vm0, %v2621_v15  ;;  %v2080_v24 = vmul.f32 %v6434_v10, %v5093_v1 }
 0x4f8   :  { %v6459_v19 = vsub.f32 %v6280_v45, %v1895_v40 }
 0x4fa   :  { %v1959_v29 = vmul.f32 %v6459_v19, %v6459_v19  ;;  %v4557_v26 = vpop.eup %4556 }
 0x4fb   :  { %v1698_v45 = vpop.f32.mrf.mxu3  ;;  %v2213_v8 = vmul.f32 %v4557_v26, %v2108_v52  ;;  %vm2219_vm10 = vweird.f32 %v4557_v26 }
 0x4fc   :  { %v2029_v41 = vsel %vm117_vm0, %v1959_v29, 0.0  ;;  %v1738_v56 = vadd.f32 %v1698_v45, %v6039_v38  ;;  %vm2220_vm12 = vmor %vm2218_vm11, %vm2219_vm10 }
 0x4fd   :  { %2030 = vadd.xlane.f32.xlu2 %v2029_v41  ;;  %v1842_v43 = vpop.xlane.xlu1 %1841  ;;  %1850 = vadd.xlane.f32.xlu0 %v1849_v47  ;;  %v2214_v27 = vmul.f32 %v4557_v26, %v2213_v8 }
 0x4fe   :  { %v1896_v36 = vmul.f32 %v1842_v43, %v5093_v1  ;;  %v6484_v35 = vadd.f32 %v6336_v57, %v1738_v56  ;;  %v6509_v43 = vadd.f32 1e-05, %v2080_v24 }
 0x4ff   :  { %v2215_v23 = vmul.f32 0.5, %v2214_v27 }
 0x500   :  { %v6472_v50 = vsub.f32 %v6287_v34, %v1896_v36  ;;  %v1861_v7 = vsel %vm117_vm0, %v6484_v35, 0.0  ;;  %vm2258_vm11 = vweird.f32 %v6509_v43 }
 0x501   :  { %v2216_v15 = vsub.f32 1.5, %v2215_v23 }
 0x502   :  { %v1960_v37 = vmul.f32 %v6472_v50, %v6472_v50 }
 0x503   :  { %v1701_v34 = vpop.f32.mrf.mxu3  ;;  %v2217_v0 = vmul.f32 %v4557_v26, %v2216_v15 }
 0x504   :  { %v2032_v51 = vsel %vm117_vm0, %v1960_v37, 0.0  ;;  %v1739_v2 = vadd.f32 %v1701_v34, %v6094_v60  ;;  %v2079_v60 = vmul.f32 %v6421_v28, %v5093_v1 }
 0x505   :  { %2033 = vadd.xlane.f32.xlu2 %v2032_v51  ;;  %1853 = vadd.xlane.f32.xlu0 %v1852_v63  ;;  %v2221_v47 = vsel %vm2220_vm12, %v4557_v26, %v2217_v0 }
 0x506   :  { %v6490_v3 = vadd.f32 %v6336_v57, %v1739_v2  ;;  %v6498_v30 = vadd.f32 1e-05, %v2079_v60  ;;  %v2460_v51 = vmul.f32 %v2221_v47, %v6216_v39  ;;  %v2558_v47 = vld [vmem:[%s8080_s1 + $0x40] sm:$0xff] }
 0x508   :  { %v1864_v38 = vsel %vm117_vm0, %v6490_v3, 0.0  ;;  %4558 = vrsqrt.f32 %v6498_v30  ;;  %v2493_v39 = vmul.f32 %v6230_v59, %v2460_v51  ;;  %vm2248_vm4 = vweird.f32 %v6498_v30  ;;  %v2561_v51 = vld [vmem:[%s8080_s1 + $0x58] sm:$0xff] }
 0x50d   :  { %1862 = vadd.xlane.f32.xlu2 %v1861_v7 }
 0x50e   :  { %v6502_v55 = vpop.eup %4558 }
 0x50f   :  { %v2243_v40 = vmul.f32 %v6502_v55, %v6498_v30  ;;  %vm2249_vm2 = vweird.f32 %v6502_v55  ;;  %v1736_v30 = vadd.f32 %v6429_v31, %v5999_v54 }
 0x510   :  { %vm6552_vm5 = vmor %vm2248_vm4, %vm2249_vm2 }
 0x511   :  { %v2244_v36 = vmul.f32 %v6502_v55, %v2243_v40  ;;  %v2526_v40 = vadd.f32 %v6244_v62, %v2493_v39 }
 0x513   :  { %v2245_v2 = vmul.f32 0.5, %v2244_v36  ;;  %v2559_v36 = vld [vmem:[%s8080_s1 + $0x48] sm:$0xff] }
 0x515   :  { %1865 = vadd.xlane.f32.xlu2 %v1864_v38  ;;  %v2246_v27 = vsub.f32 1.5, %v2245_v2  ;;  %v2590_v2 = vmul.f32 %v2558_v47, %v2526_v40  ;;  %v2560_v47 = vld [vmem:[%s8080_s1 + $0x50] sm:$0xff] }
 0x530   :  { %v2001_v25 = vpop.xlane.xlu0 %2000 }
 0x531   :  { %v2077_v61 = vmul.f32 %v2001_v25, %v5093_v1 }
 0x533   :  { %v2109_v13 = vadd.f32 1e-05, %v2077_v61 }
 0x535   :  { %4560 = vrsqrt.f32 %v2109_v13  ;;  %vm2228_vm14 = vweird.f32 %v2109_v13 }
 0x538   :  { %v2004_v18 = vpop.xlane.xlu0 %2003 }
 0x539   :  { %v2078_v28 = vmul.f32 %v2004_v18, %v5093_v1 }
 0x53b   :  { %v4561_v29 = vpop.eup %4560  ;;  %v2110_v41 = vadd.f32 1e-05, %v2078_v28 }
 0x53c   :  { %v2223_v32 = vmul.f32 %v4561_v29, %v2109_v13  ;;  %vm2229_vm13 = vweird.f32 %v4561_v29 }
 0x53d   :  { %4562 = vrsqrt.f32 %v2110_v41  ;;  %vm2230_vm15 = vmor %vm2228_vm14, %vm2229_vm13  ;;  %vm2238_vm1 = vweird.f32 %v2110_v41 }
 0x53e   :  { %v2224_v45 = vmul.f32 %v4561_v29, %v2223_v32  ;;  %4564 = vrsqrt.f32 %v6509_v43 }
 0x540   :  { %v2225_v10 = vmul.f32 0.5, %v2224_v45  ;;  %v1833_v37 = vpop.xlane.xlu0 %1832  ;;  %v2013_v56 = vpop.xlane.xlu2 %2012 }
 0x541   :  { %v1893_v63 = vmul.f32 %v1833_v37, %v5093_v1  ;;  %v2081_v34 = vmul.f32 %v2013_v56, %v5093_v1 }
 0x542   :  { %v2226_v7 = vsub.f32 1.5, %v2225_v10 }
 0x543   :  { %v4563_v38 = vpop.eup %4562  ;;  %v6517_v5 = vsub.f32 %v6339_v48, %v1893_v63  ;;  %v6519_v52 = vadd.f32 1e-05, %v2081_v34 }
 0x544   :  { %v2227_v26 = vmul.f32 %v4561_v29, %v2226_v7  ;;  %v2233_v60 = vmul.f32 %v4563_v38, %v2110_v41  ;;  %v6525_v23 = vpop.eup %4564  ;;  %vm2239_vm3 = vweird.f32 %v4563_v38 }
 0x545   :  { %4566 = vrsqrt.f32 %v6519_v52  ;;  %v1957_v8 = vmul.f32 %v6517_v5, %v6517_v5  ;;  %v2253_v32 = vmul.f32 %v6525_v23, %v6509_v43  ;;  %vm2240_vm6 = vmor %vm2238_vm1, %vm2239_vm3  ;;  %vm2259_vm8 = vweird.f32 %v6525_v23 }
 0x546   :  { %v2231_v25 = vsel %vm2230_vm15, %v4561_v29, %v2227_v26  ;;  %v2234_v61 = vmul.f32 %v4563_v38, %v2233_v60  ;;  %v2247_v29 = vmul.f32 %v6502_v55, %v2246_v27  ;;  %vm2268_vm9 = vweird.f32 %v6519_v52  ;;  %vm2260_vm12 = vmor %vm2258_vm11, %vm2259_vm8 }
 0x547   :  { %v2461_v48 = vmul.f32 %v2231_v25, %v6306_v9  ;;  %v2023_v15 = vsel %vm117_vm0, %v1957_v8, 0.0  ;;  %v2254_v60 = vmul.f32 %v6525_v23, %v2253_v32 }
 0x548   :  { %v2235_v18 = vmul.f32 0.5, %v2234_v61  ;;  %2024 = vadd.xlane.f32.xlu1 %v2023_v15  ;;  %v1836_v13 = vpop.xlane.xlu0 %1835  ;;  %v2016_v24 = vpop.xlane.xlu2 %2015  ;;  %v2251_v26 = vsel %vm6552_vm5, %v6502_v55, %v2247_v29 }
 0x549   :  { %v2494_v28 = vmul.f32 %v6230_v59, %v2461_v48  ;;  %v1894_v0 = vmul.f32 %v1836_v13, %v5093_v1  ;;  %v2082_v37 = vmul.f32 %v2016_v24, %v5093_v1  ;;  %v2463_v48 = vmul.f32 %v2251_v26, %v6234_v16 }
 0x54a   :  { %v2236_v9 = vsub.f32 1.5, %v2235_v18  ;;  %v2255_v55 = vmul.f32 0.5, %v2254_v60  ;;  %v6580_v18 = vadd.f32 %v6336_v57, %v1736_v30  ;;  %v1703_v30 = vpop.f32.mrf.mxu3 }
 0x54b   :  { %v6542_v45 = vpop.eup %4566  ;;  %v6546_v10 = vsub.f32 %v6381_v21, %v1894_v0  ;;  %v2527_v56 = vadd.f32 %v6244_v62, %v2494_v28  ;;  %v6568_v27 = vadd.f32 1e-05, %v2082_v37  ;;  %v2496_v24 = vmul.f32 %v6230_v59, %v2463_v48 }
 0x54c   :  { %v2237_v63 = vmul.f32 %v4563_v38, %v2236_v9  ;;  %v2263_v34 = vmul.f32 %v6542_v45, %v6519_v52  ;;  %v2256_v28 = vsub.f32 1.5, %v2255_v55  ;;  %v1737_v0 = vadd.f32 %v6453_v46, %v6036_v11 }
 0x54d   :  { %v1958_v21 = vmul.f32 %v6546_v10, %v6546_v10  ;;  %v2591_v7 = vmul.f32 %v2559_v36, %v2527_v56  ;;  %4568 = vrsqrt.f32 %v6568_v27  ;;  %v1855_v40 = vsel %vm117_vm0, %v6580_v18, 0.0 }
 0x54e   :  { %v2241_v39 = vsel %vm2240_vm6, %v4563_v38, %v2237_v63  ;;  %v2264_v41 = vmul.f32 %v6542_v45, %v2263_v34  ;;  %vm2269_vm7 = vweird.f32 %v6542_v45  ;;  %v2529_v46 = vadd.f32 %v6244_v62, %v2496_v24 }
 0x54f   :  { %v2462_v8 = vmul.f32 %v2241_v39, %v6316_v49  ;;  %v2026_v54 = vsel %vm117_vm0, %v1958_v21, 0.0  ;;  %v2622_v31 = vpack.c.bf16 %v2591_v7, %v2590_v2  ;;  %v2257_v37 = vmul.f32 %v6525_v23, %v2256_v28  ;;  %vm2270_vm10 = vmor %vm2268_vm9, %vm2269_vm7  ;;  %v2562_v28 = vld [vmem:[%s8080_s1 + $0x60] sm:$0xff] }
 0x550   :  { %v2265_v25 = vmul.f32 0.5, %v2264_v41  ;;  %2027 = vadd.xlane.f32.xlu1 %v2026_v54  ;;  %v1845_v61 = vpop.xlane.xlu2 %1844  ;;  %v6604_v56 = vadd.f32 %v6336_v57, %v1737_v0  ;;  %v2593_v7 = vmul.f32 %v2561_v51, %v2529_v46  ;;  %v1740_v60 = vadd.f32 %v1703_v30, %v6097_v20  ;;  %v2705_v30 = vpop.f32.mrf.mxu0 }
 0x551   :  { %v1897_v15 = vmul.f32 %v1845_v61, %v5093_v1  ;;  %4345 = vmatmul.msk.bf16.gmra.mxu0 %vm117_vm0, %v2622_v31  ;;  %v2495_v38 = vmul.f32 %v6230_v59, %v2462_v8  ;;  %v2261_v26 = vsel %vm2260_vm12, %v6525_v23, %v2257_v37  ;;  %vm2278_vm14 = vweird.f32 %v6568_v27 }
 0x552   :  { %v2266_v13 = vsub.f32 1.5, %v2265_v25  ;;  %v2464_v8 = vmul.f32 %v2261_v26, %v6258_v14  ;;  %v6630_v20 = vadd.f32 %v6336_v57, %v1740_v60 }
 0x553   :  { %v6577_v49 = vsub.f32 %v6403_v22, %v1897_v15  ;;  %v2528_v22 = vadd.f32 %v6244_v62, %v2495_v38  ;;  %v6596_v36 = vpop.eup %4568 }
 0x554   :  { %v2267_v32 = vmul.f32 %v6542_v45, %v2266_v13  ;;  %v2273_v52 = vmul.f32 %v6596_v36, %v6568_v27  ;;  %v2497_v48 = vmul.f32 %v6230_v59, %v2464_v8  ;;  %v1867_v14 = vsel %vm117_vm0, %v6630_v20, 0.0  ;;  %v2563_v13 = vld [vmem:[%s8080_s1 + $0x68] sm:$0xff] }
 0x555   :  { %v1961_v16 = vmul.f32 %v6577_v49, %v6577_v49  ;;  %v2592_v34 = vmul.f32 %v2560_v47, %v2528_v22  ;;  %vm2279_vm13 = vweird.f32 %v6596_v36 }
 0x556   :  { %v2271_v21 = vsel %vm2270_vm10, %v6542_v45, %v2267_v32  ;;  %v2274_v41 = vmul.f32 %v6596_v36, %v2273_v52  ;;  %vm2280_vm15 = vmor %vm2278_vm14, %vm2279_vm13 }
 0x557   :  { %v2035_v29 = vsel %vm117_vm0, %v1961_v16, 0.0  ;;  %v2465_v43 = vmul.f32 %v2271_v21, %v6349_v4  ;;  %v2623_v45 = vpack.c.bf16 %v2593_v7, %v2592_v34  ;;  %v2530_v16 = vadd.f32 %v6244_v62, %v2497_v48 }
 0x558   :  { %1856 = vadd.xlane.f32.xlu1 %v1855_v40  ;;  %2036 = vadd.xlane.f32.xlu0 %v2035_v29  ;;  %v1848_v9 = vpop.xlane.xlu2 %1847  ;;  %v2275_v4 = vmul.f32 0.5, %v2274_v41  ;;  %v6673_v8 = vpop.f32.mrf.mxu0 }
 0x559   :  { %v1898_v11 = vmul.f32 %v1848_v9, %v5093_v1  ;;  %v2498_v31 = vmul.f32 %v6230_v59, %v2465_v43  ;;  %v2594_v32 = vmul.f32 %v2562_v28, %v2530_v16  ;;  %v6705_v28 = vld [vmem:[%s8088_s9] ss:$0 sm:$0xff] }
 0x55a   :  { %v2276_v38 = vsub.f32 1.5, %v2275_v4 }
 0x55b   :  { %v6610_v63 = vsub.f32 %v6415_v12, %v1898_v11  ;;  %v1858_v12 = vsel %vm117_vm0, %v6604_v56, 0.0  ;;  %v2531_v55 = vadd.f32 %v6244_v62, %v2498_v31 }
 0x55c   :  { %v2277_v29 = vmul.f32 %v6596_v36, %v2276_v38 }
 0x55d   :  { %v1962_v2 = vmul.f32 %v6610_v63, %v6610_v63  ;;  %v2595_v0 = vmul.f32 %v2563_v13, %v2531_v55 }
 0x55e   :  { %v1706_v25 = vpop.f32.mrf.mxu3  ;;  %v2281_v46 = vsel %vm2280_vm15, %v6596_v36, %v2277_v29  ;;  %v6714_v29 = vadd.f32 %v6705_v28, %v2705_v30 }
 0x55f   :  { %v2038_v39 = vsel %vm117_vm0, %v1962_v2, 0.0  ;;  %v1741_v15 = vadd.f32 %v1706_v25, %v6160_v42  ;;  %v2624_v11 = vpack.c.bf16 %v2595_v0, %v2594_v32  ;;  %v2466_v27 = vmul.f32 %v2281_v46, %v6378_v6 }
 0x560   :  { %1859 = vadd.xlane.f32.xlu1 %v1858_v12  ;;  %2039 = vadd.xlane.f32.xlu0 %v2038_v39  ;;  %v2019_v54 = vpop.xlane.xlu0 %2018 }
 0x561   :  { %4346 = vmatmul.msk.bf16.gmra.mxu0 %vm117_vm0, %v2623_v45  ;;  %v2083_v23 = vmul.f32 %v2019_v54, %v5093_v1  ;;  %v6647_v42 = vadd.f32 %v6336_v57, %v1741_v15  ;;  %v2499_v26 = vmul.f32 %v6230_v59, %v2466_v27 }
 0x563   :  { %v2115_v61 = vadd.f32 1e-05, %v2083_v23  ;;  %v1870_v47 = vsel %vm117_vm0, %v6647_v42, 0.0  ;;  %v2532_v41 = vadd.f32 %v6244_v62, %v2499_v26  ;;  %v2565_v23 = vld [vmem:[%s8080_s1 + $0x78] sm:$0xff] }
 0x565   :  { %4570 = vrsqrt.f32 %v2115_v61  ;;  %vm2288_vm3 = vweird.f32 %v2115_v61 }
 0x566   :  { %v1708_v31 = vpop.f32.mrf.mxu3 }
 0x567   :  { %v1742_v48 = vadd.f32 %v1708_v31, %v6163_v58 }
 0x568   :  { %1868 = vadd.xlane.f32.xlu0 %v1867_v14  ;;  %v6640_v24 = vpop.xlane.xlu0 %2021 }
 0x569   :  { %v6697_v13 = vadd.f32 %v6336_v57, %v1742_v48  ;;  %v2084_v30 = vmul.f32 %v6640_v24, %v5093_v1 }
 0x56b   :  { %v4571_v40 = vpop.eup %4570 }
 0x56c   :  { %v2283_v22 = vmul.f32 %v4571_v40, %v2115_v61  ;;  %vm2289_vm2 = vweird.f32 %v4571_v40 }
 0x56d   :  { %vm2290_vm4 = vmor %vm2288_vm3, %vm2289_vm2 }
 0x56e   :  { %v2284_v9 = vmul.f32 %v4571_v40, %v2283_v22 }
 0x570   :  { %1871 = vadd.xlane.f32.xlu0 %v1870_v47  ;;  %v6655_v37 = vpop.xlane.xlu2 %2030  ;;  %v2285_v51 = vmul.f32 0.5, %v2284_v9  ;;  %v1851_v34 = vpop.xlane.xlu0 %1850  ;;  %v2787_v47 = vsel %vm117_vm0, %v6714_v29, 0.0 }
 0x571   :  { %4347 = vmatmul.msk.bf16.gmra.mxu0 %vm117_vm0, %v2624_v11  ;;  %v1899_v21 = vmul.f32 %v1851_v34, %v5093_v1 }
 0x572   :  { %v2286_v52 = vsub.f32 1.5, %v2285_v51 }
 0x573   :  { %v6661_v2 = vsub.f32 %v6462_v33, %v1899_v21  ;;  %v2116_v21 = vadd.f32 1e-05, %v2084_v30 }
 0x574   :  { %v2287_v7 = vmul.f32 %v4571_v40, %v2286_v52  ;;  %v2087_v52 = vmul.f32 %v6655_v37, %v5093_v1 }
 0x575   :  { %v1963_v36 = vmul.f32 %v6661_v2, %v6661_v2  ;;  %4572 = vrsqrt.f32 %v2116_v21  ;;  %vm2298_vm1 = vweird.f32 %v2116_v21 }
 0x576   :  { %v2291_v12 = vsel %vm2290_vm4, %v4571_v40, %v2287_v7 }
 0x577   :  { %v2467_v60 = vmul.f32 %v2291_v12, %v6426_v17  ;;  %v2041_v43 = vsel %vm117_vm0, %v1963_v36, 0.0  ;;  %v2564_v17 = vld [vmem:[%s8080_s1 + $0x70] sm:$0xff]  ;;  %v6735_v36 = vadd.f32 1e-05, %v2087_v52 }
 0x578   :  { %v6668_v39 = vpop.xlane.xlu2 %2033  ;;  %2042 = vadd.xlane.f32.xlu1 %v2041_v43  ;;  %v1854_v6 = vpop.xlane.xlu0 %1853  ;;  %v2596_v25 = vmul.f32 %v2564_v17, %v2532_v41 }
 0x579   :  { %v2500_v33 = vmul.f32 %v6230_v59, %v2467_v60  ;;  %v1900_v45 = vmul.f32 %v1854_v6, %v5093_v1  ;;  %4574 = vrsqrt.f32 %v6735_v36  ;;  %vm2328_vm12 = vweird.f32 %v6735_v36 }
 0x57b   :  { %v6676_v54 = vsub.f32 %v6475_v44, %v1900_v45  ;;  %v2533_v59 = vadd.f32 %v6244_v62, %v2500_v33  ;;  %v6694_v62 = vpop.f32.mrf.mxu0  ;;  %v4573_v27 = vpop.eup %4572  ;;  %v2088_v45 = vmul.f32 %v6668_v39, %v5093_v1 }
 0x57c   :  { %v2293_v7 = vmul.f32 %v4573_v27, %v2116_v21  ;;  %vm2299_vm5 = vweird.f32 %v4573_v27 }
 0x57d   :  { %v1964_v4 = vmul.f32 %v6676_v54, %v6676_v54  ;;  %v2597_v61 = vmul.f32 %v2565_v23, %v2533_v59  ;;  %vm2300_vm6 = vmor %vm2298_vm1, %vm2299_vm5 }
 0x57e   :  { %v2294_v26 = vmul.f32 %v4573_v27, %v2293_v7 }
 0x57f   :  { %v2044_v44 = vsel %vm117_vm0, %v1964_v4, 0.0  ;;  %v2625_v55 = vpack.c.bf16 %v2597_v61, %v2596_v25  ;;  %v6739_v33 = vpop.eup %4574  ;;  %v6746_v4 = vadd.f32 1e-05, %v2088_v45 }
 0x580   :  { %v1863_v15 = vpop.xlane.xlu2 %1862  ;;  %2045 = vadd.xlane.f32.xlu1 %v2044_v44  ;;  %v2295_v43 = vmul.f32 0.5, %v2294_v26  ;;  %v2323_v37 = vmul.f32 %v6739_v33, %v6735_v36  ;;  %vm2329_vm10 = vweird.f32 %v6739_v33 }
 0x581   :  { %v1903_v14 = vmul.f32 %v1863_v15, %v5093_v1  ;;  %4348 = vmatmul.msk.bf16.gmra.mxu0 %vm117_vm0, %v2625_v55  ;;  %vm6799_vm13 = vmor %vm2328_vm12, %vm2329_vm10  ;;  %vm2338_vm1 = vweird.f32 %v6746_v4 }
 0x582   :  { %v2296_v24 = vsub.f32 1.5, %v2295_v43  ;;  %v2324_v61 = vmul.f32 %v6739_v33, %v2323_v37 }
 0x583   :  { %v6691_v38 = vsub.f32 %v6484_v35, %v1903_v14  ;;  %v1873_v35 = vsel %vm117_vm0, %v6697_v13, 0.0  ;;  %v2712_v32 = vpop.f32.mrf.mxu0 }
 0x584   :  { %v6722_v11 = vadd.f32 %v6705_v28, %v2712_v32  ;;  %v2297_v23 = vmul.f32 %v4573_v27, %v2296_v24  ;;  %v6778_v24 = vld [vmem:[%s8086_s7 + $0x6] ss:$0 sm:$0xff] }
 0x585   :  { %v1967_v58 = vmul.f32 %v6691_v38, %v6691_v38 }
 0x586   :  { %v2301_v48 = vsel %vm2300_vm6, %v4573_v27, %v2297_v23  ;;  %v2567_v23 = vld [vmem:[%s8080_s1 + $0x88] sm:$0xff] }
 0x587   :  { %v2053_v16 = vsel %vm117_vm0, %v1967_v58, 0.0  ;;  %v2468_v55 = vmul.f32 %v2301_v48, %v6448_v53  ;;  %v2325_v58 = vmul.f32 0.5, %v2324_v61  ;;  %v6761_v53 = vld [vmem:[%s8086_s7 + $0x5] ss:$0 sm:$0xff] }
 0x588   :  { %2054 = vadd.xlane.f32.xlu0 %v2053_v16  ;;  %v1866_v0 = vpop.xlane.xlu2 %1865  ;;  %1874 = vadd.xlane.f32.xlu1 %v1873_v35 }
 0x589   :  { %v1904_v40 = vmul.f32 %v1866_v0, %v5093_v1 }
 0x58b   :  { %v6711_v57 = vsub.f32 %v6490_v3, %v1904_v40  ;;  %v2796_v3 = vsel %vm117_vm0, %v6722_v11, 0.0  ;;  %v2715_v46 = vpop.f32.mrf.mxu0 }
 0x58c   :  { %v6727_v51 = vadd.f32 %v6705_v28, %v2715_v46  ;;  %v2326_v46 = vsub.f32 1.5, %v2325_v58 }
 0x58d   :  { %v1968_v22 = vmul.f32 %v6711_v57, %v6711_v57 }
 0x58e   :  { %v2799_v34 = vsel %vm117_vm0, %v6727_v51, 0.0 }
 0x58f   :  { %v2056_v9 = vsel %vm117_vm0, %v1968_v22, 0.0 }
 0x590   :  { %2057 = vadd.xlane.f32.xlu0 %v2056_v9  ;;  %2788 = vadd.xlane.f32.xlu1 %v2787_v47 }
 0x598   :  { %2797 = vadd.xlane.f32.xlu0 %v2796_v3  ;;  %v2501_v3 = vmul.f32 %v6761_v53, %v2468_v55 }
 0x5a0   :  { %2800 = vadd.xlane.f32.xlu0 %v2799_v34 }
 0x5bb   :  { %v2025_v12 = vpop.xlane.xlu1 %2024 }
 0x5bc   :  { %v2085_v60 = vmul.f32 %v2025_v12, %v5093_v1 }
 0x5be   :  { %v2117_v6 = vadd.f32 1e-05, %v2085_v60  ;;  %v2327_v60 = vmul.f32 %v6739_v33, %v2326_v46 }
 0x5c0   :  { %4576 = vrsqrt.f32 %v2117_v6  ;;  %vm2308_vm8 = vweird.f32 %v2117_v6  ;;  %v2331_v36 = vsel %vm6799_vm13, %v6739_v33, %v2327_v60 }
 0x5c3   :  { %v2028_v41 = vpop.xlane.xlu1 %2027 }
 0x5c4   :  { %v2086_v17 = vmul.f32 %v2028_v41, %v5093_v1 }
 0x5c6   :  { %v4577_v31 = vpop.eup %4576  ;;  %v2118_v59 = vadd.f32 1e-05, %v2086_v17  ;;  %v2566_v17 = vld [vmem:[%s8080_s1 + $0x80] sm:$0xff] }
 0x5c7   :  { %v2303_v25 = vmul.f32 %v4577_v31, %v2117_v6  ;;  %vm2309_vm7 = vweird.f32 %v4577_v31 }
 0x5c8   :  { %4578 = vrsqrt.f32 %v2118_v59  ;;  %vm2310_vm9 = vmor %vm2308_vm8, %vm2309_vm7  ;;  %vm2318_vm14 = vweird.f32 %v2118_v59 }
 0x5c9   :  { %v2304_v39 = vmul.f32 %v4577_v31, %v2303_v25  ;;  %4580 = vrsqrt.f32 %v6746_v4 }
 0x5cb   :  { %v2305_v44 = vmul.f32 0.5, %v2304_v39  ;;  %v1857_v15 = vpop.xlane.xlu1 %1856  ;;  %v2037_v14 = vpop.xlane.xlu0 %2036 }
 0x5cc   :  { %v1901_v16 = vmul.f32 %v1857_v15, %v5093_v1  ;;  %v2089_v35 = vmul.f32 %v2037_v14, %v5093_v1 }
 0x5cd   :  { %v2306_v0 = vsub.f32 1.5, %v2305_v44 }
 0x5ce   :  { %v4579_v40 = vpop.eup %4578  ;;  %v6754_v22 = vsub.f32 %v6580_v18, %v1901_v16  ;;  %v6756_v32 = vadd.f32 1e-05, %v2089_v35 }
 0x5cf   :  { %v2307_v9 = vmul.f32 %v4577_v31, %v2306_v0  ;;  %v2313_v47 = vmul.f32 %v4579_v40, %v2118_v59  ;;  %v6767_v34 = vpop.eup %4580  ;;  %vm2319_vm11 = vweird.f32 %v4579_v40 }
 0x5d0   :  { %4582 = vrsqrt.f32 %v6756_v32  ;;  %v1965_v18 = vmul.f32 %v6754_v22, %v6754_v22  ;;  %v2333_v45 = vmul.f32 %v6767_v34, %v6746_v4  ;;  %vm2320_vm15 = vmor %vm2318_vm14, %vm2319_vm11  ;;  %vm2339_vm3 = vweird.f32 %v6767_v34 }
 0x5d1   :  { %v2311_v30 = vsel %vm2310_vm9, %v4577_v31, %v2307_v9  ;;  %v2314_v21 = vmul.f32 %v4579_v40, %v2313_v47  ;;  %vm2348_vm4 = vweird.f32 %v6756_v32  ;;  %vm2340_vm6 = vmor %vm2338_vm1, %vm2339_vm3 }
 0x5d2   :  { %v2469_v27 = vmul.f32 %v2311_v30, %v6517_v5  ;;  %v2047_v52 = vsel %vm117_vm0, %v1965_v18, 0.0  ;;  %v2534_v5 = vadd.f32 %v6778_v24, %v2501_v3  ;;  %v2334_v55 = vmul.f32 %v6767_v34, %v2333_v45 }
 0x5d3   :  { %v2315_v7 = vmul.f32 0.5, %v2314_v21  ;;  %2048 = vadd.xlane.f32.xlu2 %v2047_v52  ;;  %v1860_v26 = vpop.xlane.xlu1 %1859  ;;  %v2040_v12 = vpop.xlane.xlu0 %2039  ;;  %v2471_v3 = vmul.f32 %v2331_v36, %v6459_v19 }
 0x5d4   :  { %v2502_v43 = vmul.f32 %v6761_v53, %v2469_v27  ;;  %v1902_v6 = vmul.f32 %v1860_v26, %v5093_v1  ;;  %v2090_v37 = vmul.f32 %v2040_v12, %v5093_v1  ;;  %v2598_v15 = vmul.f32 %v2566_v17, %v2534_v5  ;;  %v2717_v52 = vpop.f32.mrf.mxu0  ;;  %v2569_v17 = vld [vmem:[%s8080_s1 + $0x98] sm:$0xff] }
 0x5d5   :  { %v2316_v41 = vsub.f32 1.5, %v2315_v7  ;;  %v2335_v18 = vmul.f32 0.5, %v2334_v55  ;;  %v2504_v27 = vmul.f32 %v6761_v53, %v2471_v3  ;;  %v2571_v3 = vld [vmem:[%s8080_s1 + $0xa8] sm:$0xff] }
 0x5d6   :  { %v6790_v31 = vpop.eup %4582  ;;  %v6794_v25 = vsub.f32 %v6604_v56, %v1902_v6  ;;  %v2535_v61 = vadd.f32 %v6778_v24, %v2502_v43  ;;  %v6812_v35 = vadd.f32 1e-05, %v2090_v37  ;;  %v2568_v6 = vld [vmem:[%s8080_s1 + $0x90] sm:$0xff] }
 0x5d7   :  { %v2317_v39 = vmul.f32 %v4579_v40, %v2316_v41  ;;  %v2343_v44 = vmul.f32 %v6790_v31, %v6756_v32  ;;  %v2336_v7 = vsub.f32 1.5, %v2335_v18  ;;  %vm2349_vm2 = vweird.f32 %v6790_v31 }
 0x5d8   :  { %v1966_v56 = vmul.f32 %v6794_v25, %v6794_v25  ;;  %v2599_v14 = vmul.f32 %v2567_v23, %v2535_v61  ;;  %4584 = vrsqrt.f32 %v6812_v35  ;;  %v2537_v45 = vadd.f32 %v6778_v24, %v2504_v27  ;;  %vm2350_vm5 = vmor %vm2348_vm4, %vm2349_vm2 }
 0x5d9   :  { %v2321_v58 = vsel %vm2320_vm15, %v4579_v40, %v2317_v39  ;;  %v2344_v16 = vmul.f32 %v6790_v31, %v2343_v44  ;;  %v6822_v40 = vadd.f32 %v6705_v28, %v6673_v8  ;;  %v6846_v41 = vadd.f32 %v6705_v28, %v6694_v62 }
 0x5da   :  { %v2470_v59 = vmul.f32 %v2321_v58, %v6546_v10  ;;  %v2050_v0 = vsel %vm117_vm0, %v1966_v56, 0.0  ;;  %v2626_v9 = vpack.c.bf16 %v2599_v14, %v2598_v15  ;;  %v2337_v37 = vmul.f32 %v6767_v34, %v2336_v7 }
 0x5db   :  { %v2345_v47 = vmul.f32 0.5, %v2344_v16  ;;  %2051 = vadd.xlane.f32.xlu2 %v2050_v0  ;;  %v1869_v33 = vpop.xlane.xlu0 %1868  ;;  %v2790_v26 = vsel %vm117_vm0, %v6822_v40, 0.0  ;;  %v2601_v39 = vmul.f32 %v2569_v17, %v2537_v45  ;;  %v2793_v56 = vsel %vm117_vm0, %v6846_v41, 0.0 }
 0x5dc   :  { %v1905_v46 = vmul.f32 %v1869_v33, %v5093_v1  ;;  %4349 = vmatmul.msk.bf16.gmra.mxu0 %vm117_vm0, %v2626_v9  ;;  %v2503_v10 = vmul.f32 %v6761_v53, %v2470_v59  ;;  %v2720_v44 = vpop.f32.mrf.mxu0  ;;  %v2341_v36 = vsel %vm2340_vm6, %v6767_v34, %v2337_v37  ;;  %v6873_v34 = vadd.f32 %v6705_v28, %v2717_v52 }
 0x5dd   :  { %v2346_v21 = vsub.f32 1.5, %v2345_v47  ;;  %vm2358_vm8 = vweird.f32 %v6812_v35 }
 0x5de   :  { %v6826_v30 = vsub.f32 %v6630_v20, %v1905_v46  ;;  %v2536_v8 = vadd.f32 %v6778_v24, %v2503_v10  ;;  %v6835_v60 = vpop.eup %4584  ;;  %v2802_v47 = vsel %vm117_vm0, %v6873_v34, 0.0  ;;  %v2570_v10 = vld [vmem:[%s8080_s1 + $0xa0] sm:$0xff] }
 0x5df   :  { %v2347_v20 = vmul.f32 %v6790_v31, %v2346_v21  ;;  %v2353_v23 = vmul.f32 %v6835_v60, %v6812_v35  ;;  %v6890_v21 = vadd.f32 %v6705_v28, %v2720_v44  ;;  %vm2359_vm7 = vweird.f32 %v6835_v60 }
 0x5e0   :  { %v1969_v19 = vmul.f32 %v6826_v30, %v6826_v30  ;;  %v2600_v48 = vmul.f32 %v2568_v6, %v2536_v8  ;;  %vm2360_vm9 = vmor %vm2358_vm8, %vm2359_vm7 }
 0x5e1   :  { %v2351_v62 = vsel %vm2350_vm5, %v6790_v31, %v2347_v20  ;;  %v2472_v31 = vmul.f32 %v2341_v36, %v6472_v50  ;;  %v2805_v20 = vsel %vm117_vm0, %v6890_v21, 0.0 }
 0x5e2   :  { %v2059_v12 = vsel %vm117_vm0, %v1969_v19, 0.0  ;;  %v2473_v15 = vmul.f32 %v2351_v62, %v6577_v49  ;;  %v2627_v4 = vpack.c.bf16 %v2601_v39, %v2600_v48 }
 0x5e3   :  { %2791 = vadd.xlane.f32.xlu2 %v2790_v26  ;;  %2060 = vadd.xlane.f32.xlu1 %v2059_v12  ;;  %v1872_v43 = vpop.xlane.xlu0 %1871  ;;  %v2505_v0 = vmul.f32 %v6761_v53, %v2472_v31 }
 0x5e4   :  { %v1906_v5 = vmul.f32 %v1872_v43, %v5093_v1  ;;  %v2506_v16 = vmul.f32 %v6761_v53, %v2473_v15  ;;  %v2722_v33 = vpop.f32.mrf.mxu0 }
 0x5e5   :  { %v2538_v18 = vadd.f32 %v6778_v24, %v2505_v0 }
 0x5e6   :  { %v6857_v61 = vsub.f32 %v6647_v42, %v1906_v5  ;;  %v2354_v42 = vmul.f32 %v6835_v60, %v2353_v23  ;;  %v2539_v50 = vadd.f32 %v6778_v24, %v2506_v16 }
 0x5e7   :  { %v2602_v26 = vmul.f32 %v2570_v10, %v2538_v18 }
 0x5e8   :  { %v1970_v32 = vmul.f32 %v6857_v61, %v6857_v61  ;;  %v2355_v49 = vmul.f32 0.5, %v2354_v42  ;;  %v2603_v19 = vmul.f32 %v2571_v3, %v2539_v50 }
 0x5ea   :  { %v2062_v14 = vsel %vm117_vm0, %v1970_v32, 0.0  ;;  %v2356_v9 = vsub.f32 1.5, %v2355_v49  ;;  %v2628_v43 = vpack.c.bf16 %v2603_v19, %v2602_v26 }
 0x5eb   :  { %2794 = vadd.xlane.f32.xlu2 %v2793_v56  ;;  %2063 = vadd.xlane.f32.xlu1 %v2062_v14  ;;  %v2043_v55 = vpop.xlane.xlu1 %2042 }
 0x5ec   :  { %4350 = vmatmul.msk.bf16.gmra.mxu0 %vm117_vm0, %v2627_v4  ;;  %v2091_v58 = vmul.f32 %v2043_v55, %v5093_v1  ;;  %v2357_v27 = vmul.f32 %v6835_v60, %v2356_v9  ;;  %v2725_v6 = vpop.f32.mrf.mxu0  ;;  %v2572_v4 = vld [vmem:[%s8080_s1 + $0xb0] sm:$0xff] }
 0x5ee   :  { %v2123_v59 = vadd.f32 1e-05, %v2091_v58  ;;  %v2361_v12 = vsel %vm2360_vm9, %v6835_v60, %v2357_v27 }
 0x5ef   :  { %v2474_v35 = vmul.f32 %v2361_v12, %v6610_v63 }
 0x5f0   :  { %4586 = vrsqrt.f32 %v2123_v59  ;;  %vm2368_vm11 = vweird.f32 %v2123_v59 }
 0x5f1   :  { %v2507_v62 = vmul.f32 %v6761_v53, %v2474_v35 }
 0x5f3   :  { %2803 = vadd.xlane.f32.xlu1 %v2802_v47  ;;  %v6883_v46 = vpop.xlane.xlu1 %2045  ;;  %v2540_v14 = vadd.f32 %v6778_v24, %v2507_v62 }
 0x5f4   :  { %v6911_v15 = vpop.f32.mrf.mxu0 }
 0x5f5   :  { %v2604_v16 = vmul.f32 %v2572_v4, %v2540_v14 }
 0x5f6   :  { %v4587_v52 = vpop.eup %4586 }
 0x5f7   :  { %v2363_v7 = vmul.f32 %v4587_v52, %v2123_v59  ;;  %vm2369_vm10 = vweird.f32 %v4587_v52 }
 0x5f8   :  { %vm2370_vm12 = vmor %vm2368_vm11, %vm2369_vm10 }
 0x5f9   :  { %v2364_v8 = vmul.f32 %v4587_v52, %v2363_v7 }
 0x5fb   :  { %2806 = vadd.xlane.f32.xlu1 %v2805_v20  ;;  %v6898_v5 = vpop.xlane.xlu0 %2054  ;;  %v2365_v45 = vmul.f32 0.5, %v2364_v8  ;;  %v1875_v37 = vpop.xlane.xlu1 %1874 }
 0x5fc   :  { %4351 = vmatmul.msk.bf16.gmra.mxu0 %vm117_vm0, %v2628_v43  ;;  %v1907_v17 = vmul.f32 %v1875_v37, %v5093_v1  ;;  %v6937_v3 = vpop.f32.mrf.mxu0  ;;  %v2092_v37 = vmul.f32 %v6883_v46, %v5093_v1 }
 0x5fd   :  { %v2366_v23 = vsub.f32 1.5, %v2365_v45 }
 0x5fe   :  { %v6904_v60 = vsub.f32 %v6697_v13, %v1907_v17  ;;  %v2124_v35 = vadd.f32 1e-05, %v2092_v37 }
 0x5ff   :  { %v2367_v48 = vmul.f32 %v4587_v52, %v2366_v23  ;;  %v2095_v23 = vmul.f32 %v6898_v5, %v5093_v1 }
 0x600   :  { %v1971_v32 = vmul.f32 %v6904_v60, %v6904_v60  ;;  %4588 = vrsqrt.f32 %v2124_v35  ;;  %vm2378_vm14 = vweird.f32 %v2124_v35 }
 0x601   :  { %v2371_v39 = vsel %vm2370_vm12, %v4587_v52, %v2367_v48  ;;  %v6970_v62 = vadd.f32 1e-05, %v2095_v23 }
 0x602   :  { %v2475_v44 = vmul.f32 %v2371_v39, %v6661_v2  ;;  %v2065_v63 = vsel %vm117_vm0, %v1971_v32, 0.0  ;;  %v2573_v2 = vld [vmem:[%s8080_s1 + $0xb8] sm:$0xff] }
 0x603   :  { %v2058_v36 = vpop.xlane.xlu0 %2057  ;;  %2066 = vadd.xlane.f32.xlu2 %v2065_v63  ;;  %v2789_v56 = vpop.xlane.xlu1 %2788  ;;  %4590 = vrsqrt.f32 %v6970_v62  ;;  %vm2408_vm6 = vweird.f32 %v6970_v62 }
 0x604   :  { %v2508_v13 = vmul.f32 %v6761_v53, %v2475_v44  ;;  %v2883_v42 = vmul.f32 %v2789_v56, %v5093_v1  ;;  %v2732_v26 = vpop.f32.mrf.mxu0 }
 0x605   :  { %v6957_v20 = vadd.f32 %v6705_v28, %v2732_v26 }
 0x606   :  { %v6923_v31 = vsub.f32 %v6714_v29, %v2883_v42  ;;  %v2541_v55 = vadd.f32 %v6778_v24, %v2508_v13  ;;  %v6935_v29 = vadd.f32 %v6705_v28, %v2722_v33  ;;  %v6949_v33 = vadd.f32 %v6705_v28, %v2725_v6  ;;  %v4589_v17 = vpop.eup %4588 }
 0x607   :  { %v2373_v48 = vmul.f32 %v4589_v17, %v2124_v35  ;;  %v2096_v42 = vmul.f32 %v2058_v36, %v5093_v1  ;;  %vm2379_vm13 = vweird.f32 %v4589_v17 }
 0x608   :  { %v2947_v58 = vmul.f32 %v6923_v31, %v6923_v31  ;;  %v2605_v49 = vmul.f32 %v2573_v2, %v2541_v55  ;;  %v2808_v27 = vsel %vm117_vm0, %v6935_v29, 0.0  ;;  %v2811_v8 = vsel %vm117_vm0, %v6949_v33, 0.0  ;;  %vm2380_vm15 = vmor %vm2378_vm14, %vm2379_vm13 }
 0x609   :  { %v2374_v32 = vmul.f32 %v4589_v17, %v2373_v48  ;;  %v6974_v13 = vpop.eup %4590 }
 0x60a   :  { %v2979_v59 = vsel %vm117_vm0, %v2947_v58, 0.0  ;;  %v2629_v9 = vpack.c.bf16 %v2605_v49, %v2604_v16  ;;  %v2403_v5 = vmul.f32 %v6974_v13, %v6970_v62  ;;  %v6980_v16 = vadd.f32 1e-05, %v2096_v42 }
 0x60b   :  { %v2798_v0 = vpop.xlane.xlu0 %2797  ;;  %2980 = vadd.xlane.f32.xlu2 %v2979_v59  ;;  %v2375_v63 = vmul.f32 0.5, %v2374_v32  ;;  %vm2409_vm5 = vweird.f32 %v6974_v13 }
 0x60c   :  { %v2886_v47 = vmul.f32 %v2798_v0, %v5093_v1  ;;  %4352 = vmatmul.msk.bf16.gmra.mxu0 %vm117_vm0, %v2629_v9  ;;  %v2735_v43 = vpop.f32.mrf.mxu0  ;;  %v2404_v59 = vmul.f32 %v6974_v13, %v2403_v5  ;;  %vm7023_vm7 = vmor %vm2408_vm6, %vm2409_vm5  ;;  %vm2418_vm14 = vweird.f32 %v6980_v16 }
 0x60d   :  { %v6962_v6 = vadd.f32 %v6705_v28, %v2735_v43  ;;  %v2376_v46 = vsub.f32 1.5, %v2375_v63 }
 0x60e   :  { %v6932_v50 = vsub.f32 %v6722_v11, %v2886_v47 }
 0x60f   :  { %v2823_v45 = vsel %vm117_vm0, %v6962_v6, 0.0  ;;  %v2377_v2 = vmul.f32 %v4589_v17, %v2376_v46 }
 0x610   :  { %v2950_v18 = vmul.f32 %v6932_v50, %v6932_v50 }
 0x611   :  { %v2381_v0 = vsel %vm2380_vm15, %v4589_v17, %v2377_v2  ;;  %v2575_v2 = vld [vmem:[%s8080_s1 + $0xc8] sm:$0xff] }
 0x612   :  { %v2988_v10 = vsel %vm117_vm0, %v2950_v18, 0.0 }
 0x613   :  { %2989 = vadd.xlane.f32.xlu1 %v2988_v10  ;;  %v2801_v19 = vpop.xlane.xlu0 %2800  ;;  %2809 = vadd.xlane.f32.xlu2 %v2808_v27  ;;  %v2476_v10 = vmul.f32 %v2381_v0, %v6676_v54  ;;  %v2405_v27 = vmul.f32 0.5, %v2404_v59 }
 0x614   :  { %v2887_v52 = vmul.f32 %v2801_v19, %v5093_v1 }
 0x615   :  { %v2406_v37 = vsub.f32 1.5, %v2405_v27 }
 0x616   :  { %v6946_v11 = vsub.f32 %v6727_v51, %v2887_v52  ;;  %v2820_v51 = vsel %vm117_vm0, %v6957_v20, 0.0 }
 0x617   :  { %v2407_v63 = vmul.f32 %v6974_v13, %v2406_v37 }
 0x618   :  { %v2951_v7 = vmul.f32 %v6946_v11, %v6946_v11 }
 0x619   :  { %v2411_v62 = vsel %vm7023_vm7, %v6974_v13, %v2407_v63 }
 0x61a   :  { %v2991_v12 = vsel %vm117_vm0, %v2951_v7, 0.0 }
 0x61b   :  { %2992 = vadd.xlane.f32.xlu1 %v2991_v12  ;;  %2812 = vadd.xlane.f32.xlu2 %v2811_v8 }
 0x623   :  { %2821 = vadd.xlane.f32.xlu1 %v2820_v51 }
 0x62b   :  { %2824 = vadd.xlane.f32.xlu1 %v2823_v45  ;;  %v2509_v45 = vmul.f32 %v6761_v53, %v2476_v10 }
 0x62d   :  { %v2542_v42 = vadd.f32 %v6778_v24, %v2509_v45  ;;  %v2479_v45 = vmul.f32 %v2411_v62, %v6691_v38 }
 0x62f   :  { %v2512_v38 = vmul.f32 %v6761_v53, %v2479_v45  ;;  %v2579_v45 = vld [vmem:[%s8080_s1 + $0xe8] sm:$0xff] }
 0x646   :  { %v2049_v39 = vpop.xlane.xlu2 %2048 }
 0x647   :  { %v2093_v44 = vmul.f32 %v2049_v39, %v5093_v1 }
 0x649   :  { %v2125_v56 = vadd.f32 1e-05, %v2093_v44 }
 0x64b   :  { %4592 = vrsqrt.f32 %v2125_v56  ;;  %vm2388_vm3 = vweird.f32 %v2125_v56 }
 0x64e   :  { %v2052_v14 = vpop.xlane.xlu2 %2051 }
 0x64f   :  { %v2094_v4 = vmul.f32 %v2052_v14, %v5093_v1 }
 0x651   :  { %v4593_v55 = vpop.eup %4592  ;;  %v2126_v58 = vadd.f32 1e-05, %v2094_v4  ;;  %v2574_v4 = vld [vmem:[%s8080_s1 + $0xc0] sm:$0xff] }
 0x652   :  { %v2383_v49 = vmul.f32 %v4593_v55, %v2125_v56  ;;  %vm2389_vm2 = vweird.f32 %v4593_v55 }
 0x653   :  { %4594 = vrsqrt.f32 %v2126_v58  ;;  %vm2390_vm4 = vmor %vm2388_vm3, %vm2389_vm2  ;;  %vm2398_vm8 = vweird.f32 %v2126_v58 }
 0x654   :  { %v2384_v36 = vmul.f32 %v4593_v55, %v2383_v49  ;;  %4596 = vrsqrt.f32 %v6980_v16 }
 0x656   :  { %v2385_v9 = vmul.f32 0.5, %v2384_v36  ;;  %v2061_v47 = vpop.xlane.xlu1 %2060  ;;  %v2792_v18 = vpop.xlane.xlu2 %2791 }
 0x657   :  { %v2097_v19 = vmul.f32 %v2061_v47, %v5093_v1  ;;  %v2884_v52 = vmul.f32 %v2792_v18, %v5093_v1  ;;  %v2606_v47 = vmul.f32 %v2574_v4, %v2542_v42  ;;  %v2577_v4 = vld [vmem:[%s8080_s1 + $0xd8] sm:$0xff] }
 0x658   :  { %v2386_v7 = vsub.f32 1.5, %v2385_v9 }
 0x659   :  { %v4595_v26 = vpop.eup %4594  ;;  %v6987_v12 = vadd.f32 1e-05, %v2097_v19  ;;  %v6990_v8 = vsub.f32 %v6822_v40, %v2884_v52 }
 0x65a   :  { %v2387_v51 = vmul.f32 %v4593_v55, %v2386_v7  ;;  %v2393_v43 = vmul.f32 %v4595_v26, %v2126_v58  ;;  %v6996_v35 = vpop.eup %4596  ;;  %vm2399_vm1 = vweird.f32 %v4595_v26 }
 0x65b   :  { %4598 = vrsqrt.f32 %v6987_v12  ;;  %v2948_v54 = vmul.f32 %v6990_v8, %v6990_v8  ;;  %v2413_v14 = vmul.f32 %v6996_v35, %v6980_v16  ;;  %vm2400_vm9 = vmor %vm2398_vm8, %vm2399_vm1  ;;  %vm2419_vm11 = vweird.f32 %v6996_v35 }
 0x65c   :  { %v2391_v17 = vsel %vm2390_vm4, %v4593_v55, %v2387_v51  ;;  %v2394_v23 = vmul.f32 %v4595_v26, %v2393_v43  ;;  %vm2428_vm12 = vweird.f32 %v6987_v12  ;;  %vm2420_vm15 = vmor %vm2418_vm14, %vm2419_vm11 }
 0x65d   :  { %v2477_v48 = vmul.f32 %v2391_v17, %v6754_v22  ;;  %v2982_v40 = vsel %vm117_vm0, %v2948_v54, 0.0  ;;  %v2414_v10 = vmul.f32 %v6996_v35, %v2413_v14  ;;  %v2545_v14 = vadd.f32 %v6778_v24, %v2512_v38 }
 0x65e   :  { %v2395_v32 = vmul.f32 0.5, %v2394_v23  ;;  %v2064_v39 = vpop.xlane.xlu1 %2063  ;;  %2983 = vadd.xlane.f32.xlu0 %v2982_v40  ;;  %v2795_v44 = vpop.xlane.xlu2 %2794 }
 0x65f   :  { %v2510_v56 = vmul.f32 %v6761_v53, %v2477_v48  ;;  %v2885_v46 = vmul.f32 %v2795_v44, %v5093_v1  ;;  %v2098_v5 = vmul.f32 %v2064_v39, %v5093_v1  ;;  %v2415_v54 = vmul.f32 0.5, %v2414_v10  ;;  %v2737_v23 = vpop.f32.mrf.mxu0 }
 0x660   :  { %v2396_v22 = vsub.f32 1.5, %v2395_v32 }
 0x661   :  { %v7014_v55 = vpop.eup %4598  ;;  %v7018_v49 = vsub.f32 %v6846_v41, %v2885_v46  ;;  %v2543_v59 = vadd.f32 %v6778_v24, %v2510_v56  ;;  %v7036_v52 = vadd.f32 1e-05, %v2098_v5  ;;  %v2416_v32 = vsub.f32 1.5, %v2415_v54  ;;  %v2576_v46 = vld [vmem:[%s8080_s1 + $0xd0] sm:$0xff] }
 0x662   :  { %v2397_v36 = vmul.f32 %v4595_v26, %v2396_v22  ;;  %v2423_v9 = vmul.f32 %v7014_v55, %v6987_v12  ;;  %vm2429_vm10 = vweird.f32 %v7014_v55  ;;  %v7070_v22 = vadd.f32 %v6705_v28, %v6937_v3 }
 0x663   :  { %v2949_v41 = vmul.f32 %v7018_v49, %v7018_v49  ;;  %v2607_v18 = vmul.f32 %v2575_v2, %v2543_v59  ;;  %4600 = vrsqrt.f32 %v7036_v52  ;;  %v2417_v5 = vmul.f32 %v6996_v35, %v2416_v32  ;;  %vm2430_vm13 = vmor %vm2428_vm12, %vm2429_vm10 }
 0x664   :  { %v2401_v27 = vsel %vm2400_vm9, %v4595_v26, %v2397_v36  ;;  %v2424_v19 = vmul.f32 %v7014_v55, %v2423_v9  ;;  %v7046_v26 = vadd.f32 %v6705_v28, %v6911_v15  ;;  %v2609_v36 = vmul.f32 %v2577_v4, %v2545_v14 }
 0x665   :  { %v2478_v58 = vmul.f32 %v2401_v27, %v6794_v25  ;;  %v2985_v7 = vsel %vm117_vm0, %v2949_v41, 0.0  ;;  %v2630_v51 = vpack.c.bf16 %v2607_v18, %v2606_v47  ;;  %v2421_v62 = vsel %vm2420_vm15, %v6996_v35, %v2417_v5 }
 0x666   :  { %v2425_v43 = vmul.f32 0.5, %v2424_v19  ;;  %v2804_v13 = vpop.xlane.xlu1 %2803  ;;  %2986 = vadd.xlane.f32.xlu0 %v2985_v7  ;;  %v2814_v44 = vsel %vm117_vm0, %v7046_v26, 0.0  ;;  %v2817_v41 = vsel %vm117_vm0, %v7070_v22, 0.0  ;;  %v7097_v35 = vadd.f32 %v6705_v28, %v2737_v23 }
 0x667   :  { %v2888_v37 = vmul.f32 %v2804_v13, %v5093_v1  ;;  %4353 = vmatmul.msk.bf16.gmra.mxu0 %vm117_vm0, %v2630_v51  ;;  %v2511_v25 = vmul.f32 %v6761_v53, %v2478_v58  ;;  %v2740_v9 = vpop.f32.mrf.mxu0  ;;  %vm2438_vm3 = vweird.f32 %v7036_v52 }
 0x668   :  { %v2426_v48 = vsub.f32 1.5, %v2425_v43  ;;  %v2826_v43 = vsel %vm117_vm0, %v7097_v35, 0.0  ;;  %v7114_v23 = vadd.f32 %v6705_v28, %v2740_v9 }
 0x669   :  { %v7050_v17 = vsub.f32 %v6873_v34, %v2888_v37  ;;  %v2544_v15 = vadd.f32 %v6778_v24, %v2511_v25  ;;  %v7059_v63 = vpop.eup %4600  ;;  %v2578_v25 = vld [vmem:[%s8080_s1 + $0xe0] sm:$0xff] }
 0x66a   :  { %v2427_v34 = vmul.f32 %v7014_v55, %v2426_v48  ;;  %v2433_v2 = vmul.f32 %v7059_v63, %v7036_v52  ;;  %vm2439_vm2 = vweird.f32 %v7059_v63 }
 0x66b   :  { %v2952_v40 = vmul.f32 %v7050_v17, %v7050_v17  ;;  %v2608_v0 = vmul.f32 %v2576_v46, %v2544_v15  ;;  %vm2440_vm4 = vmor %vm2438_vm3, %vm2439_vm2 }
 0x66c   :  { %v2431_v3 = vsel %vm2430_vm13, %v7014_v55, %v2427_v34  ;;  %v2480_v55 = vmul.f32 %v2421_v62, %v6711_v57  ;;  %v2829_v34 = vsel %vm117_vm0, %v7114_v23, 0.0 }
 0x66d   :  { %v2994_v39 = vsel %vm117_vm0, %v2952_v40, 0.0  ;;  %v2481_v47 = vmul.f32 %v2431_v3, %v6826_v30  ;;  %v2631_v16 = vpack.c.bf16 %v2609_v36, %v2608_v0 }
 0x66e   :  { %2995 = vadd.xlane.f32.xlu2 %v2994_v39  ;;  %v2807_v56 = vpop.xlane.xlu1 %2806  ;;  %2815 = vadd.xlane.f32.xlu0 %v2814_v44  ;;  %v2513_v7 = vmul.f32 %v6761_v53, %v2480_v55 }
 0x66f   :  { %v2889_v42 = vmul.f32 %v2807_v56, %v5093_v1  ;;  %v2514_v19 = vmul.f32 %v6761_v53, %v2481_v47  ;;  %v2742_v13 = vpop.f32.mrf.mxu0 }
 0x670   :  { %v2546_v54 = vadd.f32 %v6778_v24, %v2513_v7 }
 0x671   :  { %v7081_v59 = vsub.f32 %v6890_v21, %v2889_v42  ;;  %v2434_v21 = vmul.f32 %v7059_v63, %v2433_v2  ;;  %v2547_v57 = vadd.f32 %v6778_v24, %v2514_v19 }
 0x672   :  { %v2610_v39 = vmul.f32 %v2578_v25, %v2546_v54 }
 0x673   :  { %v2953_v12 = vmul.f32 %v7081_v59, %v7081_v59  ;;  %v2435_v30 = vmul.f32 0.5, %v2434_v21  ;;  %v2611_v38 = vmul.f32 %v2579_v45, %v2547_v57 }
 0x675   :  { %v2997_v18 = vsel %vm117_vm0, %v2953_v12, 0.0  ;;  %v2436_v51 = vsub.f32 1.5, %v2435_v30  ;;  %v2632_v56 = vpack.c.bf16 %v2611_v38, %v2610_v39 }
 0x676   :  { %2998 = vadd.xlane.f32.xlu2 %v2997_v18  ;;  %2818 = vadd.xlane.f32.xlu0 %v2817_v41  ;;  %v2067_v10 = vpop.xlane.xlu2 %2066 }
 0x677   :  { %4354 = vmatmul.msk.bf16.gmra.mxu0 %vm117_vm0, %v2631_v16  ;;  %v2099_v27 = vmul.f32 %v2067_v10, %v5093_v1  ;;  %v2437_v48 = vmul.f32 %v7059_v63, %v2436_v51  ;;  %v2745_v46 = vpop.f32.mrf.mxu0  ;;  %v2580_v16 = vld [vmem:[%s8080_s1 + $0xf0] sm:$0xff]  ;;  %v4442_v51 = vld [vmem:[%s8089_s10 + $0x8] sm:$0xff] }
 0x678   :  { %3645 = vmatpush.bf16.msrb.mxu2 %v4442_v51 }
 0x679   :  { %v2131_v58 = vadd.f32 1e-05, %v2099_v27  ;;  %v2441_v44 = vsel %vm2440_vm4, %v7059_v63, %v2437_v48 }
 0x67a   :  { %v2482_v52 = vmul.f32 %v2441_v44, %v6857_v61 }
 0x67b   :  { %4602 = vrsqrt.f32 %v2131_v58  ;;  %vm2448_vm1 = vweird.f32 %v2131_v58 }
 0x67c   :  { %v2515_v3 = vmul.f32 %v6761_v53, %v2482_v52 }
 0x67e   :  { %2827 = vadd.xlane.f32.xlu2 %v2826_v43  ;;  %v7107_v37 = vpop.xlane.xlu2 %2980  ;;  %v2548_v18 = vadd.f32 %v6778_v24, %v2515_v3 }
 0x67f   :  { %v7137_v47 = vpop.f32.mrf.mxu0 }
 0x680   :  { %v2612_v27 = vmul.f32 %v2580_v16, %v2548_v18 }
 0x681   :  { %v4603_v40 = vpop.eup %4602 }
 0x682   :  { %v2443_v32 = vmul.f32 %v4603_v40, %v2131_v58  ;;  %vm2449_vm5 = vweird.f32 %v4603_v40 }
 0x683   :  { %vm2450_vm6 = vmor %vm2448_vm1, %vm2449_vm5 }
 0x684   :  { %v2444_v15 = vmul.f32 %v4603_v40, %v2443_v32 }
 0x686   :  { %2830 = vadd.xlane.f32.xlu2 %v2829_v34  ;;  %v7122_v42 = vpop.xlane.xlu1 %2989  ;;  %v2445_v14 = vmul.f32 0.5, %v2444_v15  ;;  %v2810_v5 = vpop.xlane.xlu2 %2809 }
 0x687   :  { %4355 = vmatmul.msk.bf16.gmra.mxu0 %vm117_vm0, %v2632_v56  ;;  %v2890_v4 = vmul.f32 %v2810_v5, %v5093_v1  ;;  %v7166_v57 = vpop.f32.mrf.mxu0 }
 0x688   :  { %v2446_v2 = vsub.f32 1.5, %v2445_v14  ;;  %v3075_v14 = vmul.f32 %v7107_v37, %v5093_v1 }
 0x689   :  { %v7128_v63 = vsub.f32 %v6935_v29, %v2890_v4  ;;  %v3078_v4 = vmul.f32 %v7122_v42, %v5093_v1 }
 0x68a   :  { %v2447_v0 = vmul.f32 %v4603_v40, %v2446_v2  ;;  %v3107_v5 = vadd.f32 1e-05, %v3075_v14 }
 0x68b   :  { %v2954_v12 = vmul.f32 %v7128_v63, %v7128_v63 }
 0x68c   :  { %v2451_v36 = vsel %vm2450_vm6, %v4603_v40, %v2447_v0  ;;  %4604 = vrsqrt.f32 %v3107_v5  ;;  %v4441_v0 = vld [vmem:[%s8089_s10] sm:$0xff]  ;;  %vm3145_vm8 = vweird.f32 %v3107_v5 }
 0x68d   :  { %v2483_v9 = vmul.f32 %v2451_v36, %v6904_v60  ;;  %v3000_v61 = vsel %vm117_vm0, %v2954_v12, 0.0  ;;  %v2581_v60 = vld [vmem:[%s8080_s1 + $0xf8] sm:$0xff]  ;;  %3646 = vmatpush.bf16.msrb.mxu2 %v4441_v0 }
 0x68e   :  { %v7134_v62 = vpop.xlane.xlu1 %2992  ;;  %3001 = vadd.xlane.f32.xlu0 %v3000_v61  ;;  %v2813_v41 = vpop.xlane.xlu2 %2812 }
 0x68f   :  { %v2516_v29 = vmul.f32 %v6761_v53, %v2483_v9  ;;  %v2891_v21 = vmul.f32 %v2813_v41, %v5093_v1  ;;  %v2752_v32 = vpop.f32.mrf.mxu0 }
 0x690   :  { %v7186_v15 = vadd.f32 %v6705_v28, %v2752_v32 }
 0x691   :  { %v7149_v55 = vsub.f32 %v6949_v33, %v2891_v21  ;;  %v2549_v10 = vadd.f32 %v6778_v24, %v2516_v29  ;;  %v7164_v33 = vadd.f32 %v6705_v28, %v2742_v13  ;;  %v7178_v13 = vadd.f32 %v6705_v28, %v2745_v46 }
 0x692   :  { %v4605_v52 = vpop.eup %4604  ;;  %v3079_v21 = vmul.f32 %v7134_v62, %v5093_v1 }
 0x693   :  { %v2955_v53 = vmul.f32 %v7149_v55, %v7149_v55  ;;  %v2613_v19 = vmul.f32 %v2581_v60, %v2549_v10  ;;  %v2832_v48 = vsel %vm117_vm0, %v7164_v33, 0.0  ;;  %v2835_v44 = vsel %vm117_vm0, %v7178_v13, 0.0 }
 0x694   :  { %v3140_v2 = vmul.f32 %v4605_v52, %v3107_v5  ;;  %vm3146_vm7 = vweird.f32 %v4605_v52 }
 0x695   :  { %v3003_v58 = vsel %vm117_vm0, %v2955_v53, 0.0  ;;  %v2633_v7 = vpack.c.bf16 %v2613_v19, %v2612_v27  ;;  %vm3147_vm9 = vmor %vm3145_vm8, %vm3146_vm7  ;;  %v7213_v27 = vadd.f32 1e-05, %v3079_v21 }
 0x696   :  { %v2822_v30 = vpop.xlane.xlu1 %2821  ;;  %3004 = vadd.xlane.f32.xlu0 %v3003_v58  ;;  %v3141_v3 = vmul.f32 %v4605_v52, %v3140_v2 }
 0x697   :  { %v2894_v43 = vmul.f32 %v2822_v30, %v5093_v1  ;;  %4356 = vmatmul.msk.bf16.gmra.mxu0 %vm117_vm0, %v2633_v7  ;;  %v2755_v34 = vpop.f32.mrf.mxu0  ;;  %vm3185_vm8 = vweird.f32 %v7213_v27 }
 0x698   :  { %v7191_v56 = vadd.f32 %v6705_v28, %v2755_v34  ;;  %v7202_v28 = vadd.f32 1e-05, %v3078_v4  ;;  %v3142_v37 = vmul.f32 0.5, %v3141_v3  ;;  %v7236_v34 = vld [vmem:[%s8088_s9 + $0x2] ss:$0 sm:$0xff] }
 0x699   :  { %v7161_v24 = vsub.f32 %v6957_v20, %v2894_v43 }
 0x69a   :  { %v2847_v46 = vsel %vm117_vm0, %v7191_v56, 0.0  ;;  %4606 = vrsqrt.f32 %v7202_v28  ;;  %v3143_v61 = vsub.f32 1.5, %v3142_v37  ;;  %vm3175_vm3 = vweird.f32 %v7202_v28 }
 0x69b   :  { %v2958_v45 = vmul.f32 %v7161_v24, %v7161_v24 }
 0x69c   :  { %v3144_v16 = vmul.f32 %v4605_v52, %v3143_v61 }
 0x69d   :  { %v3012_v54 = vsel %vm117_vm0, %v2958_v45, 0.0 }
 0x69e   :  { %3013 = vadd.xlane.f32.xlu2 %v3012_v54  ;;  %v2825_v25 = vpop.xlane.xlu1 %2824  ;;  %2833 = vadd.xlane.f32.xlu0 %v2832_v48  ;;  %v3148_v30 = vsel %vm3147_vm9, %v4605_v52, %v3144_v16  ;;  %v7221_v54 = vld [vmem:[%s8088_s9 + $0x1] ss:$0 sm:$0xff] }
 0x69f   :  { %v2895_v38 = vmul.f32 %v2825_v25, %v5093_v1  ;;  %v3459_v25 = vmul.f32 %v3148_v30, %v6923_v31 }
 0x6a0   :  { %v7206_v41 = vpop.eup %4606 }
 0x6a1   :  { %v7175_v20 = vsub.f32 %v6962_v6, %v2895_v38  ;;  %v2844_v6 = vsel %vm117_vm0, %v7186_v15, 0.0  ;;  %v3170_v60 = vmul.f32 %v7206_v41, %v7202_v28  ;;  %vm3176_vm13 = vweird.f32 %v7206_v41 }
 0x6a2   :  { %vm3177_vm4 = vmor %vm3175_vm3, %vm3176_vm13 }
 0x6a3   :  { %v2959_v40 = vmul.f32 %v7175_v20, %v7175_v20  ;;  %v3171_v58 = vmul.f32 %v7206_v41, %v3170_v60 }
 0x6a5   :  { %v3015_v39 = vsel %vm117_vm0, %v2959_v40, 0.0  ;;  %v3172_v40 = vmul.f32 0.5, %v3171_v58 }
 0x6a6   :  { %3016 = vadd.xlane.f32.xlu2 %v3015_v39  ;;  %2836 = vadd.xlane.f32.xlu0 %v2835_v44 }
 0x6a7   :  { %v3173_v5 = vsub.f32 1.5, %v3172_v40 }
 0x6ae   :  { %2845 = vadd.xlane.f32.xlu2 %v2844_v6 }
 0x6b6   :  { %2848 = vadd.xlane.f32.xlu2 %v2847_v46  ;;  %v3492_v46 = vmul.f32 %v7221_v54, %v3459_v25 }
 0x6d1   :  { %v2984_v12 = vpop.xlane.xlu0 %2983 }
 0x6d2   :  { %v3076_v36 = vmul.f32 %v2984_v12, %v5093_v1 }
 0x6d4   :  { %v3108_v9 = vadd.f32 1e-05, %v3076_v36 }
 0x6d6   :  { %4608 = vrsqrt.f32 %v3108_v9  ;;  %vm3155_vm11 = vweird.f32 %v3108_v9 }
 0x6d9   :  { %v2987_v42 = vpop.xlane.xlu0 %2986 }
 0x6da   :  { %v3077_v29 = vmul.f32 %v2987_v42, %v5093_v1 }
 0x6dc   :  { %v4609_v18 = vpop.eup %4608  ;;  %v3109_v10 = vadd.f32 1e-05, %v3077_v29 }
 0x6dd   :  { %v3150_v53 = vmul.f32 %v4609_v18, %v3108_v9  ;;  %vm3156_vm10 = vweird.f32 %v4609_v18  ;;  %v3525_v9 = vadd.f32 %v7236_v34, %v3492_v46 }
 0x6de   :  { %4610 = vrsqrt.f32 %v3109_v10  ;;  %vm3157_vm12 = vmor %vm3155_vm11, %vm3156_vm10  ;;  %vm3165_vm15 = vweird.f32 %v3109_v10 }
 0x6df   :  { %v3151_v19 = vmul.f32 %v4609_v18, %v3150_v53  ;;  %4612 = vrsqrt.f32 %v7213_v27 }
 0x6e1   :  { %v3152_v7 = vmul.f32 0.5, %v3151_v19  ;;  %v2816_v51 = vpop.xlane.xlu0 %2815  ;;  %v2996_v62 = vpop.xlane.xlu2 %2995 }
 0x6e2   :  { %v2892_v43 = vmul.f32 %v2816_v51, %v5093_v1  ;;  %v3080_v45 = vmul.f32 %v2996_v62, %v5093_v1 }
 0x6e3   :  { %v3153_v48 = vsub.f32 1.5, %v3152_v7 }
 0x6e4   :  { %v4611_v38 = vpop.eup %4610  ;;  %v7226_v32 = vsub.f32 %v7046_v26, %v2892_v43  ;;  %v7228_v39 = vadd.f32 1e-05, %v3080_v45 }
 0x6e5   :  { %v3154_v44 = vmul.f32 %v4609_v18, %v3153_v48  ;;  %v3160_v6 = vmul.f32 %v4611_v38, %v3109_v10  ;;  %v7241_v2 = vpop.eup %4612  ;;  %vm3166_vm14 = vweird.f32 %v4611_v38  ;;  %v7279_v48 = vld [vmem:[%s8088_s9] ss:$0 sm:$0xff] }
 0x6e6   :  { %4614 = vrsqrt.f32 %v7228_v39  ;;  %v2956_v31 = vmul.f32 %v7226_v32, %v7226_v32  ;;  %v3180_v29 = vmul.f32 %v7241_v2, %v7213_v27  ;;  %vm3167_vm2 = vmor %vm3165_vm15, %vm3166_vm14  ;;  %vm3186_vm1 = vweird.f32 %v7241_v2 }
 0x6e7   :  { %v3158_v26 = vsel %vm3157_vm12, %v4609_v18, %v3154_v44  ;;  %v3161_v14 = vmul.f32 %v4611_v38, %v3160_v6  ;;  %v2757_v44 = vpop.f32.mrf.mxu0  ;;  %vm3195_vm6 = vweird.f32 %v7228_v39  ;;  %vm3187_vm9 = vmor %vm3185_vm8, %vm3186_vm1 }
 0x6e8   :  { %v3460_v52 = vmul.f32 %v3158_v26, %v6990_v8  ;;  %v3006_v4 = vsel %vm117_vm0, %v2956_v31, 0.0  ;;  %v3174_v8 = vmul.f32 %v7206_v41, %v3173_v5  ;;  %v3181_v51 = vmul.f32 %v7241_v2, %v3180_v29 }
 0x6e9   :  { %v3162_v0 = vmul.f32 0.5, %v3161_v14  ;;  %3007 = vadd.xlane.f32.xlu1 %v3006_v4  ;;  %v2819_v3 = vpop.xlane.xlu0 %2818  ;;  %v2999_v12 = vpop.xlane.xlu2 %2998 }
 0x6ea   :  { %v3493_v36 = vmul.f32 %v7221_v54, %v3460_v52  ;;  %v2893_v37 = vmul.f32 %v2819_v3, %v5093_v1  ;;  %v3081_v53 = vmul.f32 %v2999_v12, %v5093_v1  ;;  %v3178_v10 = vsel %vm3177_vm4, %v7206_v41, %v3174_v8 }
 0x6eb   :  { %v3163_v61 = vsub.f32 1.5, %v3162_v0  ;;  %v3462_v41 = vmul.f32 %v3178_v10, %v6932_v50  ;;  %v3182_v6 = vmul.f32 0.5, %v3181_v51  ;;  %v7303_v3 = vadd.f32 %v7279_v48, %v7166_v57 }
 0x6ec   :  { %v7247_v42 = vpop.eup %4614  ;;  %v3526_v21 = vadd.f32 %v7236_v34, %v3493_v36  ;;  %v7254_v18 = vsub.f32 %v7070_v22, %v2893_v37  ;;  %v7272_v62 = vadd.f32 1e-05, %v3081_v53 }
 0x6ed   :  { %v3164_v16 = vmul.f32 %v4611_v38, %v3163_v61  ;;  %v3190_v60 = vmul.f32 %v7247_v42, %v7228_v39  ;;  %v3495_v50 = vmul.f32 %v7221_v54, %v3462_v41  ;;  %v3183_v14 = vsub.f32 1.5, %v3182_v6 }
 0x6ee   :  { %v7259_v19 = vpack.c.bf16 %v3526_v21, %v3525_v9  ;;  %v2957_v30 = vmul.f32 %v7254_v18, %v7254_v18  ;;  %4616 = vrsqrt.f32 %v7272_v62  ;;  %vm3196_vm5 = vweird.f32 %v7247_v42 }
 0x6ef   :  { %v3168_v58 = vsel %vm3167_vm2, %v4611_v38, %v3164_v16  ;;  %v3191_v7 = vmul.f32 %v7247_v42, %v3190_v60  ;;  %v7283_v38 = vadd.f32 %v7279_v48, %v7137_v47  ;;  %v3528_v36 = vadd.f32 %v7236_v34, %v3495_v50  ;;  %vm3197_vm7 = vmor %vm3195_vm6, %vm3196_vm5  ;;  %v2760_v8 = vpop.f32.mrf.mxu0 }
 0x6f0   :  { %4365 = vmatmul.msk.bf16.vlgmr.msrb.gmra.mxu2 %vm117_vm0, %v7259_v19  ;;  %v3009_v22 = vsel %vm117_vm0, %v2957_v30, 0.0  ;;  %v3461_v28 = vmul.f32 %v3168_v58, %v7018_v49  ;;  %v3184_v37 = vmul.f32 %v7241_v2, %v3183_v14  ;;  %v2841_v39 = vsel %vm117_vm0, %v7303_v3, 0.0 }
 0x6f1   :  { %3010 = vadd.xlane.f32.xlu1 %v3009_v22  ;;  %v2828_v43 = vpop.xlane.xlu2 %2827  ;;  %v3192_v25 = vmul.f32 0.5, %v3191_v7  ;;  %v2838_v26 = vsel %vm117_vm0, %v7283_v38, 0.0  ;;  %vm3205_vm11 = vweird.f32 %v7272_v62 }
 0x6f2   :  { %v2896_v45 = vmul.f32 %v2828_v43, %v5093_v1  ;;  %v3494_v31 = vmul.f32 %v7221_v54, %v3461_v28  ;;  %v3188_v21 = vsel %vm3187_vm9, %v7241_v2, %v3184_v37 }
 0x6f3   :  { %v3193_v46 = vsub.f32 1.5, %v3192_v25  ;;  %v3463_v30 = vmul.f32 %v3188_v21, %v6946_v11 }
 0x6f4   :  { %v7287_v40 = vsub.f32 %v7097_v35, %v2896_v45  ;;  %v3527_v52 = vadd.f32 %v7236_v34, %v3494_v31  ;;  %v4617_v4 = vpop.eup %4616  ;;  %v7339_v45 = vadd.f32 %v7279_v48, %v2760_v8 }
 0x6f5   :  { %v3194_v0 = vmul.f32 %v7247_v42, %v3193_v46  ;;  %v3200_v9 = vmul.f32 %v4617_v4, %v7272_v62  ;;  %v3496_v10 = vmul.f32 %v7221_v54, %v3463_v30  ;;  %vm3206_vm10 = vweird.f32 %v4617_v4 }
 0x6f6   :  { %v2960_v49 = vmul.f32 %v7287_v40, %v7287_v40  ;;  %v7313_v61 = vpack.c.bf16 %v3528_v36, %v3527_v52  ;;  %v2853_v31 = vsel %vm117_vm0, %v7339_v45, 0.0  ;;  %vm3207_vm12 = vmor %vm3205_vm11, %vm3206_vm10 }
 0x6f7   :  { %v3201_v60 = vmul.f32 %v4617_v4, %v3200_v9  ;;  %v3529_v11 = vadd.f32 %v7236_v34, %v3496_v10 }
 0x6f8   :  { %v3018_v47 = vsel %vm117_vm0, %v2960_v49, 0.0 }
 0x6f9   :  { %2839 = vadd.xlane.f32.xlu1 %v2838_v26  ;;  %3019 = vadd.xlane.f32.xlu0 %v3018_v47  ;;  %v2831_v35 = vpop.xlane.xlu2 %2830  ;;  %v3202_v7 = vmul.f32 0.5, %v3201_v60 }
 0x6fa   :  { %v2897_v5 = vmul.f32 %v2831_v35, %v5093_v1 }
 0x6fb   :  { %v3203_v51 = vsub.f32 1.5, %v3202_v7 }
 0x6fc   :  { %v7306_v12 = vsub.f32 %v7114_v23, %v2897_v5  ;;  %v3198_v23 = vsel %vm3197_vm7, %v7247_v42, %v3194_v0  ;;  %v7328_v42 = vadd.f32 %v7279_v48, %v2757_v44 }
 0x6fd   :  { %v3464_v16 = vmul.f32 %v3198_v23, %v7050_v17  ;;  %v2762_v17 = vpop.f32.mrf.mxu0  ;;  %v3204_v41 = vmul.f32 %v4617_v4, %v3203_v51 }
 0x6fe   :  { %v2961_v57 = vmul.f32 %v7306_v12, %v7306_v12  ;;  %v2850_v2 = vsel %vm117_vm0, %v7328_v42, 0.0 }
 0x6ff   :  { %v3497_v22 = vmul.f32 %v7221_v54, %v3464_v16  ;;  %v3208_v47 = vsel %vm3207_vm12, %v4617_v4, %v3204_v41 }
 0x700   :  { %4366 = vmatmul.msk.bf16.gmra.mxu2 %vm117_vm0, %v7313_v61  ;;  %v3021_v29 = vsel %vm117_vm0, %v2961_v57, 0.0  ;;  %v3465_v62 = vmul.f32 %v3208_v47, %v7081_v59 }
 0x701   :  { %2842 = vadd.xlane.f32.xlu1 %v2841_v39  ;;  %3022 = vadd.xlane.f32.xlu0 %v3021_v29  ;;  %v3002_v53 = vpop.xlane.xlu0 %3001  ;;  %v3530_v28 = vadd.f32 %v7236_v34, %v3497_v22 }
 0x702   :  { %v3082_v27 = vmul.f32 %v3002_v53, %v5093_v1  ;;  %v3498_v8 = vmul.f32 %v7221_v54, %v3465_v62 }
 0x703   :  { %v7342_v6 = vpack.c.bf16 %v3530_v28, %v3529_v11 }
 0x704   :  { %v3114_v58 = vadd.f32 1e-05, %v3082_v27  ;;  %v3531_v21 = vadd.f32 %v7236_v34, %v3498_v8 }
 0x705   :  { %v2765_v46 = vpop.f32.mrf.mxu0 }
 0x706   :  { %4618 = vrsqrt.f32 %v3114_v58  ;;  %vm3215_vm14 = vweird.f32 %v3114_v58 }
 0x709   :  { %2851 = vadd.xlane.f32.xlu0 %v2850_v2  ;;  %v7335_v43 = vpop.xlane.xlu0 %3004 }
 0x70c   :  { %v4619_v25 = vpop.eup %4618 }
 0x70d   :  { %v3210_v44 = vmul.f32 %v4619_v25, %v3114_v58  ;;  %vm3216_vm13 = vweird.f32 %v4619_v25  ;;  %v7361_v23 = vpop.f32.mrf.mxu0  ;;  %v7382_v58 = vadd.f32 %v7279_v48, %v2762_v17  ;;  %v7396_v17 = vadd.f32 %v7279_v48, %v2765_v46 }
 0x70e   :  { %vm3217_vm15 = vmor %vm3215_vm14, %vm3216_vm13 }
 0x70f   :  { %v3211_v49 = vmul.f32 %v4619_v25, %v3210_v44  ;;  %v2856_v10 = vsel %vm117_vm0, %v7382_v58, 0.0  ;;  %v2859_v44 = vsel %vm117_vm0, %v7396_v17, 0.0 }
 0x710   :  { %4367 = vmatmul.msk.bf16.gmra.mxu2 %vm117_vm0, %v7342_v6 }
 0x711   :  { %2854 = vadd.xlane.f32.xlu0 %v2853_v31  ;;  %v3014_v26 = vpop.xlane.xlu2 %3013  ;;  %v3212_v50 = vmul.f32 0.5, %v3211_v49  ;;  %v2834_v14 = vpop.xlane.xlu0 %2833 }
 0x712   :  { %v2898_v35 = vmul.f32 %v2834_v14, %v5093_v1 }
 0x713   :  { %v3213_v5 = vsub.f32 1.5, %v3212_v50  ;;  %v3083_v50 = vmul.f32 %v7335_v43, %v5093_v1 }
 0x714   :  { %v7352_v52 = vsub.f32 %v7164_v33, %v2898_v35 }
 0x715   :  { %v3214_v0 = vmul.f32 %v4619_v25, %v3213_v5  ;;  %v7384_v7 = vpop.f32.mrf.mxu0  ;;  %v3115_v14 = vadd.f32 1e-05, %v3083_v50  ;;  %v3086_v5 = vmul.f32 %v3014_v26, %v5093_v1  ;;  %v4443_v26 = vld [vmem:[%s8090_s11] sm:$0xff] }
 0x716   :  { %v2962_v36 = vmul.f32 %v7352_v52, %v7352_v52 }
 0x717   :  { %v3218_v37 = vsel %vm3217_vm15, %v4619_v25, %v3214_v0  ;;  %4620 = vrsqrt.f32 %v3115_v14  ;;  %v7416_v0 = vadd.f32 1e-05, %v3086_v5  ;;  %vm3225_vm3 = vweird.f32 %v3115_v14 }
 0x718   :  { %v3466_v4 = vmul.f32 %v3218_v37, %v7128_v63  ;;  %v3024_v9 = vsel %vm117_vm0, %v2962_v36, 0.0 }
 0x719   :  { %v7358_v57 = vpop.xlane.xlu2 %3016  ;;  %3025 = vadd.xlane.f32.xlu1 %v3024_v9  ;;  %v2837_v59 = vpop.xlane.xlu0 %2836  ;;  %4622 = vrsqrt.f32 %v7416_v0  ;;  %vm3255_vm11 = vweird.f32 %v7416_v0 }
 0x71a   :  { %v2899_v33 = vmul.f32 %v2837_v59, %v5093_v1  ;;  %v3499_v39 = vmul.f32 %v7221_v54, %v3466_v4  ;;  %v4444_v4 = vld [vmem:[%s8090_s11 + $0x8] sm:$0xff]  ;;  %s4175_s11 = sshll.u32 %s8092_s13, 4  ;;  %s4742_s13 = smov 64   ;;  %s4176_s11 = int_to_ptr.hbm [resolvable:$true] %s4175_s11 }
 0x71b   :  { %3848 = vmatpush.bf16.msrb.mxu1 %v4444_v4 }
 0x71c   :  { %v7366_v29 = vsub.f32 %v7178_v13, %v2899_v33  ;;  %v3532_v63 = vadd.f32 %v7236_v34, %v3499_v39 }
 0x71d   :  { %v2772_v25 = vpop.f32.mrf.mxu0  ;;  %v4621_v35 = vpop.eup %4620 }
 0x71e   :  { %v7370_v16 = vpack.c.bf16 %v3532_v63, %v3531_v21  ;;  %v2963_v60 = vmul.f32 %v7366_v29, %v7366_v29  ;;  %v7404_v49 = vadd.f32 %v7279_v48, %v2772_v25  ;;  %v3220_v62 = vmul.f32 %v4621_v35, %v3115_v14 }
 0x71f   :  { %3849 = vmatpush.bf16.msrb.mxu1 %v4443_v26  ;;  %v7426_v59 = vpop.eup %4622  ;;  %vm3226_vm2 = vweird.f32 %v4621_v35 }
 0x720   :  { %4368 = vmatmul.msk.bf16.gmra.mxu2 %vm117_vm0, %v7370_v16  ;;  %v3027_v53 = vsel %vm117_vm0, %v2963_v60, 0.0  ;;  %v3221_v36 = vmul.f32 %v4621_v35, %v3220_v62  ;;  %v3250_v63 = vmul.f32 %v7426_v59, %v7416_v0  ;;  %v3087_v60 = vmul.f32 %v7358_v57, %v5093_v1  ;;  %vm3227_vm4 = vmor %vm3225_vm3, %vm3226_vm2 }
 0x721   :  { %v2846_v27 = vpop.xlane.xlu2 %2845  ;;  %3028 = vadd.xlane.f32.xlu1 %v3027_v53  ;;  %vm3256_vm7 = vweird.f32 %v7426_v59 }
 0x722   :  { %v2902_v30 = vmul.f32 %v2846_v27, %v5093_v1  ;;  %v3222_v8 = vmul.f32 0.5, %v3221_v36  ;;  %vm7489_vm12 = vmor %vm3255_vm11, %vm3256_vm7 }
 0x724   :  { %v7379_v13 = vsub.f32 %v7186_v15, %v2902_v30  ;;  %v3223_v33 = vsub.f32 1.5, %v3222_v8 }
 0x725   :  { %v2775_v31 = vpop.f32.mrf.mxu0 }
 0x726   :  { %v2966_v22 = vmul.f32 %v7379_v13, %v7379_v13  ;;  %v7409_v46 = vadd.f32 %v7279_v48, %v2775_v31  ;;  %v3224_v30 = vmul.f32 %v4621_v35, %v3223_v33 }
 0x728   :  { %v3036_v2 = vsel %vm117_vm0, %v2966_v22, 0.0  ;;  %v2871_v47 = vsel %vm117_vm0, %v7409_v46, 0.0 }
 0x729   :  { %3037 = vadd.xlane.f32.xlu0 %v3036_v2  ;;  %v2849_v51 = vpop.xlane.xlu2 %2848  ;;  %2857 = vadd.xlane.f32.xlu1 %v2856_v10  ;;  %v3251_v2 = vmul.f32 %v7426_v59, %v3250_v63  ;;  %v7434_v10 = vadd.f32 1e-05, %v3087_v60 }
 0x72a   :  { %v2903_v28 = vmul.f32 %v2849_v51, %v5093_v1 }
 0x72b   :  { %vm3265_vm3 = vweird.f32 %v7434_v10 }
 0x72c   :  { %v7393_v15 = vsub.f32 %v7191_v56, %v2903_v28  ;;  %v2868_v56 = vsel %vm117_vm0, %v7404_v49, 0.0  ;;  %v3228_v28 = vsel %vm3227_vm4, %v4621_v35, %v3224_v30  ;;  %v7460_v30 = vld [vmem:[%s8088_s9 + $0x3] ss:$0 sm:$0xff] }
 0x72d   :  { %v3467_v50 = vmul.f32 %v3228_v28, %v7149_v55 }
 0x72e   :  { %v2967_v11 = vmul.f32 %v7393_v15, %v7393_v15 }
 0x72f   :  { %v3500_v26 = vmul.f32 %v7221_v54, %v3467_v50 }
 0x730   :  { %v3039_v41 = vsel %vm117_vm0, %v2967_v11, 0.0 }
 0x731   :  { %3040 = vadd.xlane.f32.xlu0 %v3039_v41  ;;  %2860 = vadd.xlane.f32.xlu1 %v2859_v44  ;;  %v3533_v28 = vadd.f32 %v7236_v34, %v3500_v26 }
 0x739   :  { %2869 = vadd.xlane.f32.xlu0 %v2868_v56  ;;  %v3252_v56 = vmul.f32 0.5, %v3251_v2 }
 0x741   :  { %2872 = vadd.xlane.f32.xlu0 %v2871_v47 }
 0x75c   :  { %v3008_v37 = vpop.xlane.xlu1 %3007 }
 0x75d   :  { %v3084_v9 = vmul.f32 %v3008_v37, %v5093_v1  ;;  %v3253_v37 = vsub.f32 1.5, %v3252_v56 }
 0x75f   :  { %v3116_v43 = vadd.f32 1e-05, %v3084_v9 }
 0x761   :  { %4624 = vrsqrt.f32 %v3116_v43  ;;  %vm3235_vm1 = vweird.f32 %v3116_v43 }
 0x764   :  { %v3011_v39 = vpop.xlane.xlu1 %3010 }
 0x765   :  { %v3085_v21 = vmul.f32 %v3011_v39, %v5093_v1 }
 0x767   :  { %v4625_v53 = vpop.eup %4624  ;;  %v3117_v27 = vadd.f32 1e-05, %v3085_v21 }
 0x768   :  { %v3230_v22 = vmul.f32 %v4625_v53, %v3116_v43  ;;  %vm3236_vm5 = vweird.f32 %v4625_v53 }
 0x769   :  { %4626 = vrsqrt.f32 %v3117_v27  ;;  %vm3237_vm6 = vmor %vm3235_vm1, %vm3236_vm5  ;;  %vm3245_vm9 = vweird.f32 %v3117_v27 }
 0x76a   :  { %v3231_v51 = vmul.f32 %v4625_v53, %v3230_v22  ;;  %4628 = vrsqrt.f32 %v7434_v10 }
 0x76c   :  { %v3232_v11 = vmul.f32 0.5, %v3231_v51  ;;  %v2840_v25 = vpop.xlane.xlu1 %2839  ;;  %v3020_v41 = vpop.xlane.xlu0 %3019 }
 0x76d   :  { %v2900_v44 = vmul.f32 %v2840_v25, %v5093_v1  ;;  %v3088_v57 = vmul.f32 %v3020_v41, %v5093_v1 }
 0x76e   :  { %v3233_v31 = vsub.f32 1.5, %v3232_v11 }
 0x76f   :  { %v4627_v47 = vpop.eup %4626  ;;  %v7441_v14 = vsub.f32 %v7283_v38, %v2900_v44  ;;  %v7443_v5 = vadd.f32 1e-05, %v3088_v57 }
 0x770   :  { %v3234_v35 = vmul.f32 %v4625_v53, %v3233_v31  ;;  %v3240_v62 = vmul.f32 %v4627_v47, %v3117_v27  ;;  %v7451_v33 = vpop.eup %4628  ;;  %vm3246_vm8 = vweird.f32 %v4627_v47 }
 0x771   :  { %4630 = vrsqrt.f32 %v7443_v5  ;;  %v2964_v36 = vmul.f32 %v7441_v14, %v7441_v14  ;;  %v3260_v2 = vmul.f32 %v7451_v33, %v7434_v10  ;;  %vm7474_vm10 = vmor %vm3245_vm9, %vm3246_vm8  ;;  %vm3266_vm14 = vweird.f32 %v7451_v33 }
 0x772   :  { %v3238_v4 = vsel %vm3237_vm6, %v4625_v53, %v3234_v35  ;;  %v3241_v9 = vmul.f32 %v4627_v47, %v3240_v62  ;;  %v3254_v53 = vmul.f32 %v7426_v59, %v3253_v37  ;;  %vm3275_vm15 = vweird.f32 %v7443_v5  ;;  %vm7554_vm4 = vmor %vm3265_vm3, %vm3266_vm14 }
 0x773   :  { %v3468_v8 = vmul.f32 %v3238_v4, %v7226_v32  ;;  %v3648_v55 = vpop.f32.mrf.mxu2  ;;  %v3030_v38 = vsel %vm117_vm0, %v2964_v36, 0.0 }
 0x774   :  { %v3242_v43 = vmul.f32 0.5, %v3241_v9  ;;  %3031 = vadd.xlane.f32.xlu2 %v3030_v38  ;;  %v2843_v39 = vpop.xlane.xlu1 %2842  ;;  %v3023_v21 = vpop.xlane.xlu0 %3022  ;;  %v3649_v50 = vadd.f32 %v7460_v30, %v3648_v55  ;;  %v3258_v0 = vsel %vm7489_vm12, %v7426_v59, %v3254_v53 }
 0x775   :  { %v2901_v63 = vmul.f32 %v2843_v39, %v5093_v1  ;;  %v3501_v60 = vmul.f32 %v7221_v54, %v3468_v8  ;;  %v3089_v44 = vmul.f32 %v3023_v21, %v5093_v1  ;;  %v7507_v39 = vadd.f32 %v7279_v48, %v7361_v23 }
 0x776   :  { %v3243_v32 = vsub.f32 1.5, %v3242_v43  ;;  %v3728_v26 = vmax.f32 %v3649_v50, 0.0  ;;  %v3470_v59 = vmul.f32 %v3258_v0, %v7161_v24 }
 0x777   :  { %v7462_v22 = vpop.eup %4630  ;;  %v7467_v51 = vsub.f32 %v7303_v3, %v2901_v63  ;;  %v3534_v11 = vadd.f32 %v7236_v34, %v3501_v60  ;;  %v7500_v37 = vadd.f32 1e-05, %v3089_v44  ;;  %v2862_v23 = vsel %vm117_vm0, %v7507_v39, 0.0 }
 0x778   :  { %v3244_v25 = vmul.f32 %v4627_v47, %v3243_v32  ;;  %v3270_v41 = vmul.f32 %v7462_v22, %v7443_v5  ;;  %vm3276_vm13 = vweird.f32 %v7462_v22 }
 0x779   :  { %v7478_v56 = vpack.c.bf16 %v3534_v11, %v3533_v28  ;;  %v2965_v3 = vmul.f32 %v7467_v51, %v7467_v51  ;;  %4632 = vrsqrt.f32 %v7500_v37  ;;  %vm7539_vm2 = vmor %vm3275_vm15, %vm3276_vm13  ;;  %vm3285_vm1 = vweird.f32 %v7500_v37 }
 0x77a   :  { %v3248_v31 = vsel %vm7474_vm10, %v4627_v47, %v3244_v25  ;;  %v3271_v27 = vmul.f32 %v7462_v22, %v3270_v41  ;;  %v3261_v47 = vmul.f32 %v7451_v33, %v3260_v2 }
 0x77b   :  { %v3650_v62 = vpop.f32.mrf.mxu2  ;;  %4369 = vmatmul.msk.bf16.gmra.mxu2 %vm117_vm0, %v7478_v56  ;;  %v3033_v36 = vsel %vm117_vm0, %v2965_v3, 0.0  ;;  %v3469_v8 = vmul.f32 %v3248_v31, %v7254_v18  ;;  %v7530_v3 = vadd.f32 %v7279_v48, %v7384_v7 }
 0x77c   :  { %v3651_v4 = vadd.f32 %v7460_v30, %v3650_v62  ;;  %3034 = vadd.xlane.f32.xlu2 %v3033_v36  ;;  %v2852_v9 = vpop.xlane.xlu0 %2851  ;;  %v3272_v38 = vmul.f32 0.5, %v3271_v27  ;;  %v3262_v63 = vmul.f32 0.5, %v3261_v47  ;;  %v2777_v36 = vpop.f32.mrf.mxu0 }
 0x77d   :  { %v2904_v55 = vmul.f32 %v2852_v9, %v5093_v1  ;;  %v3502_v53 = vmul.f32 %v7221_v54, %v3469_v8  ;;  %v2865_v9 = vsel %vm117_vm0, %v7530_v3, 0.0 }
 0x77e   :  { %v3729_v43 = vmax.f32 %v3651_v4, 0.0  ;;  %v3273_v32 = vsub.f32 1.5, %v3272_v38  ;;  %v3263_v28 = vsub.f32 1.5, %v3262_v63 }
 0x77f   :  { %v7511_v21 = vsub.f32 %v7328_v42, %v2904_v55  ;;  %v3503_v42 = vmul.f32 %v7221_v54, %v3470_v59  ;;  %v3535_v41 = vadd.f32 %v7236_v34, %v3502_v53  ;;  %v7524_v44 = vpop.eup %4632 }
 0x780   :  { %v3764_v60 = vpack.c.bf16 %v3729_v43, %v3728_v26  ;;  %v3274_v57 = vmul.f32 %v7462_v22, %v3273_v32  ;;  %v3264_v50 = vmul.f32 %v7451_v33, %v3263_v28  ;;  %v3280_v62 = vmul.f32 %v7524_v44, %v7500_v37 }
 0x781   :  { %v2968_v18 = vmul.f32 %v7511_v21, %v7511_v21  ;;  %v3536_v27 = vadd.f32 %v7236_v34, %v3503_v42  ;;  %vm3286_vm5 = vweird.f32 %v7524_v44 }
 0x782   :  { %4389 = vmatmul.msk.bf16.vlgmr.msrb.gmra.mxu1 %vm117_vm0, %v3764_v60  ;;  %v3278_v0 = vsel %vm7539_vm2, %v7462_v22, %v3274_v57  ;;  %v3268_v10 = vsel %vm7554_vm4, %v7451_v33, %v3264_v50  ;;  %v3281_v38 = vmul.f32 %v7524_v44, %v3280_v62  ;;  %v7571_v60 = vadd.f32 %v7279_v48, %v2777_v36  ;;  %vm3287_vm6 = vmor %vm3285_vm1, %vm3286_vm5 }
 0x783   :  { %v3653_v2 = vpop.f32.mrf.mxu2  ;;  %v3042_v24 = vsel %vm117_vm0, %v2968_v18, 0.0  ;;  %v7545_v7 = vpack.c.bf16 %v3536_v27, %v3535_v41  ;;  %v3472_v55 = vmul.f32 %v3278_v0, %v7287_v40  ;;  %v3471_v18 = vmul.f32 %v3268_v10, %v7175_v20 }
 0x784   :  { %2863 = vadd.xlane.f32.xlu2 %v2862_v23  ;;  %3043 = vadd.xlane.f32.xlu1 %v3042_v24  ;;  %v2855_v11 = vpop.xlane.xlu0 %2854  ;;  %v3654_v5 = vadd.f32 %v7460_v30, %v3653_v2  ;;  %v3282_v32 = vmul.f32 0.5, %v3281_v38  ;;  %v2874_v23 = vsel %vm117_vm0, %v7571_v60, 0.0  ;;  %v2780_v42 = vpop.f32.mrf.mxu0 }
 0x785   :  { %v2905_v25 = vmul.f32 %v2855_v11, %v5093_v1  ;;  %v3505_v2 = vmul.f32 %v7221_v54, %v3472_v55  ;;  %v3504_v24 = vmul.f32 %v7221_v54, %v3471_v18 }
 0x786   :  { %v3730_v43 = vmax.f32 %v3654_v5, 0.0  ;;  %v3283_v28 = vsub.f32 1.5, %v3282_v32 }
 0x787   :  { %v7533_v31 = vsub.f32 %v7339_v45, %v2905_v25  ;;  %v3538_v20 = vadd.f32 %v7236_v34, %v3505_v2  ;;  %v7583_v25 = vadd.f32 %v7279_v48, %v2780_v42  ;;  %v3537_v41 = vadd.f32 %v7236_v34, %v3504_v24 }
 0x788   :  { %v3284_v27 = vmul.f32 %v7524_v44, %v3283_v28 }
 0x789   :  { %v2969_v45 = vmul.f32 %v7533_v31, %v7533_v31  ;;  %v3567_v35 = vpack.c.bf16 %v3538_v20, %v3537_v41  ;;  %v2877_v0 = vsel %vm117_vm0, %v7583_v25, 0.0 }
 0x78b   :  { %v3655_v4 = vpop.f32.mrf.mxu2  ;;  %4370 = vmatmul.msk.bf16.gmra.mxu2 %vm117_vm0, %v7545_v7  ;;  %v3045_v8 = vsel %vm117_vm0, %v2969_v45, 0.0 }
 0x78c   :  { %v3656_v22 = vadd.f32 %v7460_v30, %v3655_v4  ;;  %2866 = vadd.xlane.f32.xlu2 %v2865_v9  ;;  %3046 = vadd.xlane.f32.xlu1 %v3045_v8  ;;  %v3026_v26 = vpop.xlane.xlu1 %3025  ;;  %v3288_v4 = vsel %vm3287_vm6, %v7524_v44, %v3284_v27 }
 0x78d   :  { %v3090_v63 = vmul.f32 %v3026_v26, %v5093_v1  ;;  %v3473_v38 = vmul.f32 %v3288_v4, %v7306_v12 }
 0x78e   :  { %v3731_v59 = vmax.f32 %v3656_v22, 0.0 }
 0x78f   :  { %v3122_v33 = vadd.f32 1e-05, %v3090_v63  ;;  %v3506_v12 = vmul.f32 %v7221_v54, %v3473_v38 }
 0x790   :  { %v3765_v53 = vpack.c.bf16 %v3731_v59, %v3730_v43 }
 0x791   :  { %4634 = vrsqrt.f32 %v3122_v33  ;;  %vm3295_vm8 = vweird.f32 %v3122_v33  ;;  %v3539_v24 = vadd.f32 %v7236_v34, %v3506_v12 }
 0x792   :  { %4390 = vmatmul.msk.bf16.gmra.mxu1 %vm117_vm0, %v3765_v53 }
 0x793   :  { %v3658_v40 = vpop.f32.mrf.mxu2 }
 0x794   :  { %2875 = vadd.xlane.f32.xlu1 %v2874_v23  ;;  %v7579_v11 = vpop.xlane.xlu1 %3028  ;;  %v3659_v62 = vadd.f32 %v7460_v30, %v3658_v40 }
 0x796   :  { %v3732_v10 = vmax.f32 %v3659_v62, 0.0 }
 0x797   :  { %v4635_v57 = vpop.eup %4634 }
 0x798   :  { %v3290_v50 = vmul.f32 %v4635_v57, %v3122_v33  ;;  %vm3296_vm7 = vweird.f32 %v4635_v57 }
 0x799   :  { %vm3297_vm9 = vmor %vm3295_vm8, %vm3296_vm7 }
 0x79a   :  { %v3291_v45 = vmul.f32 %v4635_v57, %v3290_v50 }
 0x79b   :  { %v3660_v36 = vpop.f32.mrf.mxu2  ;;  %4371 = vmatmul.msk.bf16.gmra.mxu2 %vm117_vm0, %v3567_v35 }
 0x79c   :  { %v3661_v5 = vadd.f32 %v7460_v30, %v3660_v36  ;;  %2878 = vadd.xlane.f32.xlu1 %v2877_v0  ;;  %v7594_v47 = vpop.xlane.xlu0 %3037  ;;  %v3292_v9 = vmul.f32 0.5, %v3291_v45  ;;  %v2858_v8 = vpop.xlane.xlu1 %2857 }
 0x79d   :  { %v2906_v37 = vmul.f32 %v2858_v8, %v5093_v1 }
 0x79e   :  { %v3733_v22 = vmax.f32 %v3661_v5, 0.0  ;;  %v3293_v55 = vsub.f32 1.5, %v3292_v9 }
 0x79f   :  { %v7600_v43 = vsub.f32 %v7382_v58, %v2906_v37  ;;  %v3610_v37 = vsel %vm117_vm0, %v3567_v35, 0  ;;  %v3604_v35 = vsel %vm117_vm0, %v7478_v56, 0  ;;  %v3094_v56 = vmul.f32 %v7594_v47, %v5093_v1 }
 0x7a0   :  { %v3766_v26 = vpack.c.bf16 %v3733_v22, %v3732_v10  ;;  %v3294_v59 = vmul.f32 %v4635_v57, %v3293_v55 }
 0x7a1   :  { %v2970_v44 = vmul.f32 %v7600_v43, %v7600_v43  ;;  %v7661_v12 = vadd.f32 1e-05, %v3094_v56 }
 0x7a2   :  { %4391 = vmatmul.msk.bf16.gmra.mxu1 %vm117_vm0, %v3766_v26  ;;  %v3298_v63 = vsel %vm3297_vm9, %v4635_v57, %v3294_v59  ;;  %v3607_v59 = vsel %vm117_vm0, %v7545_v7, 0  ;;  %v3595_v7 = vsel %vm117_vm0, %v7313_v61, 0 }
 0x7a3   :  { %v3474_v18 = vmul.f32 %v3298_v63, %v7352_v52  ;;  %v3663_v53 = vpop.f32.mrf.mxu2  ;;  %v3048_v32 = vsel %vm117_vm0, %v2970_v44, 0.0  ;;  %v3601_v44 = vsel %vm117_vm0, %v7370_v16, 0  ;;  %v3598_v63 = vsel %vm117_vm0, %v7342_v6, 0 }
 0x7a4   :  { %v7607_v2 = vpop.xlane.xlu0 %3040  ;;  %3049 = vadd.xlane.f32.xlu2 %v3048_v32  ;;  %v2861_v58 = vpop.xlane.xlu1 %2860  ;;  %v3664_v20 = vadd.f32 %v7460_v30, %v3663_v53  ;;  %v3592_v16 = vsel %vm117_vm0, %v7259_v19, 0  ;;  %vm3335_vm5 = vweird.f32 %v7661_v12 }
 0x7a5   :  { %v2907_v33 = vmul.f32 %v2861_v58, %v5093_v1  ;;  %v3507_v40 = vmul.f32 %v7221_v54, %v3474_v18  ;;  %v3095_v19 = vmul.f32 %v7607_v2, %v5093_v1 }
 0x7a6   :  { %v3734_v36 = vmax.f32 %v3664_v20, 0.0 }
 0x7a7   :  { %v7613_v23 = vsub.f32 %v7396_v17, %v2907_v33  ;;  %v3540_v52 = vadd.f32 %v7236_v34, %v3507_v40  ;;  %v2782_v17 = vpop.f32.mrf.mxu0 }
 0x7a8   :  { %v7629_v4 = vadd.f32 %v7279_v48, %v2782_v17 }
 0x7a9   :  { %v3568_v42 = vpack.c.bf16 %v3540_v52, %v3539_v24  ;;  %v2971_v28 = vmul.f32 %v7613_v23, %v7613_v23 }
 0x7aa   :  { %v2880_v22 = vsel %vm117_vm0, %v7629_v4, 0.0 }
 0x7ab   :  { %v3665_v41 = vpop.f32.mrf.mxu2  ;;  %4372 = vmatmul.msk.bf16.gmra.mxu2 %vm117_vm0, %v3568_v42  ;;  %v3051_v57 = vsel %vm117_vm0, %v2971_v28, 0.0  ;;  %v3613_v27 = vsel %vm117_vm0, %v3568_v42, 0 }
 0x7ac   :  { %v2870_v50 = vpop.xlane.xlu0 %2869  ;;  %v3666_v62 = vadd.f32 %v7460_v30, %v3665_v41  ;;  %3052 = vadd.xlane.f32.xlu2 %v3051_v57  ;;  %3968 = vmatpush.bf16.xpose.msra.mxu3 %v3613_v27  ;;  %v7672_v27 = vadd.f32 1e-05, %v3095_v19 }
 0x7ad   :  { %v2910_v45 = vmul.f32 %v2870_v50, %v5093_v1 }
 0x7ae   :  { %v3735_v0 = vmax.f32 %v3666_v62, 0.0 }
 0x7af   :  { %v7626_v5 = vsub.f32 %v7404_v49, %v2910_v45 }
 0x7b0   :  { %v3767_v9 = vpack.c.bf16 %v3735_v0, %v3734_v36 }
 0x7b1   :  { %v2974_v8 = vmul.f32 %v7626_v5, %v7626_v5 }
 0x7b2   :  { %4392 = vmatmul.msk.bf16.gmra.mxu1 %vm117_vm0, %v3767_v9 }
 0x7b3   :  { %v3060_v10 = vsel %vm117_vm0, %v2974_v8, 0.0 }
 0x7b4   :  { %3061 = vadd.xlane.f32.xlu1 %v3060_v10  ;;  %v2873_v55 = vpop.xlane.xlu0 %2872  ;;  %2881 = vadd.xlane.f32.xlu2 %v2880_v22 }
 0x7b5   :  { %3969 = vmatpush.bf16.xpose.msra.mxu3 %v3610_v37  ;;  %v2911_v48 = vmul.f32 %v2873_v55, %v5093_v1 }
 0x7b7   :  { %v7640_v49 = vsub.f32 %v7409_v46, %v2911_v48  ;;  %v3091_v46 = vmul.f32 %v7579_v11, %v5093_v1 }
 0x7b9   :  { %v2975_v38 = vmul.f32 %v7640_v49, %v7640_v49  ;;  %v3123_v18 = vadd.f32 1e-05, %v3091_v46 }
 0x7bb   :  { %v3063_v26 = vsel %vm117_vm0, %v2975_v38, 0.0  ;;  %4636 = vrsqrt.f32 %v3123_v18  ;;  %vm3305_vm11 = vweird.f32 %v3123_v18 }
 0x7bc   :  { %3064 = vadd.xlane.f32.xlu2 %v3063_v26  ;;  %4638 = vrsqrt.f32 %v7661_v12 }
 0x7bd   :  { %3970 = vmatpush.bf16.xpose.msra.mxu3 %v3607_v59 }
 0x7c1   :  { %v4637_v53 = vpop.eup %4636 }
 0x7c2   :  { %v3300_v32 = vmul.f32 %v4637_v53, %v3123_v18  ;;  %v7665_v40 = vpop.eup %4638  ;;  %vm3306_vm10 = vweird.f32 %v4637_v53 }
 0x7c3   :  { %v3330_v28 = vmul.f32 %v7665_v40, %v7661_v12  ;;  %vm3307_vm12 = vmor %vm3305_vm11, %vm3306_vm10  ;;  %vm3336_vm2 = vweird.f32 %v7665_v40  ;;  %vm3345_vm11 = vweird.f32 %v7672_v27 }
 0x7c4   :  { %v3301_v11 = vmul.f32 %v4637_v53, %v3300_v32  ;;  %vm3337_vm6 = vmor %vm3335_vm5, %vm3336_vm2 }
 0x7c5   :  { %3971 = vmatpush.bf16.xpose.msra.mxu3 %v3604_v35  ;;  %v3331_v17 = vmul.f32 %v7665_v40, %v3330_v28 }
 0x7c6   :  { %v3302_v61 = vmul.f32 0.5, %v3301_v11 }
 0x7c7   :  { %v3332_v37 = vmul.f32 0.5, %v3331_v17 }
 0x7c8   :  { %v3303_v24 = vsub.f32 1.5, %v3302_v61 }
 0x7c9   :  { %v3333_v46 = vsub.f32 1.5, %v3332_v37 }
 0x7ca   :  { %v3304_v41 = vmul.f32 %v4637_v53, %v3303_v24 }
 0x7cc   :  { %v3308_v62 = vsel %vm3307_vm12, %v4637_v53, %v3304_v41 }
 0x7cd   :  { %3972 = vmatpush.bf16.xpose.msra.mxu3 %v3601_v44  ;;  %v3475_v22 = vmul.f32 %v3308_v62, %v7366_v29 }
 0x7d5   :  { %3973 = vmatpush.bf16.xpose.msra.mxu3 %v3598_v63 }
 0x7dd   :  { %3974 = vmatpush.bf16.xpose.msra.mxu3 %v3595_v7 }
 0x7e5   :  { %3975 = vmatpush.bf16.xpose.msra.mxu3 %v3592_v16  ;;  %v7695_v16 = vld [vmem:[%s8088_s9 + $0x1] ss:$0 sm:$0xff] }
 0x7e7   :  { %v3032_v6 = vpop.xlane.xlu2 %3031 }
 0x7e8   :  { %v3092_v58 = vmul.f32 %v3032_v6, %v5093_v1 }
 0x7ea   :  { %v3124_v33 = vadd.f32 1e-05, %v3092_v58  ;;  %v3334_v58 = vmul.f32 %v7665_v40, %v3333_v46 }
 0x7ec   :  { %4640 = vrsqrt.f32 %v3124_v33  ;;  %vm3315_vm14 = vweird.f32 %v3124_v33  ;;  %v3338_v12 = vsel %vm3337_vm6, %v7665_v40, %v3334_v58 }
 0x7ef   :  { %v3035_v47 = vpop.xlane.xlu2 %3034 }
 0x7f0   :  { %v3093_v52 = vmul.f32 %v3035_v47, %v5093_v1 }
 0x7f2   :  { %v4641_v42 = vpop.eup %4640  ;;  %v3125_v20 = vadd.f32 1e-05, %v3093_v52 }
 0x7f3   :  { %v3310_v57 = vmul.f32 %v4641_v42, %v3124_v33  ;;  %vm3316_vm13 = vweird.f32 %v4641_v42 }
 0x7f4   :  { %4642 = vrsqrt.f32 %v3125_v20  ;;  %vm3317_vm15 = vmor %vm3315_vm14, %vm3316_vm13  ;;  %vm3325_vm4 = vweird.f32 %v3125_v20 }
 0x7f5   :  { %v3311_v50 = vmul.f32 %v4641_v42, %v3310_v57  ;;  %4644 = vrsqrt.f32 %v7672_v27 }
 0x7f7   :  { %v3312_v45 = vmul.f32 0.5, %v3311_v50  ;;  %v3044_v36 = vpop.xlane.xlu1 %3043  ;;  %v2864_v2 = vpop.xlane.xlu2 %2863 }
 0x7f8   :  { %v3096_v0 = vmul.f32 %v3044_v36, %v5093_v1  ;;  %v2908_v9 = vmul.f32 %v2864_v2, %v5093_v1 }
 0x7f9   :  { %v3313_v8 = vsub.f32 1.5, %v3312_v45 }
 0x7fa   :  { %v4643_v10 = vpop.eup %4642  ;;  %v7679_v55 = vadd.f32 1e-05, %v3096_v0  ;;  %v7682_v48 = vsub.f32 %v7507_v39, %v2908_v9  ;;  %v3508_v39 = vmul.f32 %v7221_v54, %v3475_v22  ;;  %v3478_v22 = vmul.f32 %v3338_v12, %v7379_v13 }
 0x7fb   :  { %v3314_v38 = vmul.f32 %v4641_v42, %v3313_v8  ;;  %v3320_v26 = vmul.f32 %v4643_v10, %v3125_v20  ;;  %v7690_v7 = vpop.eup %4644  ;;  %vm3326_vm3 = vweird.f32 %v4643_v10 }
 0x7fc   :  { %4646 = vrsqrt.f32 %v7679_v55  ;;  %v2972_v59 = vmul.f32 %v7682_v48, %v7682_v48  ;;  %v3340_v33 = vmul.f32 %v7690_v7, %v7672_v27  ;;  %v3541_v61 = vadd.f32 %v7236_v34, %v3508_v39  ;;  %vm3327_vm1 = vmor %vm3325_vm4, %vm3326_vm3 }
 0x7fd   :  { %v3318_v35 = vsel %vm3317_vm15, %v4641_v42, %v3314_v38  ;;  %v3321_v44 = vmul.f32 %v4643_v10, %v3320_v26  ;;  %v3511_v13 = vmul.f32 %v7695_v16, %v3478_v22  ;;  %vm3346_vm8 = vweird.f32 %v7690_v7 }
 0x7fe   :  { %v3476_v29 = vmul.f32 %v3318_v35, %v7441_v14  ;;  %v3668_v63 = vpop.f32.mrf.mxu2  ;;  %v3054_v18 = vsel %vm117_vm0, %v2972_v59, 0.0  ;;  %v3341_v50 = vmul.f32 %v7690_v7, %v3340_v33  ;;  %vm3355_vm9 = vweird.f32 %v7679_v55  ;;  %vm3347_vm12 = vmor %vm3345_vm11, %vm3346_vm8 }
 0x7ff   :  { %v3322_v53 = vmul.f32 0.5, %v3321_v44  ;;  %v3047_v56 = vpop.xlane.xlu1 %3046  ;;  %3055 = vadd.xlane.f32.xlu0 %v3054_v18  ;;  %v2867_v32 = vpop.xlane.xlu2 %2866 }
 0x800   :  { %v3509_v11 = vmul.f32 %v7695_v16, %v3476_v29  ;;  %v2909_v6 = vmul.f32 %v2867_v32, %v5093_v1  ;;  %v3097_v42 = vmul.f32 %v3047_v56, %v5093_v1  ;;  %v3342_v37 = vmul.f32 0.5, %v3341_v50 }
 0x801   :  { %v3323_v14 = vsub.f32 1.5, %v3322_v53 }
 0x802   :  { %v7700_v54 = vpop.eup %4646  ;;  %v3542_v24 = vadd.f32 %v7236_v34, %v3509_v11  ;;  %v7710_v19 = vsub.f32 %v7530_v3, %v2909_v6  ;;  %v3669_v34 = vadd.f32 %v7460_v30, %v3668_v63  ;;  %v7729_v2 = vadd.f32 1e-05, %v3097_v42  ;;  %v7747_v63 = vld [vmem:[%s8088_s9 + $0x2] ss:$0 sm:$0xff] }
 0x803   :  { %v3324_v47 = vmul.f32 %v4643_v10, %v3323_v14  ;;  %v3350_v52 = vmul.f32 %v7700_v54, %v7679_v55  ;;  %v3343_v46 = vsub.f32 1.5, %v3342_v37  ;;  %vm3356_vm7 = vweird.f32 %v7700_v54 }
 0x804   :  { %v7714_v28 = vpack.c.bf16 %v3542_v24, %v3541_v61  ;;  %v2973_v20 = vmul.f32 %v7710_v19, %v7710_v19  ;;  %v3736_v8 = vmax.f32 %v3669_v34, 0.0  ;;  %4648 = vrsqrt.f32 %v7729_v2  ;;  %vm3357_vm10 = vmor %vm3355_vm9, %vm3356_vm7 }
 0x805   :  { %v3328_v41 = vsel %vm3327_vm1, %v4643_v10, %v3324_v47  ;;  %v3351_v57 = vmul.f32 %v7700_v54, %v3350_v52  ;;  %v3544_v32 = vadd.f32 %v7747_v63, %v3511_v13  ;;  %v3344_v11 = vmul.f32 %v7690_v7, %v3343_v46 }
 0x806   :  { %v3670_v3 = vpop.f32.mrf.mxu2  ;;  %4373 = vmatmul.msk.bf16.gmra.mxu2 %vm117_vm0, %v7714_v28  ;;  %v3057_v45 = vsel %vm117_vm0, %v2973_v20, 0.0  ;;  %v3477_v36 = vmul.f32 %v3328_v41, %v7467_v51  ;;  %vm3365_vm14 = vweird.f32 %v7729_v2 }
 0x807   :  { %v3671_v17 = vadd.f32 %v7460_v30, %v3670_v3  ;;  %v2876_v62 = vpop.xlane.xlu1 %2875  ;;  %3058 = vadd.xlane.f32.xlu0 %v3057_v45  ;;  %v3352_v9 = vmul.f32 0.5, %v3351_v57  ;;  %v3348_v24 = vsel %vm3347_vm12, %v7690_v7, %v3344_v11 }
 0x808   :  { %v2912_v0 = vmul.f32 %v2876_v62, %v5093_v1  ;;  %v3510_v26 = vmul.f32 %v7695_v16, %v3477_v36  ;;  %v3479_v34 = vmul.f32 %v3348_v24, %v7393_v15 }
 0x809   :  { %v3737_v10 = vmax.f32 %v3671_v17, 0.0  ;;  %v3353_v59 = vsub.f32 1.5, %v3352_v9 }
 0x80a   :  { %v7734_v40 = vsub.f32 %v7571_v60, %v2912_v0  ;;  %v3543_v18 = vadd.f32 %v7747_v63, %v3510_v26  ;;  %v4649_v53 = vpop.eup %4648  ;;  %v3512_v17 = vmul.f32 %v7695_v16, %v3479_v34 }
 0x80b   :  { %v3768_v38 = vpack.c.bf16 %v3737_v10, %v3736_v8  ;;  %v3354_v39 = vmul.f32 %v7700_v54, %v3353_v59  ;;  %vm3366_vm13 = vweird.f32 %v4649_v53 }
 0x80c   :  { %v2976_v51 = vmul.f32 %v7734_v40, %v7734_v40  ;;  %v7759_v14 = vpack.c.bf16 %v3544_v32, %v3543_v18  ;;  %v3545_v36 = vadd.f32 %v7747_v63, %v3512_v17  ;;  %vm3367_vm15 = vmor %vm3365_vm14, %vm3366_vm13 }
 0x80d   :  { %4393 = vmatmul.msk.bf16.gmra.mxu1 %vm117_vm0, %v3768_v38  ;;  %v3358_v58 = vsel %vm3357_vm10, %v7700_v54, %v3354_v39 }
 0x80e   :  { %v3673_v35 = vpop.f32.mrf.mxu2  ;;  %v3066_v44 = vsel %vm117_vm0, %v2976_v51, 0.0  ;;  %v3480_v27 = vmul.f32 %v3358_v58, %v7511_v21 }
 0x80f   :  { %v2879_v60 = vpop.xlane.xlu1 %2878  ;;  %3067 = vadd.xlane.f32.xlu0 %v3066_v44  ;;  %v3674_v33 = vadd.f32 %v7460_v30, %v3673_v35 }
 0x810   :  { %v2913_v29 = vmul.f32 %v2879_v60, %v5093_v1  ;;  %v3513_v12 = vmul.f32 %v7695_v16, %v3480_v27  ;;  %v7807_v27 = vpop.f32.mrf.mxu1 }
 0x811   :  { %v3738_v42 = vmax.f32 %v3674_v33, 0.0 }
 0x812   :  { %v7753_v56 = vsub.f32 %v7583_v25, %v2913_v29  ;;  %v3360_v25 = vmul.f32 %v4649_v53, %v7729_v2  ;;  %v3546_v62 = vadd.f32 %v7747_v63, %v3513_v12 }
 0x814   :  { %v2977_v6 = vmul.f32 %v7753_v56, %v7753_v56  ;;  %v3361_v54 = vmul.f32 %v4649_v53, %v3360_v25  ;;  %v7780_v15 = vpack.c.bf16 %v3546_v62, %v3545_v36 }
 0x816   :  { %v3675_v61 = vpop.f32.mrf.mxu2  ;;  %4374 = vmatmul.msk.bf16.gmra.mxu2 %vm117_vm0, %v7759_v14  ;;  %v3069_v55 = vsel %vm117_vm0, %v2977_v6, 0.0  ;;  %v3362_v50 = vmul.f32 0.5, %v3361_v54 }
 0x817   :  { %v3676_v47 = vadd.f32 %v7460_v30, %v3675_v61  ;;  %3070 = vadd.xlane.f32.xlu1 %v3069_v55  ;;  %v3050_v52 = vpop.xlane.xlu2 %3049 }
 0x818   :  { %v3098_v57 = vmul.f32 %v3050_v52, %v5093_v1  ;;  %v3363_v45 = vsub.f32 1.5, %v3362_v50  ;;  %v7810_v54 = vpop.f32.mrf.mxu1 }
 0x819   :  { %v3739_v41 = vmax.f32 %v3676_v47, 0.0 }
 0x81a   :  { %v3130_v3 = vadd.f32 1e-05, %v3098_v57  ;;  %v3364_v8 = vmul.f32 %v4649_v53, %v3363_v45 }
 0x81b   :  { %v3769_v20 = vpack.c.bf16 %v3739_v41, %v3738_v42 }
 0x81c   :  { %4650 = vrsqrt.f32 %v3130_v3  ;;  %v3368_v59 = vsel %vm3367_vm15, %v4649_v53, %v3364_v8  ;;  %vm3375_vm3 = vweird.f32 %v3130_v3 }
 0x81d   :  { %4394 = vmatmul.msk.bf16.gmra.mxu1 %vm117_vm0, %v3769_v20  ;;  %v3481_v18 = vmul.f32 %v3368_v59, %v7533_v31 }
 0x81e   :  { %v3678_v7 = vpop.f32.mrf.mxu2 }
 0x81f   :  { %v3053_v21 = vpop.xlane.xlu2 %3052  ;;  %v3679_v10 = vadd.f32 %v7460_v30, %v3678_v7 }
 0x820   :  { %v7812_v42 = vpop.f32.mrf.mxu1  ;;  %v3099_v57 = vmul.f32 %v3053_v21, %v5093_v1 }
 0x821   :  { %v3740_v35 = vmax.f32 %v3679_v10, 0.0 }
 0x822   :  { %v4651_v0 = vpop.eup %4650  ;;  %v3131_v34 = vadd.f32 1e-05, %v3099_v57 }
 0x823   :  { %v3370_v9 = vmul.f32 %v4651_v0, %v3130_v3  ;;  %vm3376_vm2 = vweird.f32 %v4651_v0 }
 0x824   :  { %vm3377_vm4 = vmor %vm3375_vm3, %vm3376_vm2  ;;  %4652 = vrsqrt.f32 %v3131_v34  ;;  %vm3385_vm1 = vweird.f32 %v3131_v34 }
 0x825   :  { %v3371_v22 = vmul.f32 %v4651_v0, %v3370_v9 }
 0x826   :  { %v3680_v37 = vpop.f32.mrf.mxu2  ;;  %4375 = vmatmul.msk.bf16.gmra.mxu2 %vm117_vm0, %v7780_v15 }
 0x827   :  { %v3681_v38 = vadd.f32 %v7460_v30, %v3680_v37  ;;  %v3372_v51 = vmul.f32 0.5, %v3371_v22  ;;  %v2882_v26 = vpop.xlane.xlu2 %2881  ;;  %v3062_v3 = vpop.xlane.xlu1 %3061 }
 0x828   :  { %v2914_v13 = vmul.f32 %v2882_v26, %v5093_v1  ;;  %v7814_v41 = vpop.f32.mrf.mxu1  ;;  %v3102_v50 = vmul.f32 %v3062_v3, %v5093_v1 }
 0x829   :  { %v3741_v44 = vmax.f32 %v3681_v38, 0.0  ;;  %v3373_v46 = vsub.f32 1.5, %v3372_v51 }
 0x82a   :  { %v7789_v29 = vsub.f32 %v7629_v4, %v2914_v13  ;;  %v3514_v4 = vmul.f32 %v7695_v16, %v3481_v18  ;;  %v4653_v12 = vpop.eup %4652  ;;  %v7822_v62 = vadd.f32 1e-05, %v3102_v50 }
 0x82b   :  { %v3770_v60 = vpack.c.bf16 %v3741_v44, %v3740_v35  ;;  %v3374_v39 = vmul.f32 %v4651_v0, %v3373_v46  ;;  %v3380_v7 = vmul.f32 %v4653_v12, %v3131_v34  ;;  %vm3386_vm5 = vweird.f32 %v4653_v12 }
 0x82c   :  { %v2978_v2 = vmul.f32 %v7789_v29, %v7789_v29  ;;  %v3547_v31 = vadd.f32 %v7747_v63, %v3514_v4  ;;  %4654 = vrsqrt.f32 %v7822_v62  ;;  %vm3387_vm6 = vmor %vm3385_vm1, %vm3386_vm5  ;;  %vm3415_vm14 = vweird.f32 %v7822_v62 }
 0x82d   :  { %4395 = vmatmul.msk.bf16.gmra.mxu1 %vm117_vm0, %v3770_v60  ;;  %v3378_v53 = vsel %vm3377_vm4, %v4651_v0, %v3374_v39  ;;  %v3381_v45 = vmul.f32 %v4653_v12, %v3380_v7 }
 0x82e   :  { %v3482_v32 = vmul.f32 %v3378_v53, %v7600_v43  ;;  %v3683_v11 = vpop.f32.mrf.mxu2  ;;  %v3072_v6 = vsel %vm117_vm0, %v2978_v2, 0.0 }
 0x82f   :  { %3073 = vadd.xlane.f32.xlu2 %v3072_v6  ;;  %v3684_v33 = vadd.f32 %v7460_v30, %v3683_v11  ;;  %v3382_v9 = vmul.f32 0.5, %v3381_v45  ;;  %v3065_v22 = vpop.xlane.xlu2 %3064 }
 0x830   :  { %v3515_v58 = vmul.f32 %v7695_v16, %v3482_v32  ;;  %v7817_v20 = vpop.f32.mrf.mxu1  ;;  %v3103_v59 = vmul.f32 %v3065_v22, %v5093_v1  ;;  %v7860_v22 = vld [vmem:[%s8088_s9 + $0x4] ss:$0 sm:$0xff] }
 0x831   :  { %v3742_v43 = vmax.f32 %v3684_v33, 0.0  ;;  %v3383_v10 = vsub.f32 1.5, %v3382_v9 }
 0x832   :  { %v3548_v25 = vadd.f32 %v7747_v63, %v3515_v58  ;;  %v7828_v37 = vpop.eup %4654  ;;  %v7834_v18 = vadd.f32 1e-05, %v3103_v59 }
 0x833   :  { %v3384_v35 = vmul.f32 %v4653_v12, %v3383_v10  ;;  %v3410_v44 = vmul.f32 %v7828_v37, %v7822_v62  ;;  %vm3416_vm11 = vweird.f32 %v7828_v37 }
 0x834   :  { %v7802_v61 = vpack.c.bf16 %v3548_v25, %v3547_v31  ;;  %vm3417_vm15 = vmor %vm3415_vm14, %vm3416_vm11  ;;  %vm3425_vm1 = vweird.f32 %v7834_v18 }
 0x835   :  { %v3388_v39 = vsel %vm3387_vm6, %v4653_v12, %v3384_v35  ;;  %v3411_v2 = vmul.f32 %v7828_v37, %v3410_v44 }
 0x836   :  { %v3685_v55 = vpop.f32.mrf.mxu2  ;;  %4376 = vmatmul.msk.bf16.gmra.mxu2 %vm117_vm0, %v7802_v61  ;;  %v3483_v58 = vmul.f32 %v3388_v39, %v7613_v23 }
 0x837   :  { %v3686_v24 = vadd.f32 %v7460_v30, %v3685_v55  ;;  %v3412_v25 = vmul.f32 0.5, %v3411_v2 }
 0x838   :  { %v7820_v17 = vpop.f32.mrf.mxu1  ;;  %v3516_v23 = vmul.f32 %v7695_v16, %v3483_v58 }
 0x839   :  { %v3743_v47 = vmax.f32 %v3686_v24, 0.0  ;;  %v3413_v34 = vsub.f32 1.5, %v3412_v25 }
 0x83a   :  { %v3549_v10 = vadd.f32 %v7747_v63, %v3516_v23 }
 0x83b   :  { %v3771_v52 = vpack.c.bf16 %v3743_v47, %v3742_v43 }
 0x83d   :  { %4396 = vmatmul.msk.bf16.gmra.mxu1 %vm117_vm0, %v3771_v52 }
 0x840   :  { %v7826_v8 = vpop.f32.mrf.mxu1 }
 0x848   :  { %v7837_v53 = vpop.f32.mrf.mxu1 }
 0x872   :  { %v3056_v36 = vpop.xlane.xlu0 %3055 }
 0x873   :  { %v3100_v0 = vmul.f32 %v3056_v36, %v5093_v1 }
 0x875   :  { %v3132_v21 = vadd.f32 1e-05, %v3100_v0 }
 0x877   :  { %4656 = vrsqrt.f32 %v3132_v21  ;;  %vm3395_vm8 = vweird.f32 %v3132_v21 }
 0x87a   :  { %v3059_v38 = vpop.xlane.xlu0 %3058 }
 0x87b   :  { %v3101_v51 = vmul.f32 %v3059_v38, %v5093_v1 }
 0x87d   :  { %v4657_v26 = vpop.eup %4656  ;;  %v3133_v46 = vadd.f32 1e-05, %v3101_v51 }
 0x87e   :  { %v3390_v13 = vmul.f32 %v4657_v26, %v3132_v21  ;;  %vm3396_vm7 = vweird.f32 %v4657_v26 }
 0x87f   :  { %4658 = vrsqrt.f32 %v3133_v46  ;;  %vm3397_vm9 = vmor %vm3395_vm8, %vm3396_vm7  ;;  %vm3405_vm12 = vweird.f32 %v3133_v46 }
 0x880   :  { %v3391_v60 = vmul.f32 %v4657_v26, %v3390_v13  ;;  %4660 = vrsqrt.f32 %v7834_v18 }
 0x882   :  { %v3392_v32 = vmul.f32 0.5, %v3391_v60  ;;  %v3068_v11 = vpop.xlane.xlu0 %3067 }
 0x883   :  { %v3104_v4 = vmul.f32 %v3068_v11, %v5093_v1 }
 0x884   :  { %v3393_v6 = vsub.f32 1.5, %v3392_v32 }
 0x885   :  { %v4659_v31 = vpop.eup %4658  ;;  %v7842_v55 = vadd.f32 1e-05, %v3104_v4 }
 0x886   :  { %v3394_v33 = vmul.f32 %v4657_v26, %v3393_v6  ;;  %v3400_v24 = vmul.f32 %v4659_v31, %v3133_v46  ;;  %v7847_v12 = vpop.eup %4660  ;;  %vm3406_vm10 = vweird.f32 %v4659_v31 }
 0x887   :  { %4662 = vrsqrt.f32 %v7842_v55  ;;  %v3420_v38 = vmul.f32 %v7847_v12, %v7834_v18  ;;  %vm7866_vm13 = vmor %vm3405_vm12, %vm3406_vm10  ;;  %vm3426_vm3 = vweird.f32 %v7847_v12  ;;  %vm3435_vm4 = vweird.f32 %v7842_v55 }
 0x888   :  { %v3398_v43 = vsel %vm3397_vm9, %v4657_v26, %v3394_v33  ;;  %v3401_v52 = vmul.f32 %v4659_v31, %v3400_v24  ;;  %vm3427_vm6 = vmor %vm3425_vm1, %vm3426_vm3 }
 0x889   :  { %v3484_v47 = vmul.f32 %v3398_v43, %v7682_v48  ;;  %v3688_v57 = vpop.f32.mrf.mxu2  ;;  %v3414_v48 = vmul.f32 %v7828_v37, %v3413_v34  ;;  %v3421_v6 = vmul.f32 %v7847_v12, %v3420_v38 }
 0x88a   :  { %v3871_v3 = vpop.f32.mrf.mxu1  ;;  %v3402_v50 = vmul.f32 0.5, %v3401_v52  ;;  %v3071_v7 = vpop.xlane.xlu1 %3070  ;;  %v3689_v35 = vadd.f32 %v7460_v30, %v3688_v57 }
 0x88b   :  { %v3517_v45 = vmul.f32 %v7695_v16, %v3484_v47  ;;  %v3105_v9 = vmul.f32 %v3071_v7, %v5093_v1  ;;  %v3872_v46 = vadd.f32 %v7860_v22, %v3871_v3  ;;  %v3418_v62 = vsel %vm3417_vm15, %v7828_v37, %v3414_v48 }
 0x88c   :  { %v3403_v36 = vsub.f32 1.5, %v3402_v50  ;;  %v3486_v47 = vmul.f32 %v3418_v62, %v7626_v5  ;;  %v3422_v52 = vmul.f32 0.5, %v3421_v6 }
 0x88d   :  { %v3550_v0 = vadd.f32 %v7747_v63, %v3517_v45  ;;  %v7851_v21 = vpop.eup %4662  ;;  %v7880_v2 = vadd.f32 1e-05, %v3105_v9  ;;  %v3939_v24 = vmax.f32 %v3872_v46, 0.0  ;;  %v7909_v9 = vld [vmem:[%s8088_s9 + $0x3] ss:$0 sm:$0xff]  ;;  %s4743_s9 = smov 4  }
 0x88e   :  { %v3404_v51 = vmul.f32 %v4659_v31, %v3403_v36  ;;  %v3430_v26 = vmul.f32 %v7851_v21, %v7842_v55  ;;  %v3519_v23 = vmul.f32 %v7695_v16, %v3486_v47  ;;  %v3423_v50 = vsub.f32 1.5, %v3422_v52 }
 0x88f   :  { %v7871_v44 = vpack.c.bf16 %v3550_v0, %v3549_v10  ;;  %4664 = vrsqrt.f32 %v7880_v2  ;;  %vm3436_vm2 = vweird.f32 %v7851_v21  ;;  %vm3445_vm8 = vweird.f32 %v7880_v2 }
 0x890   :  { %v3408_v13 = vsel %vm7866_vm13, %v4659_v31, %v3404_v51  ;;  %v3431_v60 = vmul.f32 %v7851_v21, %v3430_v26  ;;  %v3744_v31 = vmax.f32 %v3689_v35, 0.0  ;;  %v3552_v36 = vadd.f32 %v7747_v63, %v3519_v23  ;;  %vm3437_vm5 = vmor %vm3435_vm4, %vm3436_vm2 }
 0x891   :  { %v3690_v39 = vpop.f32.mrf.mxu2  ;;  %4377 = vmatmul.msk.bf16.gmra.mxu2 %vm117_vm0, %v7871_v44  ;;  %v3485_v58 = vmul.f32 %v3408_v13, %v7710_v19  ;;  %v3424_v0 = vmul.f32 %v7847_v12, %v3423_v50 }
 0x892   :  { %v3691_v32 = vadd.f32 %v7460_v30, %v3690_v39  ;;  %v3873_v11 = vpop.f32.mrf.mxu1  ;;  %v3432_v33 = vmul.f32 0.5, %v3431_v60 }
 0x893   :  { %v3874_v4 = vadd.f32 %v7860_v22, %v3873_v11  ;;  %v3518_v37 = vmul.f32 %v7695_v16, %v3485_v58  ;;  %v3428_v35 = vsel %vm3427_vm6, %v7847_v12, %v3424_v0 }
 0x894   :  { %v3745_v25 = vmax.f32 %v3691_v32, 0.0  ;;  %v3433_v34 = vsub.f32 1.5, %v3432_v33 }
 0x895   :  { %v3940_v43 = vmax.f32 %v3874_v4, 0.0  ;;  %v4665_v7 = vpop.eup %4664  ;;  %v3551_v5 = vadd.f32 %v7747_v63, %v3518_v37 }
 0x896   :  { %v3772_v30 = vpack.c.bf16 %v3745_v25, %v3744_v31  ;;  %v3434_v45 = vmul.f32 %v7851_v21, %v3433_v34  ;;  %v3440_v48 = vmul.f32 %v4665_v7, %v7880_v2  ;;  %vm3446_vm7 = vweird.f32 %v4665_v7 }
 0x897   :  { %v7891_v57 = vpack.c.bf16 %v3940_v43, %v3939_v24  ;;  %v7912_v38 = vpack.c.bf16 %v3552_v36, %v3551_v5  ;;  %vm3447_vm9 = vmor %vm3445_vm8, %vm3446_vm7 }
 0x898   :  { %4397 = vmatmul.msk.bf16.gmra.mxu1 %vm117_vm0, %v3772_v30  ;;  %v3438_v51 = vsel %vm3437_vm5, %v7851_v21, %v3434_v45  ;;  %v3441_v13 = vmul.f32 %v4665_v7, %v3440_v48  ;;  %v3487_v21 = vmul.f32 %v3428_v35, %v7640_v49 }
 0x899   :  { %v3693_v3 = vpop.f32.mrf.mxu2  ;;  %v3488_v46 = vmul.f32 %v3438_v51, %v7734_v40 }
 0x89a   :  { %v7895_v19 = vpop.f32.mrf.mxu1  ;;  %v3694_v10 = vadd.f32 %v7909_v9, %v3693_v3  ;;  %v3442_v6 = vmul.f32 0.5, %v3441_v13  ;;  %v3520_v31 = vmul.f32 %v7695_v16, %v3487_v21 }
 0x89b   :  { %v3521_v4 = vmul.f32 %v7695_v16, %v3488_v46 }
 0x89c   :  { %v3746_v39 = vmax.f32 %v3694_v10, 0.0  ;;  %v3443_v25 = vsub.f32 1.5, %v3442_v6 }
 0x89d   :  { %v3554_v40 = vadd.f32 %v7747_v63, %v3521_v4 }
 0x89e   :  { %v3444_v24 = vmul.f32 %v4665_v7, %v3443_v25 }
 0x8a0   :  { %v3448_v3 = vsel %vm3447_vm9, %v4665_v7, %v3444_v24  ;;  %v3877_v24 = vadd.f32 %v7860_v22, %v7895_v19  ;;  %v3963_v19 = vld [vmem:[%s8082_s3] sm:$0x1] }
 0x8a1   :  { %v3695_v26 = vpop.f32.mrf.mxu2  ;;  %4378 = vmatmul.msk.bf16.gmra.mxu2 %vm117_vm0, %v7912_v38  ;;  %v3489_v36 = vmul.f32 %v3448_v3, %v7753_v56  ;;  %v4039_v3 = vsel %vm117_vm0, %v7891_v57, 0 }
 0x8a2   :  { %v3696_v55 = vadd.f32 %v7909_v9, %v3695_v26  ;;  %v7919_v59 = vpop.f32.mrf.mxu1  ;;  %v3074_v60 = vpop.xlane.xlu2 %3073 }
 0x8a3   :  { %v3106_v18 = vmul.f32 %v3074_v60, %v5093_v1  ;;  %v3553_v1 = vadd.f32 %v7747_v63, %v3520_v31  ;;  %v3522_v51 = vmul.f32 %v7695_v16, %v3489_v36 }
 0x8a4   :  { %v3747_v32 = vmax.f32 %v3696_v55, 0.0 }
 0x8a5   :  { %v3138_v62 = vadd.f32 1e-05, %v3106_v18  ;;  %v7931_v47 = vpack.c.bf16 %v3554_v40, %v3553_v1  ;;  %v3555_v35 = vadd.f32 %v7747_v63, %v3522_v51 }
 0x8a6   :  { %v3773_v11 = vpack.c.bf16 %v3747_v32, %v3746_v39 }
 0x8a7   :  { %4666 = vrsqrt.f32 %v3138_v62  ;;  %vm3455_vm11 = vweird.f32 %v3138_v62 }
 0x8a8   :  { %4398 = vmatmul.msk.bf16.gmra.mxu1 %vm117_vm0, %v3773_v11 }
 0x8a9   :  { %v3698_v58 = vpop.f32.mrf.mxu2 }
 0x8aa   :  { %v3881_v12 = vpop.f32.mrf.mxu1  ;;  %v3699_v43 = vadd.f32 %v7909_v9, %v3698_v58 }
 0x8ab   :  { %v3882_v6 = vadd.f32 %v7860_v22, %v3881_v12  ;;  %v3941_v12 = vmax.f32 %v3877_v24, 0.0 }
 0x8ac   :  { %v3748_v50 = vmax.f32 %v3699_v43, 0.0 }
 0x8ad   :  { %v4667_v33 = vpop.eup %4666  ;;  %v3943_v40 = vmax.f32 %v3882_v6, 0.0 }
 0x8ae   :  { %v3450_v49 = vmul.f32 %v4667_v33, %v3138_v62  ;;  %vm3456_vm10 = vweird.f32 %v4667_v33 }
 0x8af   :  { %vm3457_vm12 = vmor %vm3455_vm11, %vm3456_vm10 }
 0x8b0   :  { %v3451_v30 = vmul.f32 %v4667_v33, %v3450_v49 }
 0x8b1   :  { %v3700_v52 = vpop.f32.mrf.mxu2  ;;  %4379 = vmatmul.msk.bf16.gmra.mxu2 %vm117_vm0, %v7931_v47 }
 0x8b2   :  { %v3701_v37 = vadd.f32 %v7909_v9, %v3700_v52  ;;  %v3883_v34 = vpop.f32.mrf.mxu1  ;;  %v3452_v23 = vmul.f32 0.5, %v3451_v30 }
 0x8b4   :  { %v3749_v5 = vmax.f32 %v3701_v37, 0.0  ;;  %v3453_v45 = vsub.f32 1.5, %v3452_v23  ;;  %v3869_v37 = vadd.f32 %v7860_v22, %v7837_v53 }
 0x8b6   :  { %v3774_v0 = vpack.c.bf16 %v3749_v5, %v3748_v50  ;;  %v3454_v48 = vmul.f32 %v4667_v33, %v3453_v45  ;;  %v3964_v50 = vpack.c.bf16 %v3963_v19, %v3963_v19  ;;  %v3864_v5 = vadd.f32 %v7860_v22, %v7820_v17  ;;  %v4447_v19 = vld [vmem:[%s8091_s12] sm:$0xff] }
 0x8b7   :  { %4111 = vxpose.xlu1.c.b16.start [1/2] (short) (narrow) %v4447_v19, 16 }
 0x8b8   :  { %4399 = vmatmul.msk.bf16.gmra.mxu1 %vm117_vm0, %v3774_v0  ;;  %v3458_v2 = vsel %vm3457_vm12, %v4667_v33, %v3454_v48  ;;  %v3879_v33 = vadd.f32 %v7860_v22, %v7919_v59  ;;  %v3938_v59 = vmax.f32 %v3869_v37, 0.0  ;;  %4405 = vmatmul.msk.bf16.vlgmr.msra.gmra.mxu3 %vm117_vm0, %v3964_v50  ;;  %v3936_v53 = vmax.f32 %v3864_v5, 0.0 }
 0x8b9   :  { %v3490_v10 = vmul.f32 %v3458_v2, %v7789_v29  ;;  %v3703_v26 = vpop.f32.mrf.mxu2  ;;  %v3859_v0 = vadd.f32 %v7860_v22, %v7814_v41  ;;  %v3857_v2 = vadd.f32 %v7860_v22, %v7812_v42  ;;  %v3616_v5 = vsel %vm117_vm0, %v7714_v28, 0  ;;  %v4448_v28 = vld [vmem:[%s8091_s12 + $0x8] sm:$0xff] }
 0x8ba   :  { %v3886_v7 = vpop.f32.mrf.mxu1  ;;  %v3704_v60 = vadd.f32 %v7909_v9, %v3703_v26  ;;  %v3942_v49 = vmax.f32 %v3879_v33, 0.0  ;;  %v3622_v33 = vsel %vm117_vm0, %v7780_v15, 0  ;;  %v3619_v15 = vsel %vm117_vm0, %v7759_v14, 0 }
 0x8bb   :  { %v3523_v55 = vmul.f32 %v7695_v16, %v3490_v10  ;;  %v3887_v46 = vadd.f32 %v7860_v22, %v3886_v7  ;;  %v3884_v16 = vadd.f32 %v7860_v22, %v3883_v34  ;;  %v3867_v34 = vadd.f32 %v7860_v22, %v7826_v8 }
 0x8bc   :  { %v3750_v21 = vmax.f32 %v3704_v60, 0.0  ;;  %v3991_v30 = vpack.c.bf16 %v3942_v49, %v3941_v12  ;;  %v3862_v8 = vadd.f32 %v7860_v22, %v7817_v20  ;;  %v3934_v10 = vmax.f32 %v3859_v0, 0.0 }
 0x8bd   :  { %v3556_v13 = vadd.f32 %v7747_v63, %v3523_v55  ;;  %v3945_v11 = vmax.f32 %v3887_v46, 0.0  ;;  %v3944_v31 = vmax.f32 %v3884_v16, 0.0  ;;  %v3937_v23 = vmax.f32 %v3867_v34, 0.0 }
 0x8be   :  { %v4042_v52 = vsel %vm117_vm0, %v3991_v30, 0  ;;  %v3935_v57 = vmax.f32 %v3862_v8, 0.0  ;;  %v3933_v51 = vmax.f32 %v3857_v2, 0.0  ;;  %v3854_v20 = vadd.f32 %v7860_v22, %v7810_v54  ;;  %v4445_v54 = vld [vmem:[%s8091_s12] sm:$0xff] }
 0x8bf   :  { %v7944_v56 = vpack.c.bf16 %v3556_v13, %v3555_v35  ;;  %v3992_v1 = vpack.c.bf16 %v3944_v31, %v3943_v40  ;;  %v3989_v45 = vpack.c.bf16 %v3938_v59, %v3937_v23  ;;  %v3852_v7 = vadd.f32 %v7860_v22, %v7807_v27  ;;  %4007 = vxpose.xlu0.c.b16.start [1/2] (short) (narrow) %v4445_v54, 16 }
 0x8c0   :  { %v3988_v48 = vpack.c.bf16 %v3936_v53, %v3935_v57  ;;  %v3987_v26 = vpack.c.bf16 %v3934_v10, %v3933_v51  ;;  %v3932_v55 = vmax.f32 %v3854_v20, 0.0  ;;  %v3634_v27 = vsel %vm117_vm0, %v7931_v47, 0 }
 0x8c1   :  { %4380 = vmatmul.msk.bf16.gmra.mxu2 %vm117_vm0, %v7944_v56  ;;  %v3705_v29 = vpop.f32.mrf.mxu2  ;;  %v4045_v43 = vsel %vm117_vm0, %v3992_v1, 0  ;;  %v4036_v36 = vsel %vm117_vm0, %v3989_v45, 0  ;;  %v3931_v41 = vmax.f32 %v3852_v7, 0.0  ;;  %v3637_v60 = vsel %vm117_vm0, %v7944_v56, 0  ;;  %v4446_v56 = vld [vmem:[%s8091_s12 + $0x8] sm:$0xff] }
 0x8c2   :  { %v3888_v39 = vpop.f32.mrf.mxu1  ;;  %v3706_v32 = vadd.f32 %v7909_v9, %v3705_v29  ;;  %v4033_v17 = vsel %vm117_vm0, %v3988_v48, 0  ;;  %v4030_v35 = vsel %vm117_vm0, %v3987_v26, 0  ;;  %v3631_v46 = vsel %vm117_vm0, %v7912_v38, 0 }
 0x8c3   :  { %v3889_v18 = vadd.f32 %v7860_v22, %v3888_v39  ;;  %v3986_v13 = vpack.c.bf16 %v3932_v55, %v3931_v41 }
 0x8c4   :  { %v3751_v63 = vmax.f32 %v3706_v32, 0.0  ;;  %v3628_v32 = vsel %vm117_vm0, %v7871_v44, 0  ;;  %v3625_v44 = vsel %vm117_vm0, %v7802_v61, 0 }
 0x8c5   :  { %v3946_v62 = vmax.f32 %v3889_v18, 0.0  ;;  %v4027_v42 = vsel %vm117_vm0, %v3986_v13, 0 }
 0x8c6   :  { %v3775_v4 = vpack.c.bf16 %v3751_v63, %v3750_v21 }
 0x8c7   :  { %v3993_v58 = vpack.c.bf16 %v3946_v62, %v3945_v11  ;;  %4112 = vxpose.xlu1.c.b16.end [2/2] (short) (narrow) %v4448_v28, 16 }
 0x8c8   :  { %4400 = vmatmul.msk.bf16.gmra.mxu1 %vm117_vm0, %v3775_v4 }
 0x8c9   :  { %v4048_v25 = vsel %vm117_vm0, %v3993_v58, 0 }
 0x8ca   :  { %4050 = vmatpush.bf16.xpose.msrb.mxu3 %v4048_v25 }
 0x8cf   :  { %4008 = vxpose.xlu0.c.b16.end [2/2] (short) (narrow) %v4446_v56, 16 }
 0x8d2   :  { %4051 = vmatpush.bf16.xpose.msrb.mxu3 %v4045_v43 }
 0x8da   :  { %4052 = vmatpush.bf16.xpose.msrb.mxu3 %v4042_v52 }
 0x8e2   :  { %4053 = vmatpush.bf16.xpose.msrb.mxu3 %v4039_v3 }
 0x8ea   :  { %4054 = vmatpush.bf16.xpose.msrb.mxu3 %v4036_v36 }
 0x8f2   :  { %4055 = vmatpush.bf16.xpose.msrb.mxu3 %v4033_v17 }
 0x8fa   :  { %4056 = vmatpush.bf16.xpose.msrb.mxu3 %v4030_v35 }
 0x902   :  { %4057 = vmatpush.bf16.xpose.msrb.mxu3 %v4027_v42 }
 0x90a   :  { %4070 = vmatpush.bf16.xpose.msra.mxu3 %v3637_v60 }
 0x912   :  { %4071 = vmatpush.bf16.xpose.msra.mxu3 %v3634_v27 }
 0x914   :  { %v3708_v29 = vpop.f32.mrf.mxu2 }
 0x915   :  { %v3891_v39 = vpop.f32.mrf.mxu1  ;;  %v3709_v18 = vadd.f32 %v7909_v9, %v3708_v29 }
 0x916   :  { %v3892_v16 = vadd.f32 %v7860_v22, %v3891_v39 }
 0x917   :  { %v3752_v63 = vmax.f32 %v3709_v18, 0.0 }
 0x918   :  { %v3947_v62 = vmax.f32 %v3892_v16, 0.0 }
 0x91a   :  { %4072 = vmatpush.bf16.xpose.msra.mxu3 %v3631_v46 }
 0x91c   :  { %v3710_v47 = vpop.f32.mrf.mxu2 }
 0x91d   :  { %v3893_v21 = vpop.f32.mrf.mxu1  ;;  %v3711_v38 = vadd.f32 %v7909_v9, %v3710_v47 }
 0x91e   :  { %v3894_v11 = vadd.f32 %v7860_v22, %v3893_v21 }
 0x91f   :  { %v3753_v6 = vmax.f32 %v3711_v38, 0.0 }
 0x920   :  { %v3948_v4 = vmax.f32 %v3894_v11, 0.0 }
 0x921   :  { %v3776_v58 = vpack.c.bf16 %v3753_v6, %v3752_v63 }
 0x922   :  { %4073 = vmatpush.bf16.xpose.msra.mxu3 %v3628_v32  ;;  %v8006_v31 = vpack.c.bf16 %v3948_v4, %v3947_v62 }
 0x923   :  { %4401 = vmatmul.msk.bf16.gmra.mxu1 %vm117_vm0, %v3776_v58 }
 0x924   :  { %v3713_v25 = vpop.f32.mrf.mxu2 }
 0x925   :  { %v3896_v40 = vpop.f32.mrf.mxu1  ;;  %v3714_v1 = vadd.f32 %v7909_v9, %v3713_v25 }
 0x926   :  { %v3897_v24 = vadd.f32 %v7860_v22, %v3896_v40 }
 0x927   :  { %v3754_v61 = vmax.f32 %v3714_v1, 0.0  ;;  %v4415_v1 = vld [vmem:[%s8082_s3 + $0x1] sm:$0x1] }
 0x928   :  { %v3949_v52 = vmax.f32 %v3897_v24, 0.0 }
 0x92a   :  { %4074 = vmatpush.bf16.xpose.msra.mxu3 %v3625_v44 }
 0x92c   :  { %v3715_v49 = vpop.f32.mrf.mxu2 }
 0x92d   :  { %v3898_v43 = vpop.f32.mrf.mxu1  ;;  %v3716_v12 = vadd.f32 %v7909_v9, %v3715_v49  ;;  %v4066_v49 = vpack.c.bf16 %v4415_v1, %v4415_v1 }
 0x92e   :  { %v3899_v30 = vadd.f32 %v7860_v22, %v3898_v43 }
 0x92f   :  { %v3755_v37 = vmax.f32 %v3716_v12, 0.0 }
 0x930   :  { %v3950_v34 = vmax.f32 %v3899_v30, 0.0 }
 0x931   :  { %v3777_v59 = vpack.c.bf16 %v3755_v37, %v3754_v61 }
 0x932   :  { %4075 = vmatpush.bf16.xpose.msra.mxu3 %v3622_v33  ;;  %v8017_v3 = vpack.c.bf16 %v3950_v34, %v3949_v52 }
 0x933   :  { %4402 = vmatmul.msk.bf16.gmra.mxu1 %vm117_vm0, %v3777_v59 }
 0x934   :  { %v3718_v23 = vpop.f32.mrf.mxu2 }
 0x935   :  { %v3901_v50 = vpop.f32.mrf.mxu1  ;;  %v3719_v45 = vadd.f32 %v7909_v9, %v3718_v23 }
 0x936   :  { %v3902_v8 = vadd.f32 %v7860_v22, %v3901_v50 }
 0x937   :  { %v3756_v0 = vmax.f32 %v3719_v45, 0.0 }
 0x938   :  { %v3951_v48 = vmax.f32 %v3902_v8, 0.0 }
 0x93a   :  { %4076 = vmatpush.bf16.xpose.msra.mxu3 %v3619_v15 }
 0x93c   :  { %v3720_v53 = vpop.f32.mrf.mxu2 }
 0x93d   :  { %v3903_v14 = vpop.f32.mrf.mxu1  ;;  %v3721_v36 = vadd.f32 %v7909_v9, %v3720_v53  ;;  %v3977_v53 = vpop.f32.mrf.mxu3 }
 0x93e   :  { %v3904_v57 = vadd.f32 %v7860_v22, %v3903_v14  ;;  %3981 = vst [vmem:[#allocation2] sm:$0x1] %v3977_v53 }
 0x93f   :  { %v3757_v2 = vmax.f32 %v3721_v36, 0.0 }
 0x940   :  { %v3952_v10 = vmax.f32 %v3904_v57, 0.0  ;;  %v4134_v57 = vsel %vm117_vm0, %v8017_v3, 0 }
 0x941   :  { %v3778_v17 = vpack.c.bf16 %v3757_v2, %v3756_v0 }
 0x942   :  { %4077 = vmatpush.bf16.xpose.msra.mxu3 %v3616_v5  ;;  %v8031_v51 = vpack.c.bf16 %v3952_v10, %v3951_v48  ;;  %v3994_v48 = vld [vmem:[%s8081_s2] sm:$0xf] }
 0x943   :  { %4403 = vmatmul.msk.bf16.gmra.mxu1 %vm117_vm0, %v3778_v17 }
 0x944   :  { %v3723_v20 = vpop.f32.mrf.mxu2  ;;  %v4137_v14 = vsel %vm117_vm0, %v8031_v51, 0  ;;  %v4417_v51 = vld [vmem:[%s8081_s2 + $0x4] sm:$0xf] }
 0x945   :  { %v3724_v26 = vadd.f32 %v7909_v9, %v3723_v20  ;;  %v3906_v42 = vpop.f32.mrf.mxu1  ;;  %v3979_v36 = vpop.f32.mrf.mxu3 }
 0x946   :  { %v3907_v19 = vadd.f32 %v7860_v22, %v3906_v42 }
 0x947   :  { %v3758_v35 = vmax.f32 %v3724_v26, 0.0 }
 0x948   :  { %v3953_v5 = vmax.f32 %v3907_v19, 0.0 }
 0x94c   :  { %v3725_v7 = vpop.f32.mrf.mxu2 }
 0x94d   :  { %v3726_v55 = vadd.f32 %v7909_v9, %v3725_v7  ;;  %v3908_v60 = vpop.f32.mrf.mxu1 }
 0x94e   :  { %v3909_v15 = vadd.f32 %v7860_v22, %v3908_v60 }
 0x94f   :  { %v3759_v41 = vmax.f32 %v3726_v55, 0.0 }
 0x950   :  { %v3954_v23 = vmax.f32 %v3909_v15, 0.0 }
 0x951   :  { %v3779_v13 = vpack.c.bf16 %v3759_v41, %v3758_v35 }
 0x952   :  { %v4092_v45 = vpack.c.bf16 %v3954_v23, %v3953_v5 }
 0x953   :  { %4404 = vmatmul.msk.bf16.gmra.mxu1 %vm117_vm0, %v3779_v13 }
 0x954   :  { %v4140_v8 = vsel %vm117_vm0, %v4092_v45, 0 }
 0x963   :  { %v4119_v0 = vpop.trf.xlu1 }
 0x96b   :  { %v4015_v16 = vpop.trf.xlu0 }
 0x96c   :  { %4414 = vmatmul.msk.bf16.vlgmr.msrb.gmra.mxu3 %vm117_vm0, %v4015_v16 }
 0x97c   :  { %4416 = vmatmul.msk.bf16.vlgmr.msra.gmra.mxu3 %vm117_vm0, %v4066_v49 }
 0x9a0   :  { %v3911_v54 = vpop.f32.mrf.mxu1 }
 0x9a1   :  { %v3912_v27 = vadd.f32 %v7860_v22, %v3911_v54 }
 0x9a3   :  { %v3955_v39 = vmax.f32 %v3912_v27, 0.0 }
 0x9a8   :  { %v3913_v46 = vpop.f32.mrf.mxu1 }
 0x9a9   :  { %v3914_v29 = vadd.f32 %v7860_v22, %v3913_v46 }
 0x9ab   :  { %v3956_v56 = vmax.f32 %v3914_v29, 0.0 }
 0x9ad   :  { %v4093_v32 = vpack.c.bf16 %v3956_v56, %v3955_v39 }
 0x9af   :  { %v4143_v50 = vsel %vm117_vm0, %v4093_v32, 0 }
 0x9b0   :  { %v3916_v18 = vpop.f32.mrf.mxu1 }
 0x9b1   :  { %v3917_v30 = vadd.f32 %v7860_v22, %v3916_v18 }
 0x9b3   :  { %v3957_v37 = vmax.f32 %v3917_v30, 0.0 }
 0x9b8   :  { %v3918_v9 = vpop.f32.mrf.mxu1 }
 0x9b9   :  { %v3919_v43 = vadd.f32 %v7860_v22, %v3918_v9 }
 0x9bb   :  { %v3958_v61 = vmax.f32 %v3919_v43, 0.0 }
 0x9bd   :  { %v4094_v34 = vpack.c.bf16 %v3958_v61, %v3957_v37 }
 0x9bf   :  { %v4146_v59 = vsel %vm117_vm0, %v4094_v34, 0 }
 0x9c0   :  { %v3921_v47 = vpop.f32.mrf.mxu1 }
 0x9c1   :  { %v3922_v44 = vadd.f32 %v7860_v22, %v3921_v47 }
 0x9c3   :  { %v3959_v24 = vmax.f32 %v3922_v44, 0.0 }
 0x9c8   :  { %v3923_v21 = vpop.f32.mrf.mxu1 }
 0x9c9   :  { %v3924_v6 = vadd.f32 %v7860_v22, %v3923_v21 }
 0x9cb   :  { %v3960_v40 = vmax.f32 %v3924_v6, 0.0 }
 0x9cd   :  { %v4095_v12 = vpack.c.bf16 %v3960_v40, %v3959_v24 }
 0x9cf   :  { %v4149_v52 = vsel %vm117_vm0, %v4095_v12, 0 }
 0x9d0   :  { %v3926_v38 = vpop.f32.mrf.mxu1 }
 0x9d1   :  { %v3927_v11 = vadd.f32 %v7860_v22, %v3926_v38 }
 0x9d3   :  { %v3961_v4 = vmax.f32 %v3927_v11, 0.0 }
 0x9d8   :  { %v3928_v63 = vpop.f32.mrf.mxu1 }
 0x9d9   :  { %v3929_v62 = vadd.f32 %v7860_v22, %v3928_v63  ;;  %v4131_v22 = vsel %vm117_vm0, %v8006_v31, 0 }
 0x9db   :  { %v3962_v58 = vmax.f32 %v3929_v62, 0.0 }
 0x9dd   :  { %v4096_v25 = vpack.c.bf16 %v3962_v58, %v3961_v4 }
 0x9df   :  { %v4152_v33 = vsel %vm117_vm0, %v4096_v25, 0 }
 0x9e0   :  { %4154 = vmatpush.bf16.xpose.msrb.mxu3 %v4152_v33 }
 0x9e8   :  { %4155 = vmatpush.bf16.xpose.msrb.mxu3 %v4149_v52 }
 0x9ef   :  { %v4059_v2 = vpop.f32.mrf.mxu3 }
 0x9f0   :  { %4156 = vmatpush.bf16.xpose.msrb.mxu3 %v4146_v59  ;;  %v4060_v10 = vadd.f32 %v4059_v2, %v3994_v48 }
 0x9f2   :  { %4063 = vst [vmem:[#allocation4] sm:$0xf] %v4060_v10 }
 0x9f7   :  { %v4061_v17 = vpop.f32.mrf.mxu3 }
 0x9f8   :  { %4157 = vmatpush.bf16.xpose.msrb.mxu3 %v4143_v50 }
 0x9ff   :  { %v4079_v31 = vpop.f32.mrf.mxu3 }
 0xa00   :  { %4158 = vmatpush.bf16.xpose.msrb.mxu3 %v4140_v8  ;;  %4084 = vst [vmem:[#allocation2 + $0x1] sm:$0x1] %v4079_v31 }
 0xa01   :  { %4181 = dma.vmem_to_hbm [thread:$0]  %s4174_s17, 32, %s4176_s11, [#allocation3], %s4739_s19, %s4739_s19, %s4740_s20  }
 0xa07   :  { %v4081_v3 = vpop.f32.mrf.mxu3 }
 0xa08   :  { %4159 = vmatpush.bf16.xpose.msrb.mxu3 %v4137_v14 }
 0xa10   :  { %4160 = vmatpush.bf16.xpose.msrb.mxu3 %v4134_v57 }
 0xa18   :  { %4161 = vmatpush.bf16.xpose.msrb.mxu3 %v4131_v22 }
 0xa1f   :  { %4426 = vmatmul.msk.bf16.vlgmr.msrb.gmra.mxu3 %vm117_vm0, %v4119_v0 }
 0xaa2   :  { %v4163_v28 = vpop.f32.mrf.mxu3 }
 0xaa3   :  { %v4164_v20 = vadd.f32 %v4417_v51, %v4163_v28 }
 0xaa5   :  { %4168 = vst [vmem:[#allocation4 + $0x4] sm:$0xf] %v4164_v20 }
 0xaa6   :  { %4194 = dma.vmem_to_hbm [thread:$0]  %s4187_s22, 128, %s4189_s24, [#allocation5], %s4742_s13, %s4742_s13, %s4743_s9  }
 0xaaa   :  { %v4165_v26 = vpop.f32.mrf.mxu3 }
 0xaab   :  { %4733 = dma.done.wait [#allocation3], 32  }
 0xaac   :  { %4734 = vsyncadd [#allocation3], 4294967264 }
 0xaad   :  { %4735 = dma.done.wait [#allocation5], 128  }
 0xaae   :  { %4736 = vsyncadd [#allocation5], 4294967168 }
 0xaaf   :  { %4203 = vsyncpa [#allocation3], 1 }
 0xab0   :  { %4204 = vsyncpa [#allocation5], 1 }

</bundles_post_ra>
